<compile_context>
chip_gen: v7x
topology: tpu7x:2x2x1
jax: 0.10.0
libtpu: 0.0.40
codegen_flags: <defaults>
</compile_context>

<pallas_src>
import jax
import jax.numpy as jnp
from jax import lax
from jax.experimental import pallas as pl
from jax.experimental.pallas import tpu as pltpu

# ---------------------------------------------------------------------------
# Model constants
# ---------------------------------------------------------------------------
C_IN = 4                 # input channels
C1 = 16                  # conv1 out channels
C2 = 16                  # conv2 out channels
IMG_H = 16
IMG_W = 16
P = IMG_H * IMG_W        # 256 spatial positions, kept lane-dense
HIDDEN = 32
LN_EPS = 1e-5

CH_B = 4                 # samples processed per in-kernel chunk
CH_LANES = CH_B * P      # 1024 lanes per chunk (batch folded onto lanes)

# tap order t = (dh+1)*3 + (dw+1)  (matches the conv-weight packing below)
_TAPS = tuple((dh, dw) for dh in (-1, 0, 1) for dw in (-1, 0, 1))


def _round_up(x, m):
    return ((x + m - 1) // m) * m


# ---------------------------------------------------------------------------
# Fused kernel: conv1 -> conv2 -> flatten -> dense(+ReLU) -> LayerNorm
# Activation layout inside a chunk: (channels, CH_B*256) -- batch+position on
# the 128-lane axis, so conv matmuls are batched over samples.
# ---------------------------------------------------------------------------
def _lifelong_fused_kernel(x_ref, w1_ref, w2_ref, b1_ref, b2_ref, wh_ref,
                           ln_ref, o_ref, y1_ref, y2t_ref):
    tile_b = o_ref.shape[0]
    n_chunks = tile_b // CH_B

    # ---- per-tap boundary masks (pattern repeats every P lanes), built ONCE.
    pos = lax.broadcasted_iota(jnp.int32, (1, CH_LANES), 1)
    hh = (pos & (P - 1)) >> 4          # row within the 16x16 image
    ww = pos & (IMG_W - 1)             # col within the 16x16 image
    masks = {}
    for dh, dw in _TAPS:
        if dh == 0 and dw == 0:
            continue
        m = jnp.ones((1, CH_LANES), dtype=jnp.bool_)
        if dh < 0:
            m = m & (hh >= -dh)
        if dh > 0:
            m = m & (hh < IMG_H - dh)
        if dw < 0:
            m = m & (ww >= -dw)
        if dw > 0:
            m = m & (ww < IMG_W - dw)
        masks[(dh, dw)] = m

    def tap_slab(src, dh, dw):
        # src: (cin, CH_LANES) f32.  Returns the (dh, dw) tap of a 3x3 SAME
        # conv as a bf16 slab.  pltpu.roll only mixes data across sample /
        # image boundaries at positions that the mask zeroes, so wrap-around
        # is harmless.
        s = dh * IMG_W + dw
        shifted = pltpu.roll(src, shift=(-s) % CH_LANES, axis=1) if s else src
        if dh or dw:
            shifted = jnp.where(masks[(dh, dw)], shifted, 0.0)
        return shifted.astype(jnp.bfloat16)

    def conv1_chunk(off):
        # 3x3 SAME, 4 -> 16, bias, ReLU.  9 tap-accumulated dots (K=4 each);
        # the x slab is re-read from VMEM per tap to keep live ranges short.
        acc = jnp.zeros((C1, CH_LANES), jnp.float32)
        for t, (dh, dw) in enumerate(_TAPS):
            slab = tap_slab(x_ref[:, off:off + CH_LANES], dh, dw)
            acc = acc + jnp.dot(w1_ref[t], slab,
                                preferred_element_type=jnp.float32)
        return jnp.maximum(acc + b1_ref[...], 0.0)

    def conv2_chunk():
        # 3x3 SAME, 16 -> 16, bias, ReLU.  3 row-grouped dots (K=48 each);
        # the 16-row bf16 slabs concatenate on aligned sublane tiles.
        acc = jnp.zeros((C2, CH_LANES), jnp.float32)
        for g, dh in enumerate((-1, 0, 1)):
            slab = jnp.concatenate(
                [tap_slab(y1_ref[...], dh, dw) for dw in (-1, 0, 1)], axis=0)
            acc = acc + jnp.dot(w2_ref[g], slab,
                                preferred_element_type=jnp.float32)
        return jnp.maximum(acc + b2_ref[...], 0.0)

    for ck in range(n_chunks):                     # static Python loop
        off = ck * CH_LANES

        # conv1 -> VMEM scratch (conv2 re-reads it per tap)
        y1_ref[...] = conv1_chunk(off)

        # conv2, cast to bf16 for the dense matmuls
        y2 = conv2_chunk().astype(jnp.bfloat16)

        # bridge: cheap per-sample lane slices -> sample-major scratch
        for s in range(CH_B):
            y2t_ref[s] = y2[:, s * P:(s + 1) * P]

        # flatten (NCHW order == (channel, position)) + Dense(4096->32) + ReLU
        acc = jnp.zeros((CH_B, HIDDEN), jnp.float32)
        for c in range(C2):
            acc = acc + jnp.dot(y2t_ref[:, c, :], wh_ref[c],
                                preferred_element_type=jnp.float32)
        hdn = jnp.maximum(acc + ln_ref[0:1, :], 0.0)

        # LayerNorm (biased variance, eps=1e-5; torch semantics)
        mean = jnp.mean(hdn, axis=-1, keepdims=True)
        cen = hdn - mean
        var = jnp.mean(cen * cen, axis=-1, keepdims=True)
        inv = lax.rsqrt(var + LN_EPS)
        o_ref[ck * CH_B:(ck + 1) * CH_B, :] = (
            cen * inv * ln_ref[1:2, :] + ln_ref[2:3, :])


# ---------------------------------------------------------------------------
# Wrapper
# ---------------------------------------------------------------------------
def _pack_w1(w):
    # (3, 3, cin, cout) -> (9, cout, cin); tap index t = kh*3 + kw
    kh, kw, cin, cout = w.shape
    return jnp.transpose(w, (0, 1, 3, 2)).reshape(kh * kw, cout, cin)


def _pack_w2(w):
    # (3, 3, cin, cout) -> (3, cout, 3*cin); row-group g = kh, cols = kw*cin+ci
    kh, kw, cin, cout = w.shape
    return jnp.transpose(w, (0, 3, 1, 2)).reshape(kh, cout, kw * cin)


def lifelong_network_forward(params, x_nchw):
    """Fused forward of _LifelongNetwork.  x_nchw: (B,4,16,16) f32 -> (B,32)."""
    B = x_nchw.shape[0]

    # Batch-tile selection: tiny batches run in one grid step; anything larger
    # gets >= 2 steps so the "parallel" grid axis keeps both v7x TensorCores
    # busy.  Cap at 32 samples/step (trace size + VMEM headroom on v7x).
    b_pad = _round_up(B, CH_B)
    if b_pad <= 2 * CH_B:
        tile_b = b_pad
    else:
        tile_b = min(32, _round_up(b_pad // 2, 8))
        b_pad = _round_up(b_pad, tile_b)
    nb = b_pad // tile_b

    # NCHW -> (C, B, P) (one small one-off copy; the old 4->8 channel pad is
    # gone) -> flatten batch onto the lane axis.
    x = x_nchw.astype(jnp.float32).reshape(B, C_IN, P)
    x = jnp.transpose(x, (1, 0, 2))
    if b_pad != B:
        x = jnp.pad(x, ((0, 0), (0, b_pad - B), (0, 0)))
    x = x.reshape(C_IN, b_pad * P)

    # bf16 matmul operands (f32 accumulation happens in-kernel).
    w1 = _pack_w1(params["w_conv1"]).astype(jnp.bfloat16)       # (9, 16, 4)
    w2 = _pack_w2(params["w_conv2"]).astype(jnp.bfloat16)       # (3, 16, 48)
    b1 = params["b_conv1"].astype(jnp.float32).reshape(C1, 1)
    b2 = params["b_conv2"].astype(jnp.float32).reshape(C2, 1)
    wh = params["w_hidden"].astype(jnp.bfloat16).reshape(C2, P, HIDDEN)
    ln = jnp.stack([params["b_hidden"], params["ln_gamma"],
                    params["ln_beta"]]).astype(jnp.float32)     # (3, 32)

    flops_per_sample = (2 * P * (9 * C_IN * C1 + 9 * C1 * C2)
                        + 2 * (C2 * P) * HIDDEN)
    cost = pl.CostEstimate(
        flops=b_pad * flops_per_sample,
        transcendentals=b_pad,
        bytes_accessed=(4 * x.size + 2 * (w1.size + w2.size + wh.size)
                        + 4 * (b1.size + b2.size + ln.size + b_pad * HIDDEN)))

    out = pl.pallas_call(
        _lifelong_fused_kernel,
        out_shape=jax.ShapeDtypeStruct((b_pad, HIDDEN), jnp.float32),
        grid_spec=pltpu.PrefetchScalarGridSpec(
            num_scalar_prefetch=0,
            grid=(nb,),
            in_specs=[
                pl.BlockSpec((C_IN, tile_b * P), lambda i: (0, i)),    # x tile
                pl.BlockSpec((9, C1, C_IN), lambda i: (0, 0, 0)),      # conv1 w
                pl.BlockSpec((3, C2, 3 * C1), lambda i: (0, 0, 0)),    # conv2 w
                pl.BlockSpec((C1, 1), lambda i: (0, 0)),               # conv1 b
                pl.BlockSpec((C2, 1), lambda i: (0, 0)),               # conv2 b
                pl.BlockSpec((C2, P, HIDDEN), lambda i: (0, 0, 0)),    # dense w
                pl.BlockSpec((3, HIDDEN), lambda i: (0, 0)),           # b/gamma/beta
            ],
            out_specs=pl.BlockSpec((tile_b, HIDDEN), lambda i: (i, 0)),
            scratch_shapes=[
                pltpu.VMEM((C1, CH_LANES), jnp.float32),    # conv1 activations
                pltpu.VMEM((CH_B, C2, P), jnp.bfloat16),    # conv2 out, sample-major
            ],
        ),
        compiler_params=pltpu.CompilerParams(
            dimension_semantics=("parallel",),      # batch tiles independent
            vmem_limit_bytes=32 * 1024 * 1024,
        ),
        cost_estimate=cost,
    )(x, w1, w2, b1, b2, wh, ln)
    return out[:B]


# ---------------------------------------------------------------------------
# Parameters (deterministic init) and pure-JAX reference
# ---------------------------------------------------------------------------
def init_params(key):
    ks = jax.random.split(key, 6)

    def dense_init(k, fan_in, shape):
        return jax.random.normal(k, shape, jnp.float32) / jnp.sqrt(float(fan_in))

    return {
        # conv weights kept in (kh, kw, cin, cout); real torch Conv2d weights
        # (cout, cin, kh, kw) would be transposed to this layout when loaded.
        "w_conv1": dense_init(ks[0], 9 * C_IN, (3, 3, C_IN, C1)),
        "b_conv1": 0.1 * jax.random.normal(ks[1], (C1,), jnp.float32),
        "w_conv2": dense_init(ks[2], 9 * C1, (3, 3, C1, C2)),
        "b_conv2": 0.1 * jax.random.normal(ks[3], (C2,), jnp.float32),
        # nn.Linear stores (out, in); kept here as (in, out) with the input
        # axis in NCHW-flatten order (real torch weights load as weight.T).
        "w_hidden": dense_init(ks[4], C2 * P, (C2 * P, HIDDEN)),
        "b_hidden": 0.1 * jax.random.normal(ks[5], (HIDDEN,), jnp.float32),
        "ln_gamma": jnp.ones((HIDDEN,), jnp.float32),
        "ln_beta": jnp.zeros((HIDDEN,), jnp.float32),
    }


def reference_forward(params, x_nchw, matmul_dtype=jnp.float32):
    """Pure-JAX reference.  matmul_dtype=bfloat16 mirrors the kernel's MXU
    operand precision (accumulation stays float32)."""
    c = lambda a: a.astype(matmul_dtype)
    dn = ("NCHW", "HWIO", "NCHW")
    y = lax.conv_general_dilated(c(x_nchw), c(params["w_conv1"]), (1, 1),
                                 "SAME", dimension_numbers=dn,
                                 preferred_element_type=jnp.float32)
    y = jax.nn.relu(y + params["b_conv1"].reshape(1, C1, 1, 1))
    y = lax.conv_general_dilated(c(y), c(params["w_conv2"]), (1, 1),
                                 "SAME", dimension_numbers=dn,
                                 preferred_element_type=jnp.float32)
    y = jax.nn.relu(y + params["b_conv2"].reshape(1, C2, 1, 1))
    y = y.reshape(y.shape[0], -1)                      # nn.Flatten on NCHW
    h = jnp.dot(c(y), c(params["w_hidden"]), preferred_element_type=jnp.float32)
    h = jax.nn.relu(h + params["b_hidden"])
    mean = jnp.mean(h, axis=-1, keepdims=True)
    var = jnp.mean((h - mean) ** 2, axis=-1, keepdims=True)
    return ((h - mean) / jnp.sqrt(var + LN_EPS) * params["ln_gamma"]
            + params["ln_beta"])


# ---------------------------------------------------------------------------
# Demo
# ---------------------------------------------------------------------------
if __name__ == "__main__":
    key = jax.random.PRNGKey(0)
    k_param, k_x = jax.random.split(key)

    params = init_params(k_param)
    x = jax.random.normal(k_x, (2, C_IN, IMG_H, IMG_W), jnp.float32)   # NCHW

    fwd = jax.jit(lifelong_network_forward)
    out = jax.block_until_ready(fwd(params, x))

    assert out.shape == (2, HIDDEN), out.shape
    assert out.dtype == jnp.float32
    assert bool(jnp.all(jnp.isfinite(out)))

    # Structural check: reference with the SAME bf16 matmul-operand precision
    # as the kernel (f32 accumulation) -- must match tightly.
    ref_bf16 = jax.block_until_ready(
        jax.jit(lambda p, xx: reference_forward(p, xx, jnp.bfloat16))(params, x))
    err_struct = float(jnp.max(jnp.abs(out - ref_bf16)))
    assert err_struct < 2e-3, f"structural mismatch vs bf16 reference: {err_struct}"

    # Drift check: pure-f32 reference (torch semantics); loose bound only
    # covers the bf16 operand quantisation.
    ref_f32 = jax.block_until_ready(jax.jit(reference_forward)(params, x))
    err_drift = float(jnp.max(jnp.abs(out - ref_f32)))
    assert err_drift < 1e-1, f"drift vs f32 reference too large: {err_drift}"

    print("KERNEL_OK")
</pallas_src>

<mosaic_0001>
module attributes {stable_mosaic.version = 11 : i64} {
  func.func @_lifelong_fused_kernel(%arg0: i32, %arg1: memref<4x1024xf32, #tpu.memory_space<vmem>>, %arg2: memref<9x16x4xbf16, #tpu.memory_space<vmem>>, %arg3: memref<3x16x48xbf16, #tpu.memory_space<vmem>>, %arg4: memref<16x1xf32, #tpu.memory_space<vmem>>, %arg5: memref<16x1xf32, #tpu.memory_space<vmem>>, %arg6: memref<16x256x32xbf16, #tpu.memory_space<vmem>>, %arg7: memref<3x32xf32, #tpu.memory_space<vmem>>, %arg8: memref<4x32xf32, #tpu.memory_space<vmem>>, %arg9: memref<16x1024xf32, #tpu.memory_space<vmem>>, %arg10: memref<4x16x256xbf16, #tpu.memory_space<vmem>>) attributes {dimension_semantics = [#tpu.dimension_semantics<parallel>], iteration_bounds = array<i64: 1>, scalar_prefetch = 0 : i64, scratch_operands = 2 : i64, tpu.core_type = #tpu.core_type<tc>, window_params = [{transform_indices = @transform_0, window_bounds = array<i64: 4, 1024>}, {pipeline_mode = #tpu.pipeline_mode<synchronous>, transform_indices = @transform_1, window_bounds = array<i64: 9, 16, 4>}, {pipeline_mode = #tpu.pipeline_mode<synchronous>, transform_indices = @transform_2, window_bounds = array<i64: 3, 16, 48>}, {pipeline_mode = #tpu.pipeline_mode<synchronous>, transform_indices = @transform_3, window_bounds = array<i64: 16, 1>}, {pipeline_mode = #tpu.pipeline_mode<synchronous>, transform_indices = @transform_4, window_bounds = array<i64: 16, 1>}, {pipeline_mode = #tpu.pipeline_mode<synchronous>, transform_indices = @transform_5, window_bounds = array<i64: 16, 256, 32>}, {pipeline_mode = #tpu.pipeline_mode<synchronous>, transform_indices = @transform_6, window_bounds = array<i64: 3, 32>}, {transform_indices = @transform_7, window_bounds = array<i64: 4, 32>}]} {
    %0 = tpu.iota {dimensions = array<i32: 1>} : vector<1x1024xi32>
    %c255_i32 = arith.constant 255 : i32
    %1 = vector.broadcast %c255_i32 : i32 to vector<1x1024xi32>
    %2 = arith.andi %0, %1 : vector<1x1024xi32>
    %c4_i32 = arith.constant 4 : i32
    %3 = vector.broadcast %c4_i32 : i32 to vector<1x1024xi32>
    %4 = arith.shrsi %2, %3 : vector<1x1024xi32>
    %c15_i32 = arith.constant 15 : i32
    %5 = vector.broadcast %c15_i32 : i32 to vector<1x1024xi32>
    %6 = arith.andi %0, %5 : vector<1x1024xi32>
    %true = arith.constant true
    %7 = vector.broadcast %true : i1 to vector<1x1024xi1>
    %c1_i32 = arith.constant 1 : i32
    %8 = vector.broadcast %c1_i32 : i32 to vector<1x1024xi32>
    %9 = arith.cmpi sge, %4, %8 : vector<1x1024xi32>
    %10 = arith.andi %7, %9 : vector<1x1024xi1>
    %c1_i32_0 = arith.constant 1 : i32
    %11 = vector.broadcast %c1_i32_0 : i32 to vector<1x1024xi32>
    %12 = arith.cmpi sge, %6, %11 : vector<1x1024xi32>
    %13 = arith.andi %10, %12 : vector<1x1024xi1>
    %true_1 = arith.constant true
    %14 = vector.broadcast %true_1 : i1 to vector<1x1024xi1>
    %c1_i32_2 = arith.constant 1 : i32
    %15 = vector.broadcast %c1_i32_2 : i32 to vector<1x1024xi32>
    %16 = arith.cmpi sge, %4, %15 : vector<1x1024xi32>
    %17 = arith.andi %14, %16 : vector<1x1024xi1>
    %true_3 = arith.constant true
    %18 = vector.broadcast %true_3 : i1 to vector<1x1024xi1>
    %c1_i32_4 = arith.constant 1 : i32
    %19 = vector.broadcast %c1_i32_4 : i32 to vector<1x1024xi32>
    %20 = arith.cmpi sge, %4, %19 : vector<1x1024xi32>
    %21 = arith.andi %18, %20 : vector<1x1024xi1>
    %c15_i32_5 = arith.constant 15 : i32
    %22 = vector.broadcast %c15_i32_5 : i32 to vector<1x1024xi32>
    %23 = arith.cmpi slt, %6, %22 : vector<1x1024xi32>
    %24 = arith.andi %21, %23 : vector<1x1024xi1>
    %true_6 = arith.constant true
    %25 = vector.broadcast %true_6 : i1 to vector<1x1024xi1>
    %c1_i32_7 = arith.constant 1 : i32
    %26 = vector.broadcast %c1_i32_7 : i32 to vector<1x1024xi32>
    %27 = arith.cmpi sge, %6, %26 : vector<1x1024xi32>
    %28 = arith.andi %25, %27 : vector<1x1024xi1>
    %true_8 = arith.constant true
    %29 = vector.broadcast %true_8 : i1 to vector<1x1024xi1>
    %c15_i32_9 = arith.constant 15 : i32
    %30 = vector.broadcast %c15_i32_9 : i32 to vector<1x1024xi32>
    %31 = arith.cmpi slt, %6, %30 : vector<1x1024xi32>
    %32 = arith.andi %29, %31 : vector<1x1024xi1>
    %true_10 = arith.constant true
    %33 = vector.broadcast %true_10 : i1 to vector<1x1024xi1>
    %c15_i32_11 = arith.constant 15 : i32
    %34 = vector.broadcast %c15_i32_11 : i32 to vector<1x1024xi32>
    %35 = arith.cmpi slt, %4, %34 : vector<1x1024xi32>
    %36 = arith.andi %33, %35 : vector<1x1024xi1>
    %c1_i32_12 = arith.constant 1 : i32
    %37 = vector.broadcast %c1_i32_12 : i32 to vector<1x1024xi32>
    %38 = arith.cmpi sge, %6, %37 : vector<1x1024xi32>
    %39 = arith.andi %36, %38 : vector<1x1024xi1>
    %true_13 = arith.constant true
    %40 = vector.broadcast %true_13 : i1 to vector<1x1024xi1>
    %c15_i32_14 = arith.constant 15 : i32
    %41 = vector.broadcast %c15_i32_14 : i32 to vector<1x1024xi32>
    %42 = arith.cmpi slt, %4, %41 : vector<1x1024xi32>
    %43 = arith.andi %40, %42 : vector<1x1024xi1>
    %true_15 = arith.constant true
    %44 = vector.broadcast %true_15 : i1 to vector<1x1024xi1>
    %c15_i32_16 = arith.constant 15 : i32
    %45 = vector.broadcast %c15_i32_16 : i32 to vector<1x1024xi32>
    %46 = arith.cmpi slt, %4, %45 : vector<1x1024xi32>
    %47 = arith.andi %44, %46 : vector<1x1024xi1>
    %c15_i32_17 = arith.constant 15 : i32
    %48 = vector.broadcast %c15_i32_17 : i32 to vector<1x1024xi32>
    %49 = arith.cmpi slt, %6, %48 : vector<1x1024xi32>
    %50 = arith.andi %47, %49 : vector<1x1024xi1>
    %cst = arith.constant 0.000000e+00 : f32
    %51 = vector.broadcast %cst : f32 to vector<16x1024xf32>
    %c0 = arith.constant 0 : index
    %c0_18 = arith.constant 0 : index
    %52 = vector.load %arg1[%c0, %c0_18] : memref<4x1024xf32, #tpu.memory_space<vmem>>, vector<4x1024xf32>
    %c17_i32 = arith.constant 17 : i32
    %53 = tpu.dynamic_rotate %52 by %c17_i32 dim 1 : vector<4x1024xf32>, i32 -> vector<4x1024xf32>
    %cst_19 = arith.constant 0.000000e+00 : f32
    %54 = vector.shape_cast %13 : vector<1x1024xi1> to vector<1x1024xi1>
    %55 = vector.broadcast %54 : vector<1x1024xi1> to vector<4x1024xi1>
    %56 = vector.broadcast %cst_19 : f32 to vector<4x1024xf32>
    %57 = arith.select %55, %53, %56 : vector<4x1024xi1>, vector<4x1024xf32>
    %58 = arith.truncf %57 : vector<4x1024xf32> to vector<4x1024xbf16>
    %c0_20 = arith.constant 0 : index
    %c0_21 = arith.constant 0 : index
    %c0_22 = arith.constant 0 : index
    %59 = vector.load %arg2[%c0_20, %c0_21, %c0_22] : memref<9x16x4xbf16, #tpu.memory_space<vmem>>, vector<1x16x4xbf16>
    %60 = vector.shape_cast %59 : vector<1x16x4xbf16> to vector<16x4xbf16>
    %cst_23 = arith.constant dense<0.000000e+00> : vector<16x1024xf32>
    %61 = tpu.matmul %60, %58, %cst_23 {dimension_numbers = #tpu.dot_dimension_numbers<[1], [0], [0], [1], [0, 0, 1, 1], [], []>} : vector<16x4xbf16>, vector<4x1024xbf16>, vector<16x1024xf32> -> vector<16x1024xf32>
    %62 = arith.addf %51, %61 : vector<16x1024xf32>
    %c0_24 = arith.constant 0 : index
    %c0_25 = arith.constant 0 : index
    %63 = vector.load %arg1[%c0_24, %c0_25] : memref<4x1024xf32, #tpu.memory_space<vmem>>, vector<4x1024xf32>
    %c16_i32 = arith.constant 16 : i32
    %64 = tpu.dynamic_rotate %63 by %c16_i32 dim 1 : vector<4x1024xf32>, i32 -> vector<4x1024xf32>
    %cst_26 = arith.constant 0.000000e+00 : f32
    %65 = vector.shape_cast %17 : vector<1x1024xi1> to vector<1x1024xi1>
    %66 = vector.broadcast %65 : vector<1x1024xi1> to vector<4x1024xi1>
    %67 = vector.broadcast %cst_26 : f32 to vector<4x1024xf32>
    %68 = arith.select %66, %64, %67 : vector<4x1024xi1>, vector<4x1024xf32>
    %69 = arith.truncf %68 : vector<4x1024xf32> to vector<4x1024xbf16>
    %c1 = arith.constant 1 : index
    %c0_27 = arith.constant 0 : index
    %c0_28 = arith.constant 0 : index
    %70 = vector.load %arg2[%c1, %c0_27, %c0_28] : memref<9x16x4xbf16, #tpu.memory_space<vmem>>, vector<1x16x4xbf16>
    %71 = vector.shape_cast %70 : vector<1x16x4xbf16> to vector<16x4xbf16>
    %cst_29 = arith.constant dense<0.000000e+00> : vector<16x1024xf32>
    %72 = tpu.matmul %71, %69, %cst_29 {dimension_numbers = #tpu.dot_dimension_numbers<[1], [0], [0], [1], [0, 0, 1, 1], [], []>} : vector<16x4xbf16>, vector<4x1024xbf16>, vector<16x1024xf32> -> vector<16x1024xf32>
    %73 = arith.addf %62, %72 : vector<16x1024xf32>
    %c0_30 = arith.constant 0 : index
    %c0_31 = arith.constant 0 : index
    %74 = vector.load %arg1[%c0_30, %c0_31] : memref<4x1024xf32, #tpu.memory_space<vmem>>, vector<4x1024xf32>
    %c15_i32_32 = arith.constant 15 : i32
    %75 = tpu.dynamic_rotate %74 by %c15_i32_32 dim 1 : vector<4x1024xf32>, i32 -> vector<4x1024xf32>
    %cst_33 = arith.constant 0.000000e+00 : f32
    %76 = vector.shape_cast %24 : vector<1x1024xi1> to vector<1x1024xi1>
    %77 = vector.broadcast %76 : vector<1x1024xi1> to vector<4x1024xi1>
    %78 = vector.broadcast %cst_33 : f32 to vector<4x1024xf32>
    %79 = arith.select %77, %75, %78 : vector<4x1024xi1>, vector<4x1024xf32>
    %80 = arith.truncf %79 : vector<4x1024xf32> to vector<4x1024xbf16>
    %c2 = arith.constant 2 : index
    %c0_34 = arith.constant 0 : index
    %c0_35 = arith.constant 0 : index
    %81 = vector.load %arg2[%c2, %c0_34, %c0_35] : memref<9x16x4xbf16, #tpu.memory_space<vmem>>, vector<1x16x4xbf16>
    %82 = vector.shape_cast %81 : vector<1x16x4xbf16> to vector<16x4xbf16>
    %cst_36 = arith.constant dense<0.000000e+00> : vector<16x1024xf32>
    %83 = tpu.matmul %82, %80, %cst_36 {dimension_numbers = #tpu.dot_dimension_numbers<[1], [0], [0], [1], [0, 0, 1, 1], [], []>} : vector<16x4xbf16>, vector<4x1024xbf16>, vector<16x1024xf32> -> vector<16x1024xf32>
    %84 = arith.addf %73, %83 : vector<16x1024xf32>
    %c0_37 = arith.constant 0 : index
    %c0_38 = arith.constant 0 : index
    %85 = vector.load %arg1[%c0_37, %c0_38] : memref<4x1024xf32, #tpu.memory_space<vmem>>, vector<4x1024xf32>
    %c1_i32_39 = arith.constant 1 : i32
    %86 = tpu.dynamic_rotate %85 by %c1_i32_39 dim 1 : vector<4x1024xf32>, i32 -> vector<4x1024xf32>
    %cst_40 = arith.constant 0.000000e+00 : f32
    %87 = vector.shape_cast %28 : vector<1x1024xi1> to vector<1x1024xi1>
    %88 = vector.broadcast %87 : vector<1x1024xi1> to vector<4x1024xi1>
    %89 = vector.broadcast %cst_40 : f32 to vector<4x1024xf32>
    %90 = arith.select %88, %86, %89 : vector<4x1024xi1>, vector<4x1024xf32>
    %91 = arith.truncf %90 : vector<4x1024xf32> to vector<4x1024xbf16>
    %c3 = arith.constant 3 : index
    %c0_41 = arith.constant 0 : index
    %c0_42 = arith.constant 0 : index
    %92 = vector.load %arg2[%c3, %c0_41, %c0_42] : memref<9x16x4xbf16, #tpu.memory_space<vmem>>, vector<1x16x4xbf16>
    %93 = vector.shape_cast %92 : vector<1x16x4xbf16> to vector<16x4xbf16>
    %cst_43 = arith.constant dense<0.000000e+00> : vector<16x1024xf32>
    %94 = tpu.matmul %93, %91, %cst_43 {dimension_numbers = #tpu.dot_dimension_numbers<[1], [0], [0], [1], [0, 0, 1, 1], [], []>} : vector<16x4xbf16>, vector<4x1024xbf16>, vector<16x1024xf32> -> vector<16x1024xf32>
    %95 = arith.addf %84, %94 : vector<16x1024xf32>
    %c0_44 = arith.constant 0 : index
    %c0_45 = arith.constant 0 : index
    %96 = vector.load %arg1[%c0_44, %c0_45] : memref<4x1024xf32, #tpu.memory_space<vmem>>, vector<4x1024xf32>
    %97 = arith.truncf %96 : vector<4x1024xf32> to vector<4x1024xbf16>
    %c4 = arith.constant 4 : index
    %c0_46 = arith.constant 0 : index
    %c0_47 = arith.constant 0 : index
    %98 = vector.load %arg2[%c4, %c0_46, %c0_47] : memref<9x16x4xbf16, #tpu.memory_space<vmem>>, vector<1x16x4xbf16>
    %99 = vector.shape_cast %98 : vector<1x16x4xbf16> to vector<16x4xbf16>
    %cst_48 = arith.constant dense<0.000000e+00> : vector<16x1024xf32>
    %100 = tpu.matmul %99, %97, %cst_48 {dimension_numbers = #tpu.dot_dimension_numbers<[1], [0], [0], [1], [0, 0, 1, 1], [], []>} : vector<16x4xbf16>, vector<4x1024xbf16>, vector<16x1024xf32> -> vector<16x1024xf32>
    %101 = arith.addf %95, %100 : vector<16x1024xf32>
    %c0_49 = arith.constant 0 : index
    %c0_50 = arith.constant 0 : index
    %102 = vector.load %arg1[%c0_49, %c0_50] : memref<4x1024xf32, #tpu.memory_space<vmem>>, vector<4x1024xf32>
    %c1023_i32 = arith.constant 1023 : i32
    %103 = tpu.dynamic_rotate %102 by %c1023_i32 dim 1 : vector<4x1024xf32>, i32 -> vector<4x1024xf32>
    %cst_51 = arith.constant 0.000000e+00 : f32
    %104 = vector.shape_cast %32 : vector<1x1024xi1> to vector<1x1024xi1>
    %105 = vector.broadcast %104 : vector<1x1024xi1> to vector<4x1024xi1>
    %106 = vector.broadcast %cst_51 : f32 to vector<4x1024xf32>
    %107 = arith.select %105, %103, %106 : vector<4x1024xi1>, vector<4x1024xf32>
    %108 = arith.truncf %107 : vector<4x1024xf32> to vector<4x1024xbf16>
    %c5 = arith.constant 5 : index
    %c0_52 = arith.constant 0 : index
    %c0_53 = arith.constant 0 : index
    %109 = vector.load %arg2[%c5, %c0_52, %c0_53] : memref<9x16x4xbf16, #tpu.memory_space<vmem>>, vector<1x16x4xbf16>
    %110 = vector.shape_cast %109 : vector<1x16x4xbf16> to vector<16x4xbf16>
    %cst_54 = arith.constant dense<0.000000e+00> : vector<16x1024xf32>
    %111 = tpu.matmul %110, %108, %cst_54 {dimension_numbers = #tpu.dot_dimension_numbers<[1], [0], [0], [1], [0, 0, 1, 1], [], []>} : vector<16x4xbf16>, vector<4x1024xbf16>, vector<16x1024xf32> -> vector<16x1024xf32>
    %112 = arith.addf %101, %111 : vector<16x1024xf32>
    %c0_55 = arith.constant 0 : index
    %c0_56 = arith.constant 0 : index
    %113 = vector.load %arg1[%c0_55, %c0_56] : memref<4x1024xf32, #tpu.memory_space<vmem>>, vector<4x1024xf32>
    %c1009_i32 = arith.constant 1009 : i32
    %114 = tpu.dynamic_rotate %113 by %c1009_i32 dim 1 : vector<4x1024xf32>, i32 -> vector<4x1024xf32>
    %cst_57 = arith.constant 0.000000e+00 : f32
    %115 = vector.shape_cast %39 : vector<1x1024xi1> to vector<1x1024xi1>
    %116 = vector.broadcast %115 : vector<1x1024xi1> to vector<4x1024xi1>
    %117 = vector.broadcast %cst_57 : f32 to vector<4x1024xf32>
    %118 = arith.select %116, %114, %117 : vector<4x1024xi1>, vector<4x1024xf32>
    %119 = arith.truncf %118 : vector<4x1024xf32> to vector<4x1024xbf16>
    %c6 = arith.constant 6 : index
    %c0_58 = arith.constant 0 : index
    %c0_59 = arith.constant 0 : index
    %120 = vector.load %arg2[%c6, %c0_58, %c0_59] : memref<9x16x4xbf16, #tpu.memory_space<vmem>>, vector<1x16x4xbf16>
    %121 = vector.shape_cast %120 : vector<1x16x4xbf16> to vector<16x4xbf16>
    %cst_60 = arith.constant dense<0.000000e+00> : vector<16x1024xf32>
    %122 = tpu.matmul %121, %119, %cst_60 {dimension_numbers = #tpu.dot_dimension_numbers<[1], [0], [0], [1], [0, 0, 1, 1], [], []>} : vector<16x4xbf16>, vector<4x1024xbf16>, vector<16x1024xf32> -> vector<16x1024xf32>
    %123 = arith.addf %112, %122 : vector<16x1024xf32>
    %c0_61 = arith.constant 0 : index
    %c0_62 = arith.constant 0 : index
    %124 = vector.load %arg1[%c0_61, %c0_62] : memref<4x1024xf32, #tpu.memory_space<vmem>>, vector<4x1024xf32>
    %c1008_i32 = arith.constant 1008 : i32
    %125 = tpu.dynamic_rotate %124 by %c1008_i32 dim 1 : vector<4x1024xf32>, i32 -> vector<4x1024xf32>
    %cst_63 = arith.constant 0.000000e+00 : f32
    %126 = vector.shape_cast %43 : vector<1x1024xi1> to vector<1x1024xi1>
    %127 = vector.broadcast %126 : vector<1x1024xi1> to vector<4x1024xi1>
    %128 = vector.broadcast %cst_63 : f32 to vector<4x1024xf32>
    %129 = arith.select %127, %125, %128 : vector<4x1024xi1>, vector<4x1024xf32>
    %130 = arith.truncf %129 : vector<4x1024xf32> to vector<4x1024xbf16>
    %c7 = arith.constant 7 : index
    %c0_64 = arith.constant 0 : index
    %c0_65 = arith.constant 0 : index
    %131 = vector.load %arg2[%c7, %c0_64, %c0_65] : memref<9x16x4xbf16, #tpu.memory_space<vmem>>, vector<1x16x4xbf16>
    %132 = vector.shape_cast %131 : vector<1x16x4xbf16> to vector<16x4xbf16>
    %cst_66 = arith.constant dense<0.000000e+00> : vector<16x1024xf32>
    %133 = tpu.matmul %132, %130, %cst_66 {dimension_numbers = #tpu.dot_dimension_numbers<[1], [0], [0], [1], [0, 0, 1, 1], [], []>} : vector<16x4xbf16>, vector<4x1024xbf16>, vector<16x1024xf32> -> vector<16x1024xf32>
    %134 = arith.addf %123, %133 : vector<16x1024xf32>
    %c0_67 = arith.constant 0 : index
    %c0_68 = arith.constant 0 : index
    %135 = vector.load %arg1[%c0_67, %c0_68] : memref<4x1024xf32, #tpu.memory_space<vmem>>, vector<4x1024xf32>
    %c1007_i32 = arith.constant 1007 : i32
    %136 = tpu.dynamic_rotate %135 by %c1007_i32 dim 1 : vector<4x1024xf32>, i32 -> vector<4x1024xf32>
    %cst_69 = arith.constant 0.000000e+00 : f32
    %137 = vector.shape_cast %50 : vector<1x1024xi1> to vector<1x1024xi1>
    %138 = vector.broadcast %137 : vector<1x1024xi1> to vector<4x1024xi1>
    %139 = vector.broadcast %cst_69 : f32 to vector<4x1024xf32>
    %140 = arith.select %138, %136, %139 : vector<4x1024xi1>, vector<4x1024xf32>
    %141 = arith.truncf %140 : vector<4x1024xf32> to vector<4x1024xbf16>
    %c8 = arith.constant 8 : index
    %c0_70 = arith.constant 0 : index
    %c0_71 = arith.constant 0 : index
    %142 = vector.load %arg2[%c8, %c0_70, %c0_71] : memref<9x16x4xbf16, #tpu.memory_space<vmem>>, vector<1x16x4xbf16>
    %143 = vector.shape_cast %142 : vector<1x16x4xbf16> to vector<16x4xbf16>
    %cst_72 = arith.constant dense<0.000000e+00> : vector<16x1024xf32>
    %144 = tpu.matmul %143, %141, %cst_72 {dimension_numbers = #tpu.dot_dimension_numbers<[1], [0], [0], [1], [0, 0, 1, 1], [], []>} : vector<16x4xbf16>, vector<4x1024xbf16>, vector<16x1024xf32> -> vector<16x1024xf32>
    %145 = arith.addf %134, %144 : vector<16x1024xf32>
    %c0_73 = arith.constant 0 : index
    %c0_74 = arith.constant 0 : index
    %146 = vector.load %arg4[%c0_73, %c0_74] : memref<16x1xf32, #tpu.memory_space<vmem>>, vector<16x1xf32>
    %147 = vector.broadcast %146 : vector<16x1xf32> to vector<16x1024xf32>
    %148 = arith.addf %145, %147 : vector<16x1024xf32>
    %cst_75 = arith.constant 0.000000e+00 : f32
    %149 = vector.broadcast %cst_75 : f32 to vector<16x1024xf32>
    %150 = arith.maximumf %148, %149 : vector<16x1024xf32>
    %c0_76 = arith.constant 0 : index
    %c0_77 = arith.constant 0 : index
    %151 = vector.load %arg9[%c0_76, %c0_77] : memref<16x1024xf32, #tpu.memory_space<vmem>>, vector<16x1024xf32>
    tpu.vector_store %arg9[%c0_76, %c0_77], %150 {strides = array<i32>} : memref<16x1024xf32, #tpu.memory_space<vmem>>, vector<16x1024xf32>,
    %cst_78 = arith.constant 0.000000e+00 : f32
    %152 = vector.broadcast %cst_78 : f32 to vector<16x1024xf32>
    %c0_79 = arith.constant 0 : index
    %c0_80 = arith.constant 0 : index
    %153 = vector.load %arg9[%c0_79, %c0_80] : memref<16x1024xf32, #tpu.memory_space<vmem>>, vector<16x1024xf32>
    %c17_i32_81 = arith.constant 17 : i32
    %154 = tpu.dynamic_rotate %153 by %c17_i32_81 dim 1 : vector<16x1024xf32>, i32 -> vector<16x1024xf32>
    %cst_82 = arith.constant 0.000000e+00 : f32
    %155 = vector.shape_cast %13 : vector<1x1024xi1> to vector<1x1024xi1>
    %156 = vector.broadcast %155 : vector<1x1024xi1> to vector<16x1024xi1>
    %157 = vector.broadcast %cst_82 : f32 to vector<16x1024xf32>
    %158 = arith.select %156, %154, %157 : vector<16x1024xi1>, vector<16x1024xf32>
    %159 = arith.truncf %158 : vector<16x1024xf32> to vector<16x1024xbf16>
    %c0_83 = arith.constant 0 : index
    %c0_84 = arith.constant 0 : index
    %160 = vector.load %arg9[%c0_83, %c0_84] : memref<16x1024xf32, #tpu.memory_space<vmem>>, vector<16x1024xf32>
    %c16_i32_85 = arith.constant 16 : i32
    %161 = tpu.dynamic_rotate %160 by %c16_i32_85 dim 1 : vector<16x1024xf32>, i32 -> vector<16x1024xf32>
    %cst_86 = arith.constant 0.000000e+00 : f32
    %162 = vector.shape_cast %17 : vector<1x1024xi1> to vector<1x1024xi1>
    %163 = vector.broadcast %162 : vector<1x1024xi1> to vector<16x1024xi1>
    %164 = vector.broadcast %cst_86 : f32 to vector<16x1024xf32>
    %165 = arith.select %163, %161, %164 : vector<16x1024xi1>, vector<16x1024xf32>
    %166 = arith.truncf %165 : vector<16x1024xf32> to vector<16x1024xbf16>
    %c0_87 = arith.constant 0 : index
    %c0_88 = arith.constant 0 : index
    %167 = vector.load %arg9[%c0_87, %c0_88] : memref<16x1024xf32, #tpu.memory_space<vmem>>, vector<16x1024xf32>
    %c15_i32_89 = arith.constant 15 : i32
    %168 = tpu.dynamic_rotate %167 by %c15_i32_89 dim 1 : vector<16x1024xf32>, i32 -> vector<16x1024xf32>
    %cst_90 = arith.constant 0.000000e+00 : f32
    %169 = vector.shape_cast %24 : vector<1x1024xi1> to vector<1x1024xi1>
    %170 = vector.broadcast %169 : vector<1x1024xi1> to vector<16x1024xi1>
    %171 = vector.broadcast %cst_90 : f32 to vector<16x1024xf32>
    %172 = arith.select %170, %168, %171 : vector<16x1024xi1>, vector<16x1024xf32>
    %173 = arith.truncf %172 : vector<16x1024xf32> to vector<16x1024xbf16>
    %174 = tpu.concatenate %159, %166, %173 in 0 : vector<16x1024xbf16>, vector<16x1024xbf16>, vector<16x1024xbf16> -> vector<48x1024xbf16>
    %c0_91 = arith.constant 0 : index
    %c0_92 = arith.constant 0 : index
    %c0_93 = arith.constant 0 : index
    %175 = vector.load %arg3[%c0_91, %c0_92, %c0_93] : memref<3x16x48xbf16, #tpu.memory_space<vmem>>, vector<1x16x48xbf16>
    %176 = vector.shape_cast %175 : vector<1x16x48xbf16> to vector<16x48xbf16>
    %cst_94 = arith.constant dense<0.000000e+00> : vector<16x1024xf32>
    %177 = tpu.matmul %176, %174, %cst_94 {dimension_numbers = #tpu.dot_dimension_numbers<[1], [0], [0], [1], [0, 0, 1, 1], [], []>} : vector<16x48xbf16>, vector<48x1024xbf16>, vector<16x1024xf32> -> vector<16x1024xf32>
    %178 = arith.addf %152, %177 : vector<16x1024xf32>
    %c0_95 = arith.constant 0 : index
    %c0_96 = arith.constant 0 : index
    %179 = vector.load %arg9[%c0_95, %c0_96] : memref<16x1024xf32, #tpu.memory_space<vmem>>, vector<16x1024xf32>
    %c1_i32_97 = arith.constant 1 : i32
    %180 = tpu.dynamic_rotate %179 by %c1_i32_97 dim 1 : vector<16x1024xf32>, i32 -> vector<16x1024xf32>
    %cst_98 = arith.constant 0.000000e+00 : f32
    %181 = vector.shape_cast %28 : vector<1x1024xi1> to vector<1x1024xi1>
    %182 = vector.broadcast %181 : vector<1x1024xi1> to vector<16x1024xi1>
    %183 = vector.broadcast %cst_98 : f32 to vector<16x1024xf32>
    %184 = arith.select %182, %180, %183 : vector<16x1024xi1>, vector<16x1024xf32>
    %185 = arith.truncf %184 : vector<16x1024xf32> to vector<16x1024xbf16>
    %c0_99 = arith.constant 0 : index
    %c0_100 = arith.constant 0 : index
    %186 = vector.load %arg9[%c0_99, %c0_100] : memref<16x1024xf32, #tpu.memory_space<vmem>>, vector<16x1024xf32>
    %187 = arith.truncf %186 : vector<16x1024xf32> to vector<16x1024xbf16>
    %c0_101 = arith.constant 0 : index
    %c0_102 = arith.constant 0 : index
    %188 = vector.load %arg9[%c0_101, %c0_102] : memref<16x1024xf32, #tpu.memory_space<vmem>>, vector<16x1024xf32>
    %c1023_i32_103 = arith.constant 1023 : i32
    %189 = tpu.dynamic_rotate %188 by %c1023_i32_103 dim 1 : vector<16x1024xf32>, i32 -> vector<16x1024xf32>
    %cst_104 = arith.constant 0.000000e+00 : f32
    %190 = vector.shape_cast %32 : vector<1x1024xi1> to vector<1x1024xi1>
    %191 = vector.broadcast %190 : vector<1x1024xi1> to vector<16x1024xi1>
    %192 = vector.broadcast %cst_104 : f32 to vector<16x1024xf32>
    %193 = arith.select %191, %189, %192 : vector<16x1024xi1>, vector<16x1024xf32>
    %194 = arith.truncf %193 : vector<16x1024xf32> to vector<16x1024xbf16>
    %195 = tpu.concatenate %185, %187, %194 in 0 : vector<16x1024xbf16>, vector<16x1024xbf16>, vector<16x1024xbf16> -> vector<48x1024xbf16>
    %c1_105 = arith.constant 1 : index
    %c0_106 = arith.constant 0 : index
    %c0_107 = arith.constant 0 : index
    %196 = vector.load %arg3[%c1_105, %c0_106, %c0_107] : memref<3x16x48xbf16, #tpu.memory_space<vmem>>, vector<1x16x48xbf16>
    %197 = vector.shape_cast %196 : vector<1x16x48xbf16> to vector<16x48xbf16>
    %cst_108 = arith.constant dense<0.000000e+00> : vector<16x1024xf32>
    %198 = tpu.matmul %197, %195, %cst_108 {dimension_numbers = #tpu.dot_dimension_numbers<[1], [0], [0], [1], [0, 0, 1, 1], [], []>} : vector<16x48xbf16>, vector<48x1024xbf16>, vector<16x1024xf32> -> vector<16x1024xf32>
    %199 = arith.addf %178, %198 : vector<16x1024xf32>
    %c0_109 = arith.constant 0 : index
    %c0_110 = arith.constant 0 : index
    %200 = vector.load %arg9[%c0_109, %c0_110] : memref<16x1024xf32, #tpu.memory_space<vmem>>, vector<16x1024xf32>
    %c1009_i32_111 = arith.constant 1009 : i32
    %201 = tpu.dynamic_rotate %200 by %c1009_i32_111 dim 1 : vector<16x1024xf32>, i32 -> vector<16x1024xf32>
    %cst_112 = arith.constant 0.000000e+00 : f32
    %202 = vector.shape_cast %39 : vector<1x1024xi1> to vector<1x1024xi1>
    %203 = vector.broadcast %202 : vector<1x1024xi1> to vector<16x1024xi1>
    %204 = vector.broadcast %cst_112 : f32 to vector<16x1024xf32>
    %205 = arith.select %203, %201, %204 : vector<16x1024xi1>, vector<16x1024xf32>
    %206 = arith.truncf %205 : vector<16x1024xf32> to vector<16x1024xbf16>
    %c0_113 = arith.constant 0 : index
    %c0_114 = arith.constant 0 : index
    %207 = vector.load %arg9[%c0_113, %c0_114] : memref<16x1024xf32, #tpu.memory_space<vmem>>, vector<16x1024xf32>
    %c1008_i32_115 = arith.constant 1008 : i32
    %208 = tpu.dynamic_rotate %207 by %c1008_i32_115 dim 1 : vector<16x1024xf32>, i32 -> vector<16x1024xf32>
    %cst_116 = arith.constant 0.000000e+00 : f32
    %209 = vector.shape_cast %43 : vector<1x1024xi1> to vector<1x1024xi1>
    %210 = vector.broadcast %209 : vector<1x1024xi1> to vector<16x1024xi1>
    %211 = vector.broadcast %cst_116 : f32 to vector<16x1024xf32>
    %212 = arith.select %210, %208, %211 : vector<16x1024xi1>, vector<16x1024xf32>
    %213 = arith.truncf %212 : vector<16x1024xf32> to vector<16x1024xbf16>
    %c0_117 = arith.constant 0 : index
    %c0_118 = arith.constant 0 : index
    %214 = vector.load %arg9[%c0_117, %c0_118] : memref<16x1024xf32, #tpu.memory_space<vmem>>, vector<16x1024xf32>
    %c1007_i32_119 = arith.constant 1007 : i32
    %215 = tpu.dynamic_rotate %214 by %c1007_i32_119 dim 1 : vector<16x1024xf32>, i32 -> vector<16x1024xf32>
    %cst_120 = arith.constant 0.000000e+00 : f32
    %216 = vector.shape_cast %50 : vector<1x1024xi1> to vector<1x1024xi1>
    %217 = vector.broadcast %216 : vector<1x1024xi1> to vector<16x1024xi1>
    %218 = vector.broadcast %cst_120 : f32 to vector<16x1024xf32>
    %219 = arith.select %217, %215, %218 : vector<16x1024xi1>, vector<16x1024xf32>
    %220 = arith.truncf %219 : vector<16x1024xf32> to vector<16x1024xbf16>
    %221 = tpu.concatenate %206, %213, %220 in 0 : vector<16x1024xbf16>, vector<16x1024xbf16>, vector<16x1024xbf16> -> vector<48x1024xbf16>
    %c2_121 = arith.constant 2 : index
    %c0_122 = arith.constant 0 : index
    %c0_123 = arith.constant 0 : index
    %222 = vector.load %arg3[%c2_121, %c0_122, %c0_123] : memref<3x16x48xbf16, #tpu.memory_space<vmem>>, vector<1x16x48xbf16>
    %223 = vector.shape_cast %222 : vector<1x16x48xbf16> to vector<16x48xbf16>
    %cst_124 = arith.constant dense<0.000000e+00> : vector<16x1024xf32>
    %224 = tpu.matmul %223, %221, %cst_124 {dimension_numbers = #tpu.dot_dimension_numbers<[1], [0], [0], [1], [0, 0, 1, 1], [], []>} : vector<16x48xbf16>, vector<48x1024xbf16>, vector<16x1024xf32> -> vector<16x1024xf32>
    %225 = arith.addf %199, %224 : vector<16x1024xf32>
    %c0_125 = arith.constant 0 : index
    %c0_126 = arith.constant 0 : index
    %226 = vector.load %arg5[%c0_125, %c0_126] : memref<16x1xf32, #tpu.memory_space<vmem>>, vector<16x1xf32>
    %227 = vector.broadcast %226 : vector<16x1xf32> to vector<16x1024xf32>
    %228 = arith.addf %225, %227 : vector<16x1024xf32>
    %cst_127 = arith.constant 0.000000e+00 : f32
    %229 = vector.broadcast %cst_127 : f32 to vector<16x1024xf32>
    %230 = arith.maximumf %228, %229 : vector<16x1024xf32>
    %231 = arith.truncf %230 : vector<16x1024xf32> to vector<16x1024xbf16>
    %232 = vector.extract_strided_slice %231 {offsets = [0, 0], sizes = [16, 256], strides = [1, 1]} : vector<16x1024xbf16> to vector<16x256xbf16>
    %c0_128 = arith.constant 0 : index
    %c0_129 = arith.constant 0 : index
    %c0_130 = arith.constant 0 : index
    %233 = vector.load %arg10[%c0_128, %c0_129, %c0_130] : memref<4x16x256xbf16, #tpu.memory_space<vmem>>, vector<1x16x256xbf16>
    %234 = vector.shape_cast %233 : vector<1x16x256xbf16> to vector<16x256xbf16>
    %235 = vector.shape_cast %232 : vector<16x256xbf16> to vector<1x16x256xbf16>
    tpu.vector_store %arg10[%c0_128, %c0_129, %c0_130], %235 {strides = array<i32>} : memref<4x16x256xbf16, #tpu.memory_space<vmem>>, vector<1x16x256xbf16>,
    %236 = vector.extract_strided_slice %231 {offsets = [0, 256], sizes = [16, 256], strides = [1, 1]} : vector<16x1024xbf16> to vector<16x256xbf16>
    %c1_131 = arith.constant 1 : index
    %c0_132 = arith.constant 0 : index
    %c0_133 = arith.constant 0 : index
    %237 = vector.load %arg10[%c1_131, %c0_132, %c0_133] : memref<4x16x256xbf16, #tpu.memory_space<vmem>>, vector<1x16x256xbf16>
    %238 = vector.shape_cast %237 : vector<1x16x256xbf16> to vector<16x256xbf16>
    %239 = vector.shape_cast %236 : vector<16x256xbf16> to vector<1x16x256xbf16>
    tpu.vector_store %arg10[%c1_131, %c0_132, %c0_133], %239 {strides = array<i32>} : memref<4x16x256xbf16, #tpu.memory_space<vmem>>, vector<1x16x256xbf16>,
    %240 = vector.extract_strided_slice %231 {offsets = [0, 512], sizes = [16, 256], strides = [1, 1]} : vector<16x1024xbf16> to vector<16x256xbf16>
    %c2_134 = arith.constant 2 : index
    %c0_135 = arith.constant 0 : index
    %c0_136 = arith.constant 0 : index
    %241 = vector.load %arg10[%c2_134, %c0_135, %c0_136] : memref<4x16x256xbf16, #tpu.memory_space<vmem>>, vector<1x16x256xbf16>
    %242 = vector.shape_cast %241 : vector<1x16x256xbf16> to vector<16x256xbf16>
    %243 = vector.shape_cast %240 : vector<16x256xbf16> to vector<1x16x256xbf16>
    tpu.vector_store %arg10[%c2_134, %c0_135, %c0_136], %243 {strides = array<i32>} : memref<4x16x256xbf16, #tpu.memory_space<vmem>>, vector<1x16x256xbf16>,
    %244 = vector.extract_strided_slice %231 {offsets = [0, 768], sizes = [16, 256], strides = [1, 1]} : vector<16x1024xbf16> to vector<16x256xbf16>
    %c3_137 = arith.constant 3 : index
    %c0_138 = arith.constant 0 : index
    %c0_139 = arith.constant 0 : index
    %245 = vector.load %arg10[%c3_137, %c0_138, %c0_139] : memref<4x16x256xbf16, #tpu.memory_space<vmem>>, vector<1x16x256xbf16>
    %246 = vector.shape_cast %245 : vector<1x16x256xbf16> to vector<16x256xbf16>
    %247 = vector.shape_cast %244 : vector<16x256xbf16> to vector<1x16x256xbf16>
    tpu.vector_store %arg10[%c3_137, %c0_138, %c0_139], %247 {strides = array<i32>} : memref<4x16x256xbf16, #tpu.memory_space<vmem>>, vector<1x16x256xbf16>,
    %cst_140 = arith.constant 0.000000e+00 : f32
    %248 = vector.broadcast %cst_140 : f32 to vector<4x32xf32>
    %c0_141 = arith.constant 0 : index
    %c0_142 = arith.constant 0 : index
    %c0_143 = arith.constant 0 : index
    %249 = vector.load %arg10[%c0_141, %c0_142, %c0_143] : memref<4x16x256xbf16, #tpu.memory_space<vmem>>, vector<4x1x256xbf16>
    %250 = vector.shape_cast %249 : vector<4x1x256xbf16> to vector<4x256xbf16>
    %c0_144 = arith.constant 0 : index
    %c0_145 = arith.constant 0 : index
    %c0_146 = arith.constant 0 : index
    %251 = vector.load %arg6[%c0_144, %c0_145, %c0_146] : memref<16x256x32xbf16, #tpu.memory_space<vmem>>, vector<1x256x32xbf16>
    %252 = vector.shape_cast %251 : vector<1x256x32xbf16> to vector<256x32xbf16>
    %cst_147 = arith.constant dense<0.000000e+00> : vector<4x32xf32>
    %253 = tpu.matmul %250, %252, %cst_147 {dimension_numbers = #tpu.dot_dimension_numbers<[1], [0], [0], [1], [0, 0, 1, 1], [], []>} : vector<4x256xbf16>, vector<256x32xbf16>, vector<4x32xf32> -> vector<4x32xf32>
    %254 = arith.addf %248, %253 : vector<4x32xf32>
    %c0_148 = arith.constant 0 : index
    %c1_149 = arith.constant 1 : index
    %c0_150 = arith.constant 0 : index
    %255 = vector.load %arg10[%c0_148, %c1_149, %c0_150] : memref<4x16x256xbf16, #tpu.memory_space<vmem>>, vector<4x1x256xbf16>
    %256 = vector.shape_cast %255 : vector<4x1x256xbf16> to vector<4x256xbf16>
    %c1_151 = arith.constant 1 : index
    %c0_152 = arith.constant 0 : index
    %c0_153 = arith.constant 0 : index
    %257 = vector.load %arg6[%c1_151, %c0_152, %c0_153] : memref<16x256x32xbf16, #tpu.memory_space<vmem>>, vector<1x256x32xbf16>
    %258 = vector.shape_cast %257 : vector<1x256x32xbf16> to vector<256x32xbf16>
    %cst_154 = arith.constant dense<0.000000e+00> : vector<4x32xf32>
    %259 = tpu.matmul %256, %258, %cst_154 {dimension_numbers = #tpu.dot_dimension_numbers<[1], [0], [0], [1], [0, 0, 1, 1], [], []>} : vector<4x256xbf16>, vector<256x32xbf16>, vector<4x32xf32> -> vector<4x32xf32>
    %260 = arith.addf %254, %259 : vector<4x32xf32>
    %c0_155 = arith.constant 0 : index
    %c2_156 = arith.constant 2 : index
    %c0_157 = arith.constant 0 : index
    %261 = vector.load %arg10[%c0_155, %c2_156, %c0_157] : memref<4x16x256xbf16, #tpu.memory_space<vmem>>, vector<4x1x256xbf16>
    %262 = vector.shape_cast %261 : vector<4x1x256xbf16> to vector<4x256xbf16>
    %c2_158 = arith.constant 2 : index
    %c0_159 = arith.constant 0 : index
    %c0_160 = arith.constant 0 : index
    %263 = vector.load %arg6[%c2_158, %c0_159, %c0_160] : memref<16x256x32xbf16, #tpu.memory_space<vmem>>, vector<1x256x32xbf16>
    %264 = vector.shape_cast %263 : vector<1x256x32xbf16> to vector<256x32xbf16>
    %cst_161 = arith.constant dense<0.000000e+00> : vector<4x32xf32>
    %265 = tpu.matmul %262, %264, %cst_161 {dimension_numbers = #tpu.dot_dimension_numbers<[1], [0], [0], [1], [0, 0, 1, 1], [], []>} : vector<4x256xbf16>, vector<256x32xbf16>, vector<4x32xf32> -> vector<4x32xf32>
    %266 = arith.addf %260, %265 : vector<4x32xf32>
    %c0_162 = arith.constant 0 : index
    %c3_163 = arith.constant 3 : index
    %c0_164 = arith.constant 0 : index
    %267 = vector.load %arg10[%c0_162, %c3_163, %c0_164] : memref<4x16x256xbf16, #tpu.memory_space<vmem>>, vector<4x1x256xbf16>
    %268 = vector.shape_cast %267 : vector<4x1x256xbf16> to vector<4x256xbf16>
    %c3_165 = arith.constant 3 : index
    %c0_166 = arith.constant 0 : index
    %c0_167 = arith.constant 0 : index
    %269 = vector.load %arg6[%c3_165, %c0_166, %c0_167] : memref<16x256x32xbf16, #tpu.memory_space<vmem>>, vector<1x256x32xbf16>
    %270 = vector.shape_cast %269 : vector<1x256x32xbf16> to vector<256x32xbf16>
    %cst_168 = arith.constant dense<0.000000e+00> : vector<4x32xf32>
    %271 = tpu.matmul %268, %270, %cst_168 {dimension_numbers = #tpu.dot_dimension_numbers<[1], [0], [0], [1], [0, 0, 1, 1], [], []>} : vector<4x256xbf16>, vector<256x32xbf16>, vector<4x32xf32> -> vector<4x32xf32>
    %272 = arith.addf %266, %271 : vector<4x32xf32>
    %c0_169 = arith.constant 0 : index
    %c4_170 = arith.constant 4 : index
    %c0_171 = arith.constant 0 : index
    %273 = vector.load %arg10[%c0_169, %c4_170, %c0_171] : memref<4x16x256xbf16, #tpu.memory_space<vmem>>, vector<4x1x256xbf16>
    %274 = vector.shape_cast %273 : vector<4x1x256xbf16> to vector<4x256xbf16>
    %c4_172 = arith.constant 4 : index
    %c0_173 = arith.constant 0 : index
    %c0_174 = arith.constant 0 : index
    %275 = vector.load %arg6[%c4_172, %c0_173, %c0_174] : memref<16x256x32xbf16, #tpu.memory_space<vmem>>, vector<1x256x32xbf16>
    %276 = vector.shape_cast %275 : vector<1x256x32xbf16> to vector<256x32xbf16>
    %cst_175 = arith.constant dense<0.000000e+00> : vector<4x32xf32>
    %277 = tpu.matmul %274, %276, %cst_175 {dimension_numbers = #tpu.dot_dimension_numbers<[1], [0], [0], [1], [0, 0, 1, 1], [], []>} : vector<4x256xbf16>, vector<256x32xbf16>, vector<4x32xf32> -> vector<4x32xf32>
    %278 = arith.addf %272, %277 : vector<4x32xf32>
    %c0_176 = arith.constant 0 : index
    %c5_177 = arith.constant 5 : index
    %c0_178 = arith.constant 0 : index
    %279 = vector.load %arg10[%c0_176, %c5_177, %c0_178] : memref<4x16x256xbf16, #tpu.memory_space<vmem>>, vector<4x1x256xbf16>
    %280 = vector.shape_cast %279 : vector<4x1x256xbf16> to vector<4x256xbf16>
    %c5_179 = arith.constant 5 : index
    %c0_180 = arith.constant 0 : index
    %c0_181 = arith.constant 0 : index
    %281 = vector.load %arg6[%c5_179, %c0_180, %c0_181] : memref<16x256x32xbf16, #tpu.memory_space<vmem>>, vector<1x256x32xbf16>
    %282 = vector.shape_cast %281 : vector<1x256x32xbf16> to vector<256x32xbf16>
    %cst_182 = arith.constant dense<0.000000e+00> : vector<4x32xf32>
    %283 = tpu.matmul %280, %282, %cst_182 {dimension_numbers = #tpu.dot_dimension_numbers<[1], [0], [0], [1], [0, 0, 1, 1], [], []>} : vector<4x256xbf16>, vector<256x32xbf16>, vector<4x32xf32> -> vector<4x32xf32>
    %284 = arith.addf %278, %283 : vector<4x32xf32>
    %c0_183 = arith.constant 0 : index
    %c6_184 = arith.constant 6 : index
    %c0_185 = arith.constant 0 : index
    %285 = vector.load %arg10[%c0_183, %c6_184, %c0_185] : memref<4x16x256xbf16, #tpu.memory_space<vmem>>, vector<4x1x256xbf16>
    %286 = vector.shape_cast %285 : vector<4x1x256xbf16> to vector<4x256xbf16>
    %c6_186 = arith.constant 6 : index
    %c0_187 = arith.constant 0 : index
    %c0_188 = arith.constant 0 : index
    %287 = vector.load %arg6[%c6_186, %c0_187, %c0_188] : memref<16x256x32xbf16, #tpu.memory_space<vmem>>, vector<1x256x32xbf16>
    %288 = vector.shape_cast %287 : vector<1x256x32xbf16> to vector<256x32xbf16>
    %cst_189 = arith.constant dense<0.000000e+00> : vector<4x32xf32>
    %289 = tpu.matmul %286, %288, %cst_189 {dimension_numbers = #tpu.dot_dimension_numbers<[1], [0], [0], [1], [0, 0, 1, 1], [], []>} : vector<4x256xbf16>, vector<256x32xbf16>, vector<4x32xf32> -> vector<4x32xf32>
    %290 = arith.addf %284, %289 : vector<4x32xf32>
    %c0_190 = arith.constant 0 : index
    %c7_191 = arith.constant 7 : index
    %c0_192 = arith.constant 0 : index
    %291 = vector.load %arg10[%c0_190, %c7_191, %c0_192] : memref<4x16x256xbf16, #tpu.memory_space<vmem>>, vector<4x1x256xbf16>
    %292 = vector.shape_cast %291 : vector<4x1x256xbf16> to vector<4x256xbf16>
    %c7_193 = arith.constant 7 : index
    %c0_194 = arith.constant 0 : index
    %c0_195 = arith.constant 0 : index
    %293 = vector.load %arg6[%c7_193, %c0_194, %c0_195] : memref<16x256x32xbf16, #tpu.memory_space<vmem>>, vector<1x256x32xbf16>
    %294 = vector.shape_cast %293 : vector<1x256x32xbf16> to vector<256x32xbf16>
    %cst_196 = arith.constant dense<0.000000e+00> : vector<4x32xf32>
    %295 = tpu.matmul %292, %294, %cst_196 {dimension_numbers = #tpu.dot_dimension_numbers<[1], [0], [0], [1], [0, 0, 1, 1], [], []>} : vector<4x256xbf16>, vector<256x32xbf16>, vector<4x32xf32> -> vector<4x32xf32>
    %296 = arith.addf %290, %295 : vector<4x32xf32>
    %c0_197 = arith.constant 0 : index
    %c8_198 = arith.constant 8 : index
    %c0_199 = arith.constant 0 : index
    %297 = vector.load %arg10[%c0_197, %c8_198, %c0_199] : memref<4x16x256xbf16, #tpu.memory_space<vmem>>, vector<4x1x256xbf16>
    %298 = vector.shape_cast %297 : vector<4x1x256xbf16> to vector<4x256xbf16>
    %c8_200 = arith.constant 8 : index
    %c0_201 = arith.constant 0 : index
    %c0_202 = arith.constant 0 : index
    %299 = vector.load %arg6[%c8_200, %c0_201, %c0_202] : memref<16x256x32xbf16, #tpu.memory_space<vmem>>, vector<1x256x32xbf16>
    %300 = vector.shape_cast %299 : vector<1x256x32xbf16> to vector<256x32xbf16>
    %cst_203 = arith.constant dense<0.000000e+00> : vector<4x32xf32>
    %301 = tpu.matmul %298, %300, %cst_203 {dimension_numbers = #tpu.dot_dimension_numbers<[1], [0], [0], [1], [0, 0, 1, 1], [], []>} : vector<4x256xbf16>, vector<256x32xbf16>, vector<4x32xf32> -> vector<4x32xf32>
    %302 = arith.addf %296, %301 : vector<4x32xf32>
    %c0_204 = arith.constant 0 : index
    %c9 = arith.constant 9 : index
    %c0_205 = arith.constant 0 : index
    %303 = vector.load %arg10[%c0_204, %c9, %c0_205] : memref<4x16x256xbf16, #tpu.memory_space<vmem>>, vector<4x1x256xbf16>
    %304 = vector.shape_cast %303 : vector<4x1x256xbf16> to vector<4x256xbf16>
    %c9_206 = arith.constant 9 : index
    %c0_207 = arith.constant 0 : index
    %c0_208 = arith.constant 0 : index
    %305 = vector.load %arg6[%c9_206, %c0_207, %c0_208] : memref<16x256x32xbf16, #tpu.memory_space<vmem>>, vector<1x256x32xbf16>
    %306 = vector.shape_cast %305 : vector<1x256x32xbf16> to vector<256x32xbf16>
    %cst_209 = arith.constant dense<0.000000e+00> : vector<4x32xf32>
    %307 = tpu.matmul %304, %306, %cst_209 {dimension_numbers = #tpu.dot_dimension_numbers<[1], [0], [0], [1], [0, 0, 1, 1], [], []>} : vector<4x256xbf16>, vector<256x32xbf16>, vector<4x32xf32> -> vector<4x32xf32>
    %308 = arith.addf %302, %307 : vector<4x32xf32>
    %c0_210 = arith.constant 0 : index
    %c10 = arith.constant 10 : index
    %c0_211 = arith.constant 0 : index
    %309 = vector.load %arg10[%c0_210, %c10, %c0_211] : memref<4x16x256xbf16, #tpu.memory_space<vmem>>, vector<4x1x256xbf16>
    %310 = vector.shape_cast %309 : vector<4x1x256xbf16> to vector<4x256xbf16>
    %c10_212 = arith.constant 10 : index
    %c0_213 = arith.constant 0 : index
    %c0_214 = arith.constant 0 : index
    %311 = vector.load %arg6[%c10_212, %c0_213, %c0_214] : memref<16x256x32xbf16, #tpu.memory_space<vmem>>, vector<1x256x32xbf16>
    %312 = vector.shape_cast %311 : vector<1x256x32xbf16> to vector<256x32xbf16>
    %cst_215 = arith.constant dense<0.000000e+00> : vector<4x32xf32>
    %313 = tpu.matmul %310, %312, %cst_215 {dimension_numbers = #tpu.dot_dimension_numbers<[1], [0], [0], [1], [0, 0, 1, 1], [], []>} : vector<4x256xbf16>, vector<256x32xbf16>, vector<4x32xf32> -> vector<4x32xf32>
    %314 = arith.addf %308, %313 : vector<4x32xf32>
    %c0_216 = arith.constant 0 : index
    %c11 = arith.constant 11 : index
    %c0_217 = arith.constant 0 : index
    %315 = vector.load %arg10[%c0_216, %c11, %c0_217] : memref<4x16x256xbf16, #tpu.memory_space<vmem>>, vector<4x1x256xbf16>
    %316 = vector.shape_cast %315 : vector<4x1x256xbf16> to vector<4x256xbf16>
    %c11_218 = arith.constant 11 : index
    %c0_219 = arith.constant 0 : index
    %c0_220 = arith.constant 0 : index
    %317 = vector.load %arg6[%c11_218, %c0_219, %c0_220] : memref<16x256x32xbf16, #tpu.memory_space<vmem>>, vector<1x256x32xbf16>
    %318 = vector.shape_cast %317 : vector<1x256x32xbf16> to vector<256x32xbf16>
    %cst_221 = arith.constant dense<0.000000e+00> : vector<4x32xf32>
    %319 = tpu.matmul %316, %318, %cst_221 {dimension_numbers = #tpu.dot_dimension_numbers<[1], [0], [0], [1], [0, 0, 1, 1], [], []>} : vector<4x256xbf16>, vector<256x32xbf16>, vector<4x32xf32> -> vector<4x32xf32>
    %320 = arith.addf %314, %319 : vector<4x32xf32>
    %c0_222 = arith.constant 0 : index
    %c12 = arith.constant 12 : index
    %c0_223 = arith.constant 0 : index
    %321 = vector.load %arg10[%c0_222, %c12, %c0_223] : memref<4x16x256xbf16, #tpu.memory_space<vmem>>, vector<4x1x256xbf16>
    %322 = vector.shape_cast %321 : vector<4x1x256xbf16> to vector<4x256xbf16>
    %c12_224 = arith.constant 12 : index
    %c0_225 = arith.constant 0 : index
    %c0_226 = arith.constant 0 : index
    %323 = vector.load %arg6[%c12_224, %c0_225, %c0_226] : memref<16x256x32xbf16, #tpu.memory_space<vmem>>, vector<1x256x32xbf16>
    %324 = vector.shape_cast %323 : vector<1x256x32xbf16> to vector<256x32xbf16>
    %cst_227 = arith.constant dense<0.000000e+00> : vector<4x32xf32>
    %325 = tpu.matmul %322, %324, %cst_227 {dimension_numbers = #tpu.dot_dimension_numbers<[1], [0], [0], [1], [0, 0, 1, 1], [], []>} : vector<4x256xbf16>, vector<256x32xbf16>, vector<4x32xf32> -> vector<4x32xf32>
    %326 = arith.addf %320, %325 : vector<4x32xf32>
    %c0_228 = arith.constant 0 : index
    %c13 = arith.constant 13 : index
    %c0_229 = arith.constant 0 : index
    %327 = vector.load %arg10[%c0_228, %c13, %c0_229] : memref<4x16x256xbf16, #tpu.memory_space<vmem>>, vector<4x1x256xbf16>
    %328 = vector.shape_cast %327 : vector<4x1x256xbf16> to vector<4x256xbf16>
    %c13_230 = arith.constant 13 : index
    %c0_231 = arith.constant 0 : index
    %c0_232 = arith.constant 0 : index
    %329 = vector.load %arg6[%c13_230, %c0_231, %c0_232] : memref<16x256x32xbf16, #tpu.memory_space<vmem>>, vector<1x256x32xbf16>
    %330 = vector.shape_cast %329 : vector<1x256x32xbf16> to vector<256x32xbf16>
    %cst_233 = arith.constant dense<0.000000e+00> : vector<4x32xf32>
    %331 = tpu.matmul %328, %330, %cst_233 {dimension_numbers = #tpu.dot_dimension_numbers<[1], [0], [0], [1], [0, 0, 1, 1], [], []>} : vector<4x256xbf16>, vector<256x32xbf16>, vector<4x32xf32> -> vector<4x32xf32>
    %332 = arith.addf %326, %331 : vector<4x32xf32>
    %c0_234 = arith.constant 0 : index
    %c14 = arith.constant 14 : index
    %c0_235 = arith.constant 0 : index
    %333 = vector.load %arg10[%c0_234, %c14, %c0_235] : memref<4x16x256xbf16, #tpu.memory_space<vmem>>, vector<4x1x256xbf16>
    %334 = vector.shape_cast %333 : vector<4x1x256xbf16> to vector<4x256xbf16>
    %c14_236 = arith.constant 14 : index
    %c0_237 = arith.constant 0 : index
    %c0_238 = arith.constant 0 : index
    %335 = vector.load %arg6[%c14_236, %c0_237, %c0_238] : memref<16x256x32xbf16, #tpu.memory_space<vmem>>, vector<1x256x32xbf16>
    %336 = vector.shape_cast %335 : vector<1x256x32xbf16> to vector<256x32xbf16>
    %cst_239 = arith.constant dense<0.000000e+00> : vector<4x32xf32>
    %337 = tpu.matmul %334, %336, %cst_239 {dimension_numbers = #tpu.dot_dimension_numbers<[1], [0], [0], [1], [0, 0, 1, 1], [], []>} : vector<4x256xbf16>, vector<256x32xbf16>, vector<4x32xf32> -> vector<4x32xf32>
    %338 = arith.addf %332, %337 : vector<4x32xf32>
    %c0_240 = arith.constant 0 : index
    %c15 = arith.constant 15 : index
    %c0_241 = arith.constant 0 : index
    %339 = vector.load %arg10[%c0_240, %c15, %c0_241] : memref<4x16x256xbf16, #tpu.memory_space<vmem>>, vector<4x1x256xbf16>
    %340 = vector.shape_cast %339 : vector<4x1x256xbf16> to vector<4x256xbf16>
    %c15_242 = arith.constant 15 : index
    %c0_243 = arith.constant 0 : index
    %c0_244 = arith.constant 0 : index
    %341 = vector.load %arg6[%c15_242, %c0_243, %c0_244] : memref<16x256x32xbf16, #tpu.memory_space<vmem>>, vector<1x256x32xbf16>
    %342 = vector.shape_cast %341 : vector<1x256x32xbf16> to vector<256x32xbf16>
    %cst_245 = arith.constant dense<0.000000e+00> : vector<4x32xf32>
    %343 = tpu.matmul %340, %342, %cst_245 {dimension_numbers = #tpu.dot_dimension_numbers<[1], [0], [0], [1], [0, 0, 1, 1], [], []>} : vector<4x256xbf16>, vector<256x32xbf16>, vector<4x32xf32> -> vector<4x32xf32>
    %344 = arith.addf %338, %343 : vector<4x32xf32>
    %c0_246 = arith.constant 0 : index
    %c0_247 = arith.constant 0 : index
    %345 = vector.load %arg7[%c0_246, %c0_247] : memref<3x32xf32, #tpu.memory_space<vmem>>, vector<1x32xf32>
    %346 = vector.broadcast %345 : vector<1x32xf32> to vector<4x32xf32>
    %347 = arith.addf %344, %346 : vector<4x32xf32>
    %cst_248 = arith.constant 0.000000e+00 : f32
    %348 = vector.broadcast %cst_248 : f32 to vector<4x32xf32>
    %349 = arith.maximumf %347, %348 : vector<4x32xf32>
    %cst_249 = arith.constant dense<0.000000e+00> : vector<4xf32>
    %350 = vector.multi_reduction <add>, %349, %cst_249 [1] : vector<4x32xf32> to vector<4xf32>
    %351 = vector.shape_cast %350 : vector<4xf32> to vector<4x1xf32>
    %cst_250 = arith.constant 3.200000e+01 : f32
    %352 = vector.broadcast %cst_250 : f32 to vector<4x1xf32>
    %353 = arith.divf %351, %352 : vector<4x1xf32>
    %354 = vector.broadcast %353 : vector<4x1xf32> to vector<4x32xf32>
    %355 = arith.subf %349, %354 : vector<4x32xf32>
    %356 = arith.mulf %355, %355 : vector<4x32xf32>
    %cst_251 = arith.constant dense<0.000000e+00> : vector<4xf32>
    %357 = vector.multi_reduction <add>, %356, %cst_251 [1] : vector<4x32xf32> to vector<4xf32>
    %358 = vector.shape_cast %357 : vector<4xf32> to vector<4x1xf32>
    %cst_252 = arith.constant 3.200000e+01 : f32
    %359 = vector.broadcast %cst_252 : f32 to vector<4x1xf32>
    %360 = arith.divf %358, %359 : vector<4x1xf32>
    %cst_253 = arith.constant 9.99999974E-6 : f32
    %361 = vector.broadcast %cst_253 : f32 to vector<4x1xf32>
    %362 = arith.addf %360, %361 : vector<4x1xf32>
    %363 = math.rsqrt %362 : vector<4x1xf32>
    %364 = vector.broadcast %363 : vector<4x1xf32> to vector<4x32xf32>
    %365 = arith.mulf %355, %364 : vector<4x32xf32>
    %c1_254 = arith.constant 1 : index
    %c0_255 = arith.constant 0 : index
    %366 = vector.load %arg7[%c1_254, %c0_255] : memref<3x32xf32, #tpu.memory_space<vmem>>, vector<1x32xf32>
    %367 = vector.broadcast %366 : vector<1x32xf32> to vector<4x32xf32>
    %368 = arith.mulf %365, %367 : vector<4x32xf32>
    %c2_256 = arith.constant 2 : index
    %c0_257 = arith.constant 0 : index
    %369 = vector.load %arg7[%c2_256, %c0_257] : memref<3x32xf32, #tpu.memory_space<vmem>>, vector<1x32xf32>
    %370 = vector.broadcast %369 : vector<1x32xf32> to vector<4x32xf32>
    %371 = arith.addf %368, %370 : vector<4x32xf32>
    %c0_258 = arith.constant 0 : index
    %c0_259 = arith.constant 0 : index
    %372 = vector.load %arg8[%c0_258, %c0_259] : memref<4x32xf32, #tpu.memory_space<vmem>>, vector<4x32xf32>
    tpu.vector_store %arg8[%c0_258, %c0_259], %371 {strides = array<i32>} : memref<4x32xf32, #tpu.memory_space<vmem>>, vector<4x32xf32>,
    return
  }
  func.func @transform_0(%arg0: i32) -> (i32, i32) {
    %c0_i32 = arith.constant 0 : i32
    %c0_i32_0 = arith.constant 0 : i32
    return %c0_i32, %arg0 : i32, i32
  }
  func.func @transform_1(%arg0: i32) -> (i32, i32, i32) {
    %c0_i32 = arith.constant 0 : i32
    %c0_i32_0 = arith.constant 0 : i32
    %c0_i32_1 = arith.constant 0 : i32
    %c0_i32_2 = arith.constant 0 : i32
    return %c0_i32, %c0_i32_0, %c0_i32_1 : i32, i32, i32
  }
  func.func @transform_2(%arg0: i32) -> (i32, i32, i32) {
    %c0_i32 = arith.constant 0 : i32
    %c0_i32_0 = arith.constant 0 : i32
    %c0_i32_1 = arith.constant 0 : i32
    %c0_i32_2 = arith.constant 0 : i32
    return %c0_i32, %c0_i32_0, %c0_i32_1 : i32, i32, i32
  }
  func.func @transform_3(%arg0: i32) -> (i32, i32) {
    %c0_i32 = arith.constant 0 : i32
    %c0_i32_0 = arith.constant 0 : i32
    %c0_i32_1 = arith.constant 0 : i32
    return %c0_i32, %c0_i32_0 : i32, i32
  }
  func.func @transform_4(%arg0: i32) -> (i32, i32) {
    %c0_i32 = arith.constant 0 : i32
    %c0_i32_0 = arith.constant 0 : i32
    %c0_i32_1 = arith.constant 0 : i32
    return %c0_i32, %c0_i32_0 : i32, i32
  }
  func.func @transform_5(%arg0: i32) -> (i32, i32, i32) {
    %c0_i32 = arith.constant 0 : i32
    %c0_i32_0 = arith.constant 0 : i32
    %c0_i32_1 = arith.constant 0 : i32
    %c0_i32_2 = arith.constant 0 : i32
    return %c0_i32, %c0_i32_0, %c0_i32_1 : i32, i32, i32
  }
  func.func @transform_6(%arg0: i32) -> (i32, i32) {
    %c0_i32 = arith.constant 0 : i32
    %c0_i32_0 = arith.constant 0 : i32
    %c0_i32_1 = arith.constant 0 : i32
    return %c0_i32, %c0_i32_0 : i32, i32
  }
  func.func @transform_7(%arg0: i32) -> (i32, i32) {
    %c0_i32 = arith.constant 0 : i32
    %c0_i32_0 = arith.constant 0 : i32
    return %arg0, %c0_i32 : i32, i32
  }
}

</mosaic_0001>

<bundles_post_ra>
// kernel: lifelong_network_forward.1
= control target key start
LH: loop header
LB: loop body
LE: loop exit
PB: predicated region body
PF: predicated region fallthrough
CT: control target
= control target key end

     0   :  { %v12895_v9 = vmov 0   ;;  %s9377_s9 = smov 17   ;;  %s9378_s10 = smov 15   ;;  %v27_v15 = vlaneseq  ;;  %vm12853_vm0 = vcmask 1041408   ;;  %vm12852_vm8 = vcmask 31744   ;;  %s12836_s0 = inlined_call_operand.vmem [shape: f32[4,1024], index: 0, kind: input, shape index: {}]   ;;  %s12837_s1 = inlined_call_operand.vmem [shape: bf16[9,16,4], index: 1, kind: input, shape index: {}]   ;;  %s12838_s3 = inlined_call_operand.vmem [shape: f32[16,1], index: 3, kind: input, shape index: {}]   ;;  %s12839_s2 = inlined_call_operand.vmem [shape: bf16[3,16,48], index: 2, kind: input, shape index: {}]   ;;  %s12840_s4 = inlined_call_operand.vmem [shape: f32[16,1], index: 4, kind: input, shape index: {}]   ;;  %s12841_s5 = inlined_call_operand.vmem [shape: bf16[16,256,32], index: 5, kind: input, shape index: {}]   ;;  %s12842_s6 = inlined_call_operand.vmem [shape: f32[3,32], index: 6, kind: input, shape index: {}]   ;;  %s12843_s7 = inlined_call_operand.vmem [shape: f32[4,32], index: 7, kind: output, shape index: {}]  }
   0x1   :  { %v9427_v0 = vld [vmem:[%s12836_s0] sm:$0xff]  ;;  %v9432_v1 = vld [vmem:[%s12836_s0 + $0x10] sm:$0xff]  ;;  %v9437_v2 = vld [vmem:[%s12836_s0 + $0x18] sm:$0xff]  ;;  %325 = vmatprep.mubr.bf16.mxu0 %v12895_v9  ;;  %368 = vmatprep.mubr.bf16.mxu1 %v12895_v9  ;;  %s9379_s11 = smov 1   ;;  %s9380_s12 = smov 127   ;;  %v13057_v50 = vmov 0 }
   0x2   :  { %v9441_v3 = vcombine.high %v9437_v2, %v9437_v2  ;;  %v9446_v4 = vld [vmem:[%s12836_s0 + $0x8] sm:$0xff]  ;;  %v9450_v5 = vcombine.high %v9427_v0, %v9427_v0  ;;  %v9454_v6 = vcombine.high %v9432_v1, %v9432_v1  ;;  %s9376_s0 = smov 16   ;;  %8779 = vset.pattern.permute.xlu0 %v12895_v9  ;;  %8780 = vset.pattern.permute.xlu1 %v12895_v9  ;;  %s9381_s13 = smov 113   ;;  %v9532_v16 = vand.u32 127, %v27_v15 }
   0x3   :  { %v9468_v11 = vcombine.high %v9446_v4, %v9446_v4  ;;  %s9382_s14 = smov 112   ;;  %s9383_s15 = smov 111   ;;  %v13063_v15 = vmov 0 }
   0x4   :  { %v8664_v7 = vpack.i.bf16 %v9441_v3, %v9427_v0  ;;  %v8659_v8 = vpack.i.bf16 %v9446_v4, %v9450_v5  ;;  %v8669_v10 = vpack.i.bf16 %v9437_v2, %v9454_v6  ;;  %v8754_v12 = vpack.i.bf16 %v9450_v5, %v9427_v0 }
   0x5   :  { %v8719_v13 = vpack.i.bf16 %v9468_v11, %v9446_v4  ;;  %v8729_v14 = vpack.i.bf16 %v9441_v3, %v9437_v2  ;;  %v9535_v17 = vadd.s32 128, %v9532_v16  ;;  %v9538_v18 = vadd.s32 512, %v9532_v16 }
   0x6   :  { %8665 = vrot.lane.b32.xlu1 %v8664_v7, %s9376_s0  ;;  %8660 = vrot.lane.b32.xlu0 %v8659_v8, %s9376_s0  ;;  %v9541_v19 = vadd.s32 640, %v9532_v16  ;;  %v9544_v20 = vadd.s32 384, %v9532_v16  ;;  %v9547_v21 = vadd.s32 256, %v9532_v16  ;;  %v36_v22 = vand.u32 255, %v9532_v16 }
   0x7   :  { %v9551_v23 = vadd.s32 896, %v9532_v16  ;;  %v37_v24 = vand.u32 255, %v9535_v17  ;;  %v40_v25 = vand.u32 255, %v9538_v18  ;;  %v9559_v29 = vadd.s32 768, %v9532_v16 }
   0x8   :  { %v41_v26 = vand.u32 255, %v9541_v19  ;;  %v39_v27 = vand.u32 255, %v9544_v20  ;;  %v38_v28 = vand.u32 255, %v9547_v21  ;;  %v9561_v30 = vshra.s32 %v36_v22, 4 }
   0x9   :  { %v43_v31 = vand.u32 255, %v9551_v23  ;;  %v9564_v32 = vshra.s32 %v37_v24, 4  ;;  %v9566_v33 = vshra.s32 %v40_v25, 4  ;;  %v42_v37 = vand.u32 255, %v9559_v29 }
   0xa   :  { %8670 = vrot.lane.b32.xlu1 %v8669_v10, %s9376_s0  ;;  %205 = vrot.lane.b32.xlu0 %v9468_v11, %s9376_s0  ;;  %13049 = vst [vmem:[#allocation4_spill] sm:$0xff] %v9561_v30  ;;  %v9568_v34 = vshra.s32 %v41_v26, 4  ;;  %v9570_v35 = vshra.s32 %v39_v27, 4  ;;  %v9572_v36 = vshra.s32 %v38_v28, 4  ;;  %v53_v38 = vand.u32 15, %v9535_v17  ;;  %v9643_v26 = vld [vmem:[%s12837_s1 + $0x8] sm:$0xff]  }
   0xb   :  { %13050 = vst [vmem:[#allocation5_spill] sm:$0xff] %v9564_v32  ;;  %13051 = vst [vmem:[#allocation6_spill] sm:$0xff] %v9566_v33  ;;  %vm12845_vm1 = vcmp.lt.s32.totalorder %v9532_v16, 16  ;;  %vm12844_vm2 = vcmp.ge.s32.totalorder %v9561_v30, 1  ;;  %v9578_v39 = vshra.s32 %v43_v31, 4  ;;  %v55_v40 = vand.u32 15, %v9544_v20 }
   0xc   :  { %13052 = vst [vmem:[#allocation7_spill] sm:$0xff] %v9568_v34  ;;  %13053 = vst [vmem:[#allocation8_spill] sm:$0xff] %v9570_v35  ;;  %vm12849_vm3 = vcmp.ge.s32.totalorder %v9564_v32, 1  ;;  %vm12854_vm4 = vcmp.ge.s32.totalorder %v9566_v33, 1  ;;  %vm12851_vm5 = vcmp.ge.s32.totalorder %v9568_v34, 1  ;;  %vm12847_vm6 = vcmp.ge.s32.totalorder %v9570_v35, 1 }
   0xd   :  { %13054 = vst [vmem:[#allocation9_spill] sm:$0xff] %v9572_v36  ;;  %13055 = vst [vmem:[#allocation10_spill] sm:$0xff] %v9578_v39  ;;  %vm12846_vm7 = vcmp.ge.s32.totalorder %v9572_v36, 1  ;;  %vm12855_vm9 = vcmp.lt.s32.totalorder %v9532_v16, 17  ;;  %v9587_v43 = vshra.s32 %v42_v37, 4  ;;  %v56_v44 = vand.u32 15, %v9538_v18 }
   0xe   :  { %8675 = vrot.lane.b32.xlu1 %v8659_v8, %s9377_s9  ;;  %207 = vrot.lane.b32.xlu0 %v9432_v1, %s9376_s0  ;;  %v57_v45 = vand.u32 15, %v9541_v19  ;;  %vm9593_vm10 = vcmp.ge.s32.totalorder %v53_v38, 1  ;;  %vm12850_vm11 = vcmp.ge.s32.totalorder %v9578_v39, 1  ;;  %vm9600_vm12 = vcmp.ge.s32.totalorder %v55_v40, 1 }
   0xf   :  { %13056 = vst [vmem:[#allocation11_spill] sm:$0xff] %v9587_v43  ;;  %v13058_v50 = vsel %vm9593_vm10, 4294967295, %v13057_v50  ;;  %v54_v52 = vand.u32 15, %v9547_v21  ;;  %v52_v53 = vand.u32 15, %v9532_v16  ;;  %v59_v57 = vand.u32 15, %v9551_v23 }
  0x10   :  { %vm12848_vm13 = vcmp.ge.s32.totalorder %v9587_v43, 1  ;;  %v13105_v20 = vmov 0  ;;  %v13122_v19 = vmov 0  ;;  %v13126_v21 = vmov 0 }
  0x11   :  { %vm9624_vm14 = vcmp.ge.s32.totalorder %v54_v52, 1  ;;  %vm9630_vm15 = vcmp.ge.s32.totalorder %v52_v53, 1  ;;  %v13150_v23 = vmov 0  ;;  %v13154_v18 = vmov 0 }
  0x12   :  { %8680 = vrot.lane.b32.xlu1 %v8664_v7, %s9377_s9  ;;  %146 = vrot.lane.b32.xlu0 %v9468_v11, %s9377_s9  ;;  %v13064_v15 = vsel %vm9630_vm15, 4294967295, %v13063_v15 }
  0x16   :  { %8685 = vrot.lane.b32.xlu0 %v8669_v10, %s9377_s9  ;;  %148 = vrot.lane.b32.xlu1 %v9432_v1, %s9377_s9 }
  0x1a   :  { %8690 = vrot.lane.b32.xlu0 %v8659_v8, %s9378_s10  ;;  %675 = vrot.lane.b32.xlu1 %v9468_v11, %s9378_s10 }
  0x1e   :  { %8695 = vrot.lane.b32.xlu0 %v8664_v7, %s9378_s10  ;;  %8700 = vrot.lane.b32.xlu1 %v8669_v10, %s9378_s10 }
  0x22   :  { %677 = vrot.lane.b32.xlu0 %v9432_v1, %s9378_s10  ;;  %8705 = vrot.lane.b32.xlu1 %v8659_v8, %s9379_s11 }
  0x26   :  { %8710 = vrot.lane.b32.xlu1 %v8664_v7, %s9379_s11  ;;  %955 = vrot.lane.b32.xlu0 %v9468_v11, %s9379_s11 }
  0x2a   :  { %8715 = vrot.lane.b32.xlu0 %v8669_v10, %s9379_s11  ;;  %957 = vrot.lane.b32.xlu1 %v9432_v1, %s9379_s11 }
  0x2e   :  { %8720 = vrot.lane.b32.xlu0 %v8719_v13, %s9380_s12  ;;  %1468 = vrot.lane.b32.xlu1 %v9432_v1, %s9380_s12 }
  0x32   :  { %8725 = vrot.lane.b32.xlu0 %v8754_v12, %s9380_s12  ;;  %8730 = vrot.lane.b32.xlu1 %v8729_v14, %s9380_s12 }
  0x36   :  { %1470 = vrot.lane.b32.xlu0 %v9454_v6, %s9380_s12  ;;  %8735 = vrot.lane.b32.xlu1 %v8719_v13, %s9381_s13 }
  0x3a   :  { %8740 = vrot.lane.b32.xlu1 %v8754_v12, %s9381_s13  ;;  %1748 = vrot.lane.b32.xlu0 %v9432_v1, %s9381_s13 }
  0x3e   :  { %8745 = vrot.lane.b32.xlu0 %v8729_v14, %s9381_s13  ;;  %1750 = vrot.lane.b32.xlu1 %v9454_v6, %s9381_s13 }
  0x42   :  { %8750 = vrot.lane.b32.xlu0 %v8719_v13, %s9382_s14  ;;  %2028 = vrot.lane.b32.xlu1 %v9432_v1, %s9382_s14 }
  0x46   :  { %8755 = vrot.lane.b32.xlu0 %v8754_v12, %s9382_s14  ;;  %8760 = vrot.lane.b32.xlu1 %v8729_v14, %s9382_s14 }
  0x4a   :  { %2030 = vrot.lane.b32.xlu0 %v9454_v6, %s9382_s14  ;;  %8765 = vrot.lane.b32.xlu1 %v8719_v13, %s9383_s15 }
  0x4e   :  { %8770 = vrot.lane.b32.xlu1 %v8754_v12, %s9383_s15  ;;  %2308 = vrot.lane.b32.xlu0 %v9432_v1, %s9383_s15 }
  0x52   :  { %8775 = vrot.lane.b32.xlu0 %v8729_v14, %s9383_s15  ;;  %2310 = vrot.lane.b32.xlu1 %v9454_v6, %s9383_s15 }
  0x78   :  { %v8666_v41 = vpop.permute.xlu1 %8665  ;;  %v8661_v42 = vpop.permute.xlu0 %8660 }
  0x79   :  { %v8668_v46 = vunpack.i.h.bf16 %v8666_v41  ;;  %v8667_v47 = vunpack.i.l.bf16 %v8666_v41  ;;  %v8663_v48 = vunpack.i.h.bf16 %v8661_v42  ;;  %v8662_v49 = vunpack.i.l.bf16 %v8661_v42 }
  0x7b   :  { %v222_v54 = vsel %vm12845_vm1, %v8667_v47, %v8662_v49  ;;  %v223_v55 = vsel %vm12845_vm1, %v8668_v46, %v8667_v47  ;;  %v221_v56 = vsel %vm12845_vm1, %v8662_v49, %v8663_v48 }
  0x7c   :  { %v8671_v58 = vpop.permute.xlu1 %8670  ;;  %v206_v59 = vpop.permute.xlu0 %205  ;;  %v241_v60 = vsel %vm12849_vm3, %v222_v54, 0.0  ;;  %v240_v61 = vsel %vm12844_vm2, %v223_v55, 0.0  ;;  %v242_v62 = vsel %vm12846_vm7, %v221_v56, 0.0  ;;  %vm9660_vm2 = vmand %vm12846_vm7, %vm9624_vm14  ;;  %v13065_v55 = vmov 0 }
  0x7d   :  { %v8673_v63 = vunpack.i.h.bf16 %v8671_v58  ;;  %v8672_v7 = vunpack.i.l.bf16 %v8671_v58  ;;  %v249_v8 = vpack.c.bf16 %v241_v60, %v241_v60  ;;  %v248_v10 = vpack.c.bf16 %v240_v61, %v240_v61 }
  0x7e   :  { %v220_v12 = vsel %vm12845_vm1, %v8663_v48, %v206_v59  ;;  %v250_v13 = vpack.c.bf16 %v242_v62, %v242_v62  ;;  %v13066_v55 = vsel %vm9660_vm2, 4294967295, %v13065_v55  ;;  %vm9681_vm7 = vcmp.ge.s32.totalorder %v56_v44, 1 }
  0x7f   :  { %v216_v22 = vsel %vm12845_vm1, %v8673_v63, %v8668_v46  ;;  %7094 = vmatprep.subr.msk.bf16.mxu0 %vm12853_vm0, %v249_v8  ;;  %v270_v24 = vsel %vm12853_vm0, %v248_v10, 0  ;;  %v243_v25 = vsel %vm12847_vm6, %v220_v12, 0.0  ;;  %v217_v27 = vsel %vm12845_vm1, %v8672_v7, %v8673_v63  ;;  %13067 = vst [vmem:[#allocation12_spill] sm:$0xff] %v13066_v55 }
  0x80   :  { %v8676_v28 = vpop.permute.xlu1 %8675  ;;  %v208_v31 = vpop.permute.xlu0 %207  ;;  %294 = vmatpush1.bf16.msra.mxu0 %v270_v24  ;;  %v251_v37 = vpack.c.bf16 %v243_v25, %v243_v25  ;;  %v276_v41 = vsel %vm12853_vm0, %v250_v13, 0  ;;  %v247_v42 = vsel %vm12850_vm11, %v216_v22, 0.0  ;;  %v246_v46 = vsel %vm12848_vm13, %v217_v27, 0.0  ;;  %vm9700_vm13 = vmand %vm12849_vm3, %vm9593_vm10 }
  0x81   :  { %v8678_v47 = vunpack.i.h.bf16 %v8676_v28  ;;  %v8677_v48 = vunpack.i.l.bf16 %v8676_v28  ;;  %v218_v49 = vsel %vm12845_vm1, %v208_v31, %v8672_v7  ;;  %v219_v54 = vsel %vm12845_vm1, %v206_v59, %v208_v31  ;;  %vm9675_vm1 = vmand %vm12847_vm6, %vm9600_vm12 }
  0x82   :  { %v244_v56 = vsel %vm12854_vm4, %v219_v54, 0.0  ;;  %v245_v58 = vsel %vm12851_vm5, %v218_v49, 0.0  ;;  %7096 = vmatprep.subr.msk.bf16.mxu1 %vm12853_vm0, %v251_v37  ;;  %v255_v60 = vpack.c.bf16 %v247_v42, %v247_v42  ;;  %v254_v61 = vpack.c.bf16 %v246_v46, %v246_v46 }
  0x83   :  { %v252_v62 = vpack.c.bf16 %v244_v56, %v244_v56  ;;  %v253_v59 = vpack.c.bf16 %v245_v58, %v245_v58  ;;  %337 = vmatpush1.bf16.msra.mxu1 %v276_v41  ;;  %7095 = vmatmul.mubr.msk.bf16.vlgmr.msra.gmra.mrb[0].mxu0 %vm12852_vm8, %v9643_v26  ;;  %v13068_v63 = vmov 0  ;;  %v13071_v7 = vmov 0 }
  0x84   :  { %v13069_v63 = vsel %vm9675_vm1, 4294967295, %v13068_v63  ;;  %v13072_v7 = vsel %vm9681_vm7, 4294967295, %v13071_v7  ;;  %v162_v8 = vsel %vm12855_vm9, %v8677_v48, %v8678_v47  ;;  %7100 = vmatprep.subr.msk.bf16.mxu1 %vm12853_vm0, %v255_v60  ;;  %v8681_v10 = vpop.permute.xlu1 %8680  ;;  %v147_v12 = vpop.permute.xlu0 %146  ;;  %v288_v13 = vsel %vm12853_vm0, %v254_v61, 0  ;;  %411 = vmatprep.mubr.bf16.mxu0 %v12895_v9 }
  0x85   :  { %13070 = vst [vmem:[#allocation13_spill] sm:$0xff] %v13069_v63  ;;  %vm9691_vm6 = vcmp.ge.s32.totalorder %v57_v45, 1  ;;  %v13073_v22 = vmov 0  ;;  %v13075_v24 = vmov 0  ;;  %v183_v25 = vsel %vm9660_vm2, %v162_v8, 0.0  ;;  %7098 = vmatprep.subr.msk.bf16.mxu0 %vm12853_vm0, %v253_v59 }
  0x86   :  { %v13074_v22 = vsel %vm9691_vm6, 4294967295, %v13073_v22  ;;  %v13076_v24 = vsel %vm9700_vm13, 4294967295, %v13075_v24  ;;  %v12870_v27 = vand.u32 15, %v9559_v29  ;;  %v8683_v28 = vunpack.i.h.bf16 %v8681_v10  ;;  %7097 = vmatmul.mubr.msk.bf16.vlgmr.msra.gmra.mrb[0].mxu1 %vm12852_vm8, %v9643_v26 }
  0x87   :  { %13077 = vst [vmem:[#allocation14_spill] sm:$0xff] %v13076_v24  ;;  %v8682_v31 = vunpack.i.l.bf16 %v8681_v10  ;;  %v161_v37 = vsel %vm12855_vm9, %v8678_v47, %v147_v12  ;;  %v282_v41 = vsel %vm12853_vm0, %v252_v62, 0  ;;  %vm13078_vm3 = vcmp.ge.s32.totalorder %v9561_v30, 1  ;;  %423 = vmatpush1.bf16.msra.mxu1 %v288_v13  ;;  %454 = vmatprep.mubr.bf16.mxu1 %v12895_v9 }
  0x88   :  { %vm9715_vm11 = vmand %vm13078_vm3, %vm9630_vm15  ;;  %v13079_v42 = vmov 0  ;;  %v184_v46 = vsel %vm9675_vm1, %v161_v37, 0.0  ;;  %380 = vmatpush1.bf16.msra.mxu0 %v282_v41  ;;  %v191_v47 = vpack.c.bf16 %v183_v25, %v183_v25  ;;  %vm9725_vm5 = vcmp.ge.s32.totalorder %v59_v57, 1  ;;  %v8686_v61 = vpop.permute.xlu0 %8685  ;;  %v149_v62 = vpop.permute.xlu1 %148 }
  0x89   :  { %v13080_v42 = vsel %vm9715_vm11, 4294967295, %v13079_v42  ;;  %v13082_v49 = vmov 0  ;;  %v163_v54 = vsel %vm12855_vm9, %v8682_v31, %v8677_v48  ;;  %v192_v56 = vpack.c.bf16 %v184_v46, %v184_v46  ;;  %vm9735_vm3 = vmand %vm12854_vm4, %vm9681_vm7 }
  0x8a   :  { %13081 = vst [vmem:[#allocation15_spill] sm:$0xff] %v13080_v42  ;;  %v13083_v49 = vsel %vm9725_vm5, 4294967295, %v13082_v49  ;;  %v13084_v58 = vmov 0  ;;  %v164_v60 = vsel %vm12855_vm9, %v8683_v28, %v8682_v31  ;;  %vm13087_vm8 = vcmp.ge.s32.totalorder %v9568_v34, 1 }
  0x8b   :  { %v13085_v58 = vsel %vm9735_vm3, 4294967295, %v13084_v58  ;;  %vm9746_vm0 = vmand %vm13087_vm8, %vm9691_vm6  ;;  %v13088_v48 = vmov 0  ;;  %v182_v59 = vsel %vm9700_vm13, %v163_v54, 0.0  ;;  %v181_v8 = vsel %vm9715_vm11, %v164_v60, 0.0 }
  0x8c   :  { %13086 = vst [vmem:[#allocation16_spill] sm:$0xff] %v13085_v58  ;;  %v13089_v48 = vsel %vm9746_vm0, 4294967295, %v13088_v48  ;;  %vm9756_vm4 = vcmp.ge.s32.totalorder %v12870_v27, 1  ;;  %v13091_v10 = vmov 0  ;;  %v8688_v13 = vunpack.i.h.bf16 %v8686_v61 }
  0x8d   :  { %13090 = vst [vmem:[#allocation17_spill] sm:$0xff] %v13089_v48  ;;  %v13092_v10 = vsel %vm9756_vm4, 4294967295, %v13091_v10  ;;  %v8687_v25 = vunpack.i.l.bf16 %v8686_v61  ;;  %vm13093_vm9 = vcmask 1041408   ;;  %vm13094_vm8 = vcmp.lt.s32.totalorder %v9532_v16, 17 }
  0x8e   :  { %7105 = vmatprep.subr.msk.bf16.mxu1 %vm13093_vm9, %v192_v56  ;;  %v160_v31 = vsel %vm13094_vm8, %v147_v12, %v149_v62  ;;  %v190_v37 = vpack.c.bf16 %v182_v59, %v182_v59  ;;  %vm13095_vm2 = vcmp.ge.s32.totalorder %v9578_v39, 1  ;;  %v13096_v41 = vmov 0  ;;  %vm13103_vm7 = vmmov %vm13093_vm9 }
  0x8f   :  { %vm9767_vm1 = vmand %vm13095_vm2, %vm9725_vm5  ;;  %v185_v46 = vsel %vm9735_vm3, %v160_v31, 0.0  ;;  %v189_v54 = vpack.c.bf16 %v181_v8, %v181_v8  ;;  %vm9775_vm11 = vcmp.lt.s32.totalorder %v55_v40, 15  ;;  %v13099_v56 = vmov 0 }
  0x90   :  { %v13097_v41 = vsel %vm9767_vm1, 4294967295, %v13096_v41  ;;  %v13100_v56 = vsel %vm9775_vm11, 4294967295, %v13099_v56  ;;  %v157_v12 = vsel %vm13094_vm8, %v8688_v13, %v8683_v28  ;;  %vm13101_vm2 = vmmov %vm13094_vm8  ;;  %vm13102_vm13 = vcmask 31744   ;;  %7103 = vmatprep.subr.msk.bf16.mxu0 %vm13103_vm7, %v190_v37 }
  0x91   :  { %13098 = vst [vmem:[#allocation18_spill] sm:$0xff] %v13097_v41  ;;  %v159_v60 = vsel %vm13101_vm2, %v149_v62, %v8687_v25  ;;  %7099 = vmatmul.mubr.msk.bf16.vlgmr.msra.gmra.mrb[4].mxu0 %vm13102_vm13, %v9643_v26  ;;  %vm13104_vm3 = vmmov %vm13103_vm7  ;;  %vm9790_vm5 = vcmp.lt.s32.totalorder %v53_v38, 15  ;;  %vm13107_vm8 = vcmp.ge.s32.totalorder %v9587_v43, 1  ;;  %v13108_v40 = vmov 0  ;;  %v8691_v62 = vpop.permute.xlu0 %8690  ;;  %v9807_v38 = vpop.permute.xlu1 %675 }
  0x92   :  { %v480_v61 = vsel %vm13104_vm3, %v191_v47, 0  ;;  %v13106_v20 = vsel %vm9790_vm5, 4294967295, %v13105_v20  ;;  %vm9798_vm9 = vmand %vm13107_vm8, %vm9756_vm4  ;;  %v186_v28 = vsel %vm9746_vm0, %v159_v60, 0.0  ;;  %v188_v17 = vsel %vm9767_vm1, %v157_v12, 0.0  ;;  %529 = vmatprep.mubr.bf16.mxu0 %v12895_v9  ;;  %v2581_v12 = vld [vmem:[%s12838_s3 + $0x8] sm:$0xff] }
  0x93   :  { %v13109_v40 = vsel %vm9798_vm9, 4294967295, %v13108_v40  ;;  %vm13111_vm7 = vmmov %vm13104_vm3  ;;  %v193_v8 = vpack.c.bf16 %v185_v46, %v185_v46  ;;  %v194_v31 = vpack.c.bf16 %v186_v28, %v186_v28  ;;  %v8693_v37 = vunpack.i.h.bf16 %v8691_v62  ;;  %v9837_v46 = vld [vmem:[%s12837_s1] sm:$0xff]   ;;  %2589 = vperm.xlu1 %8780, %v2581_v12  }
  0x94   :  { %13110 = vst [vmem:[#allocation19_spill] sm:$0xff] %v13109_v40  ;;  %v474_v47 = vsel %vm13111_vm7, %v189_v54, 0  ;;  %vm13112_vm13 = vmmov %vm13101_vm2  ;;  %v196_v27 = vpack.c.bf16 %v188_v17, %v188_v17  ;;  %vm13113_vm3 = vcmask 31744   ;;  %v8692_v60 = vunpack.i.l.bf16 %v8691_v62 }
  0x95   :  { %v158_v59 = vsel %vm13112_vm13, %v8687_v25, %v8688_v13  ;;  %498 = vmatpush1.bf16.msra.mxu0 %v474_v47  ;;  %7101 = vmatmul.mubr.msk.bf16.vlgmr.msra.gmra.mrb[4].mxu1 %vm13113_vm3, %v9643_v26  ;;  %vm13114_vm2 = vcmp.ge.s32.totalorder %v9570_v35, 1  ;;  %v13115_v54 = vmov 0  ;;  %vm9826_vm7 = vcmp.lt.s32.totalorder %v57_v45, 15  ;;  %v2580_v45 = vld [vmem:[%s12838_s3] sm:$0xff] }
  0x96   :  { %vm9818_vm8 = vmand %vm13114_vm2, %vm9775_vm11  ;;  %v187_v13 = vsel %vm9798_vm9, %v158_v59, 0.0  ;;  %v13118_v25 = vmov 0  ;;  %541 = vmatpush1.bf16.msra.mxu1 %v480_v61  ;;  %vm13120_vm13 = vcmp.lt.s32.totalorder %v9532_v16, 15  ;;  %vm13121_vm3 = vcmask 1041408   ;;  %572 = vmatprep.mubr.bf16.mxu1 %v12895_v9  ;;  %v8701_v61 = vpop.permute.xlu1 %8700 }
  0x97   :  { %v13116_v54 = vsel %vm9818_vm8, 4294967295, %v13115_v54  ;;  %v13119_v25 = vsel %vm9826_vm7, 4294967295, %v13118_v25  ;;  %v690_v26 = vsel %vm13120_vm13, %v8693_v37, %v9807_v38  ;;  %7107 = vmatprep.subr.msk.bf16.mxu0 %vm13121_vm3, %v194_v31  ;;  %vm9841_vm2 = vcmp.lt.s32.totalorder %v54_v52, 15  ;;  %vm13124_vm13 = vmmov %vm13121_vm3  ;;  %v8696_v52 = vpop.permute.xlu0 %8695  ;;  %2584 = vperm.xlu0 %8779, %v2580_v45  }
  0x98   :  { %13117 = vst [vmem:[#allocation20_spill] sm:$0xff] %v13116_v54  ;;  %v13123_v19 = vsel %vm9841_vm2, 4294967295, %v13122_v19  ;;  %7109 = vmatprep.subr.msk.bf16.mxu1 %vm13124_vm13, %v196_v27  ;;  %vm13125_vm3 = vcmp.ge.s32.totalorder %v9564_v32, 1  ;;  %v195_v28 = vpack.c.bf16 %v187_v13, %v187_v13  ;;  %vm9863_vm0 = vcmp.lt.s32.totalorder %v52_v53, 15 }
  0x99   :  { %vm9856_vm9 = vmand %vm13125_vm3, %vm9790_vm5  ;;  %v13129_v62 = vmov 0  ;;  %v713_v27 = vsel %vm9818_vm8, %v690_v26, 0.0  ;;  %v8698_v47 = vunpack.i.h.bf16 %v8696_v52  ;;  %v8697_v17 = vunpack.i.l.bf16 %v8696_v52 }
  0x9a   :  { %v13127_v21 = vsel %vm9856_vm9, 4294967295, %v13126_v21  ;;  %v13130_v62 = vsel %vm9863_vm0, 4294967295, %v13129_v62  ;;  %v486_v59 = vsel %vm13124_vm13, %v193_v8, 0  ;;  %vm13131_vm3 = vcmp.ge.s32.totalorder %v9568_v34, 1  ;;  %v8706_v40 = vpop.permute.xlu1 %8705 }
  0x9b   :  { %13128 = vst [vmem:[#allocation21_spill] sm:$0xff] %v13127_v21  ;;  %vm9874_vm1 = vmand %vm13131_vm3, %vm9826_vm7  ;;  %v13132_v31 = vmov 0  ;;  %v8703_v53 = vunpack.i.h.bf16 %v8701_v61  ;;  %v8702_v13 = vunpack.i.l.bf16 %v8701_v61  ;;  %vm13135_vm8 = vcmp.ge.s32.totalorder %v9572_v36, 1 }
  0x9c   :  { %v13133_v31 = vsel %vm9874_vm1, 4294967295, %v13132_v31  ;;  %vm9882_vm11 = vmand %vm13135_vm8, %vm9841_vm2  ;;  %v13136_v26 = vmov 0  ;;  %vm13139_vm13 = vcmp.lt.s32.totalorder %v9532_v16, 15  ;;  %vm13142_vm5 = vcmask 31744  }
  0x9d   :  { %13134 = vst [vmem:[#allocation22_spill] sm:$0xff] %v13133_v31  ;;  %v13137_v26 = vsel %vm9882_vm11, 4294967295, %v13136_v26  ;;  %v691_v8 = vsel %vm13139_vm13, %v8692_v60, %v8693_v37  ;;  %vm13140_vm3 = vmmov %vm13139_vm13  ;;  %7104 = vmatmul.mubr.msk.bf16.vlgmr.msra.gmra.mrb[0].mxu0 %vm13142_vm5, %v9837_v46  ;;  %vm9896_vm4 = vcmp.lt.s32.totalorder %v59_v57, 15  ;;  %vm13145_vm8 = vcmp.ge.s32.totalorder %v9561_v30, 1  ;;  %v678_v57 = vpop.permute.xlu0 %677 }
  0x9e   :  { %13138 = vst [vmem:[#allocation23_spill] sm:$0xff] %v13137_v26  ;;  %v692_v52 = vsel %vm13140_vm3, %v8697_v17, %v8692_v60  ;;  %vm13141_vm7 = vmmov %vm13140_vm3  ;;  %v13146_v37 = vmov 0  ;;  %v721_v60 = vpack.c.bf16 %v713_v27, %v713_v27  ;;  %584 = vmatpush1.bf16.msra.mxu0 %v486_v59  ;;  %vm13149_vm5 = vcmask 1041408   ;;  %615 = vmatprep.mubr.bf16.mxu0 %v12895_v9  ;;  %v8711_v31 = vpop.permute.xlu1 %8710 }
  0x9f   :  { %v693_v45 = vsel %vm13141_vm7, %v8698_v47, %v8697_v17  ;;  %vm9904_vm13 = vmand %vm13145_vm8, %vm9863_vm0  ;;  %v711_v61 = vsel %vm9856_vm9, %v692_v52, 0.0  ;;  %v492_v17 = vsel %vm13149_vm5, %v195_v28, 0  ;;  %vm9913_vm7 = vcmp.lt.s32.totalorder %v56_v44, 15 }
  0xa0   :  { %v13147_v37 = vsel %vm9904_vm13, 4294967295, %v13146_v37  ;;  %v13151_v23 = vsel %vm9913_vm7, 4294967295, %v13150_v23  ;;  %v719_v58 = vpack.c.bf16 %v711_v61, %v711_v61  ;;  %v688_v27 = vsel %vm13140_vm3, %v678_v57, %v8702_v13  ;;  %vm13157_vm2 = vmmov %vm13140_vm3 }
  0xa1   :  { %13148 = vst [vmem:[#allocation24_spill] sm:$0xff] %v13147_v37  ;;  %v712_v52 = vsel %vm9882_vm11, %v691_v8, 0.0  ;;  %vm13152_vm8 = vcmask 31744   ;;  %vm13153_vm5 = vcmp.ge.s32.totalorder %v9578_v39, 1  ;;  %v686_v44 = vsel %vm13157_vm2, %v8703_v53, %v8698_v47  ;;  %v956_v48 = vpop.permute.xlu0 %955 }
  0xa2   :  { %7106 = vmatmul.mubr.msk.bf16.vlgmr.msra.gmra.mrb[0].mxu1 %vm13152_vm8, %v9837_v46  ;;  %vm9928_vm9 = vmand %vm13153_vm5, %vm9896_vm4  ;;  %v715_v28 = vsel %vm9874_vm1, %v688_v27, 0.0  ;;  %v710_v59 = vsel %vm9904_vm13, %v693_v45, 0.0  ;;  %vm13158_vm3 = vcmask 1041408   ;;  %vm13159_vm8 = vcmp.ge.s32.totalorder %v9566_v33, 1 }
  0xa3   :  { %v13155_v18 = vsel %vm9928_vm9, 4294967295, %v13154_v18  ;;  %627 = vmatpush1.bf16.msra.mxu1 %v492_v17  ;;  %7114 = vmatprep.subr.msk.bf16.mxu0 %vm13158_vm3, %v719_v58  ;;  %vm9943_vm5 = vmand %vm13159_vm8, %vm9913_vm7  ;;  %v13160_v8 = vmov 0  ;;  %v689_v47 = vsel %vm13157_vm2, %v9807_v38, %v678_v57  ;;  %v8707_v61 = vunpack.i.l.bf16 %v8706_v40 }
  0xa4   :  { %13156 = vst [vmem:[#allocation25_spill] sm:$0xff] %v13155_v18  ;;  %v13161_v8 = vsel %vm9943_vm5, 4294967295, %v13160_v8  ;;  %v718_v27 = vpack.c.bf16 %v710_v59, %v710_v59  ;;  %v13163_v9 = vand.u32 15, %v9559_v29  ;;  %7116 = vmatprep.subr.msk.bf16.mxu1 %vm13158_vm3, %v721_v60  ;;  %v13166_v58 = vmov 0   ;;  %vm13167_vm2 = vmmov %vm13158_vm3 }
  0xa5   :  { %13162 = vst [vmem:[#allocation26_spill] sm:$0xff] %v13161_v8  ;;  %658 = vmatprep.mubr.bf16.mxu1 %v13166_v58  ;;  %v720_v17 = vpack.c.bf16 %v712_v52, %v712_v52  ;;  %v717_v38 = vsel %vm9928_vm9, %v686_v44, 0.0  ;;  %v723_v57 = vpack.c.bf16 %v715_v28, %v715_v28  ;;  %v8712_v29 = vunpack.i.l.bf16 %v8711_v31 }
  0xa6   :  { %vm9952_vm1 = vcmp.lt.s32.totalorder %v13163_v9, 15  ;;  %v738_v59 = vsel %vm13167_vm2, %v718_v27, 0  ;;  %vm13168_vm11 = vcmp.lt.s32.totalorder %v9532_v16, 15  ;;  %v714_v60 = vsel %vm9943_vm5, %v689_v47, 0.0 }
  0xa7   :  { %v687_v9 = vsel %vm13168_vm11, %v8702_v13, %v8703_v53  ;;  %v8708_v41 = vunpack.i.h.bf16 %v8706_v40  ;;  %vm13169_vm3 = vcmp.ge.s32.totalorder %v9587_v43, 1  ;;  %v13170_v52 = vmov 0 }
  0xa8   :  { %vm9970_vm8 = vmand %vm13169_vm3, %vm9952_vm1  ;;  %vm13173_vm9 = vcmask 31744   ;;  %v8713_v44 = vunpack.i.h.bf16 %v8711_v31  ;;  %vm13174_vm2 = vcmp.lt.s32.totalorder %v9532_v16, 1  ;;  %vm13175_vm11 = vcmask 1041408  }
  0xa9   :  { %v13171_v52 = vsel %vm9970_vm8, 4294967295, %v13170_v52  ;;  %7108 = vmatmul.mubr.msk.bf16.vlgmr.msra.gmra.mrb[4].mxu0 %vm13173_vm9, %v9837_v46  ;;  %v972_v28 = vsel %vm13174_vm2, %v8712_v29, %v8707_v61  ;;  %v744_v53 = vsel %vm13175_vm11, %v720_v17, 0  ;;  %v725_v13 = vpack.c.bf16 %v717_v38, %v717_v38  ;;  %vm13176_vm5 = vmmov %vm13175_vm11  ;;  %v8716_v17 = vpop.permute.xlu0 %8715 }
  0xaa   :  { %13172 = vst [vmem:[#allocation27_spill] sm:$0xff] %v13171_v52  ;;  %762 = vmatpush1.bf16.msra.mxu0 %v738_v59  ;;  %793 = vmatprep.mubr.bf16.mxu0 %v13166_v58  ;;  %v722_v40 = vpack.c.bf16 %v714_v60, %v714_v60  ;;  %v716_v47 = vsel %vm9970_vm8, %v687_v9, 0.0  ;;  %vm13177_vm3 = vmmov %vm13173_vm9  ;;  %v991_v31 = vsel %vm9593_vm10, %v972_v28, 0.0  ;;  %v973_v38 = vsel %vm13174_vm2, %v8713_v44, %v8712_v29  ;;  %v958_v9 = vpop.permute.xlu1 %957 }
  0xab   :  { %7118 = vmatprep.subr.msk.bf16.mxu0 %vm13176_vm5, %v723_v57  ;;  %7110 = vmatmul.mubr.msk.bf16.vlgmr.msra.gmra.mrb[4].mxu1 %vm13177_vm3, %v9837_v46  ;;  %vm13178_vm9 = vmmov %vm13174_vm2  ;;  %v9107_v57 = vld [vmem:[%s12837_s1 + $0x10] sm:$0xff]   ;;  %v8717_v59 = vunpack.i.l.bf16 %v8716_v17  ;;  %v724_v46 = vpack.c.bf16 %v716_v47, %v716_v47  ;;  %v8718_v52 = vunpack.i.h.bf16 %v8716_v17  ;;  %v990_v8 = vsel %vm9630_vm15, %v973_v38, 0.0 }
  0xac   :  { %v970_v27 = vsel %vm13178_vm9, %v8708_v41, %v956_v48  ;;  %805 = vmatpush1.bf16.msra.mxu1 %v744_v53  ;;  %836 = vmatprep.mubr.bf16.mxu1 %v13166_v58  ;;  %vm13179_vm11 = vmmov %vm13176_vm5  ;;  %v999_v53 = vpack.c.bf16 %v991_v31, %v991_v31  ;;  %vm13181_vm9 = vcmask 31744   ;;  %vm13190_vm13 = vcmask 31744  }
  0xad   :  { %7120 = vmatprep.subr.msk.bf16.mxu1 %vm13176_vm5, %v725_v13  ;;  %v993_v60 = vsel %vm9600_vm12, %v970_v27, 0.0  ;;  %v750_v28 = vsel %vm13179_vm11, %v722_v40, 0  ;;  %vm13180_vm3 = vmmov %vm13174_vm2  ;;  %v968_v13 = vsel %vm13174_vm2, %v958_v9, %v8717_v59  ;;  %v756_v18 = vsel %vm13176_vm5, %v724_v46, 0 }
  0xae   :  { %v971_v29 = vsel %vm13180_vm3, %v8707_v61, %v8708_v41  ;;  %v1001_v47 = vpack.c.bf16 %v993_v60, %v993_v60  ;;  %vm13182_vm11 = vmmov %vm13176_vm5  ;;  %v998_v61 = vpack.c.bf16 %v990_v8, %v990_v8  ;;  %v995_v31 = vsel %vm9691_vm6, %v968_v13, 0.0 }
  0xaf   :  { %v992_v41 = vsel %vm9624_vm14, %v971_v29, 0.0  ;;  %vm13183_vm3 = vmmov %vm13181_vm9  ;;  %v1003_v38 = vpack.c.bf16 %v995_v31, %v995_v31  ;;  %v1230_v13 = vpack.c.bf16 %v9450_v5, %v9450_v5 }
  0xb0   :  { %vm13184_vm8 = vmmov %vm13174_vm2  ;;  %v1000_v17 = vpack.c.bf16 %v992_v41, %v992_v41  ;;  %v1469_v41 = vpop.permute.xlu1 %1468 }
  0xb1   :  { %7115 = vmatmul.mubr.msk.bf16.vlgmr.msra.gmra.mrb[0].mxu0 %vm13181_vm9, %v9107_v57  ;;  %v966_v40 = vsel %vm13184_vm8, %v8718_v52, %v8713_v44  ;;  %vm13185_vm9 = vmmov %vm13174_vm2  ;;  %v967_v44 = vsel %vm13184_vm8, %v8717_v59, %v8718_v52  ;;  %v8721_v52 = vpop.permute.xlu0 %8720  ;;  %v9108_v59 = vld [vmem:[%s12837_s1 + $0x18] sm:$0xff]  }
  0xb2   :  { %848 = vmatpush1.bf16.msra.mxu0 %v750_v28  ;;  %879 = vmatprep.mubr.bf16.mxu0 %v13166_v58  ;;  %v969_v27 = vsel %vm13185_vm9, %v956_v48, %v958_v9  ;;  %vm13186_vm2 = vmmov %vm13176_vm5  ;;  %vm13187_vm5 = vnez %v13083_v49  ;;  %v8722_v5 = vunpack.i.l.bf16 %v8721_v52 }
  0xb3   :  { %7125 = vmatprep.subr.msk.bf16.mxu0 %vm13182_vm11, %v999_v53  ;;  %7117 = vmatmul.mubr.msk.bf16.vlgmr.msra.gmra.mrb[0].mxu1 %vm13183_vm3, %v9107_v57  ;;  %v997_v8 = vsel %vm13187_vm5, %v966_v40, 0.0  ;;  %vm13188_vm11 = vmmov %vm13186_vm2  ;;  %vm13189_vm3 = vnez %v13072_v7  ;;  %vm13192_vm5 = vnez %v13092_v10  ;;  %v1229_v40 = vpack.c.bf16 %v9427_v0, %v9427_v0 }
  0xb4   :  { %891 = vmatpush1.bf16.msra.mxu1 %v756_v18  ;;  %922 = vmatprep.mubr.bf16.mxu1 %v13166_v58  ;;  %v1018_v46 = vsel %vm13188_vm11, %v998_v61, 0  ;;  %v994_v18 = vsel %vm13189_vm3, %v969_v27, 0.0  ;;  %vm13191_vm9 = vmmov %vm13186_vm2  ;;  %v1005_v9 = vpack.c.bf16 %v997_v8, %v997_v8  ;;  %v996_v28 = vsel %vm13192_vm5, %v967_v44, 0.0  ;;  %v8731_v8 = vpop.permute.xlu1 %8730 }
  0xb5   :  { %7127 = vmatprep.subr.msk.bf16.mxu1 %vm13186_vm2, %v1001_v47  ;;  %v1024_v48 = vsel %vm13191_vm9, %v1000_v17, 0  ;;  %v1002_v60 = vpack.c.bf16 %v994_v18, %v994_v18  ;;  %vm13193_vm11 = vmmov %vm13190_vm13  ;;  %v1004_v53 = vpack.c.bf16 %v996_v28, %v996_v28  ;;  %v1232_v47 = vpack.c.bf16 %v9468_v11, %v9468_v11  ;;  %v8726_v61 = vpop.permute.xlu0 %8725 }
  0xb6   :  { %vm13195_vm8 = vmmov %vm13186_vm2  ;;  %v8728_v31 = vunpack.i.h.bf16 %v8726_v61  ;;  %v1231_v11 = vpack.c.bf16 %v9446_v4, %v9446_v4  ;;  %v1249_v27 = vsel %vm13186_vm2, %v1229_v40, 0  ;;  %v1234_v17 = vpack.c.bf16 %v9454_v6, %v9454_v6 }
  0xb7   :  { %v1030_v29 = vsel %vm13195_vm8, %v1002_v60, 0  ;;  %vm13196_vm9 = vmmov %vm13193_vm11  ;;  %vm12923_vm8 = vcmp.lt.s32.totalorder %v9532_v16, 127  ;;  %v8723_v0 = vunpack.i.h.bf16 %v8721_v52  ;;  %v1236_v4 = vpack.c.bf16 %v9441_v3, %v9441_v3  ;;  %v9109_v3 = vld [vmem:[%s12837_s1 + $0x20] sm:$0xff]  }
  0xb8   :  { %v1233_v6 = vpack.c.bf16 %v9432_v1, %v9432_v1  ;;  %v8732_v1 = vunpack.i.l.bf16 %v8731_v8  ;;  %v1235_v28 = vpack.c.bf16 %v9437_v2, %v9437_v2 }
  0xb9   :  { %7119 = vmatmul.mubr.msk.bf16.vlgmr.msra.gmra.mrb[4].mxu0 %vm13190_vm13, %v9107_v57  ;;  %vm13194_vm13 = vmmov %vm13186_vm2  ;;  %v1480_v18 = vsel %vm12923_vm8, %v8723_v0, %v1469_v41  ;;  %v1471_v52 = vpop.permute.xlu0 %1470 }
  0xba   :  { %1042 = vmatpush1.bf16.msra.mxu0 %v1018_v46  ;;  %1073 = vmatprep.mubr.bf16.mxu0 %v13166_v58  ;;  %v1482_v46 = vsel %vm12923_vm8, %v8728_v31, %v8722_v5 }
  0xbb   :  { %7129 = vmatprep.subr.msk.bf16.mxu0 %vm13186_vm2, %v1003_v38  ;;  %7121 = vmatmul.mubr.msk.bf16.vlgmr.msra.gmra.mrb[4].mxu1 %vm13193_vm11, %v9107_v57  ;;  %v1036_v57 = vsel %vm13186_vm2, %v1004_v53, 0  ;;  %vm13197_vm11 = vmmov %vm13186_vm2  ;;  %v8727_v38 = vunpack.i.l.bf16 %v8726_v61  ;;  %v1478_v61 = vsel %vm12923_vm8, %v1471_v52, %v8732_v1 }
  0xbc   :  { %1085 = vmatpush1.bf16.msra.mxu1 %v1024_v48  ;;  %1116 = vmatprep.mubr.bf16.mxu1 %v13166_v58 }
  0xbd   :  { %7131 = vmatprep.subr.msk.bf16.mxu1 %vm13194_vm13, %v1005_v9  ;;  %vm13198_vm13 = vmmov %vm13196_vm9  ;;  %v10074_v9 = vpop.permute.xlu1 %8735  ;;  %v1483_v60 = vsel %vm12923_vm8, %v8727_v38, %v8728_v31 }
  0xc1   :  { %7126 = vmatmul.mubr.msk.bf16.vlgmr.msra.gmra.mrb[0].mxu0 %vm13196_vm9, %v9108_v59  ;;  %vm13199_vm9 = vmmov %vm13186_vm2  ;;  %v10097_v31 = vpop.permute.xlu1 %8740 }
  0xc2   :  { %1128 = vmatpush1.bf16.msra.mxu0 %v1030_v29  ;;  %1159 = vmatprep.mubr.bf16.mxu0 %v13166_v58 }
  0xc3   :  { %7136 = vmatprep.subr.msk.bf16.mxu0 %vm13197_vm11, %v1230_v13  ;;  %7128 = vmatmul.mubr.msk.bf16.vlgmr.msra.gmra.mrb[0].mxu1 %vm13198_vm13, %v9108_v59  ;;  %vm13200_vm11 = vmmov %vm13198_vm13  ;;  %v1481_v13 = vsel %vm12923_vm8, %v8722_v5, %v8723_v0 }
  0xc4   :  { %1171 = vmatpush1.bf16.msra.mxu1 %v1036_v57  ;;  %1202 = vmatprep.mubr.bf16.mxu1 %v13166_v58  ;;  %vm13201_vm13 = vmmov %vm13186_vm2  ;;  %v8733_v57 = vunpack.i.h.bf16 %v8731_v8  ;;  %v1479_v8 = vsel %vm12923_vm8, %v1469_v41, %v1471_v52  ;;  %v13214_v52 = vmov 0 }
  0xc5   :  { %7138 = vmatprep.subr.msk.bf16.mxu1 %vm13199_vm9, %v1232_v47  ;;  %v1255_v44 = vsel %vm13201_vm13, %v1231_v11, 0  ;;  %vm13202_vm9 = vmmov %vm13186_vm2  ;;  %v1501_v47 = vsel %vm9863_vm0, %v1483_v60, 0.0  ;;  %v10099_v11 = vpop.permute.xlu0 %1748  ;;  %vm13211_vm0 = vnez %v13119_v25  ;;  %v8738_v60 = vunpack.i.h.bf16 %v10074_v9 }
  0xc6   :  { %vm13203_vm2 = vmmov %vm13200_vm11  ;;  %v1506_v0 = vsel %vm13211_vm0, %v1478_v61, 0.0  ;;  %v1477_v41 = vsel %vm12923_vm8, %v8732_v1, %v8733_v57 }
  0xc7   :  { %vm13205_vm13 = vmmov %vm13202_vm9 }
  0xc9   :  { %7130 = vmatmul.mubr.msk.bf16.vlgmr.msra.gmra.mrb[4].mxu0 %vm13200_vm11, %v9108_v59  ;;  %vm13204_vm11 = vnez %v13106_v20 }
  0xca   :  { %1273 = vmatpush1.bf16.msra.mxu0 %v1249_v27  ;;  %1304 = vmatprep.mubr.bf16.mxu0 %v13166_v58  ;;  %v1502_v48 = vsel %vm13204_vm11, %v1482_v46, 0.0  ;;  %vm13208_vm11 = vcmask 31744   ;;  %v1509_v27 = vpack.c.bf16 %v1501_v47, %v1501_v47  ;;  %v8737_v46 = vunpack.i.l.bf16 %v10074_v9 }
  0xcb   :  { %7140 = vmatprep.subr.msk.bf16.mxu0 %vm13202_vm9, %v1234_v17  ;;  %7132 = vmatmul.mubr.msk.bf16.vlgmr.msra.gmra.mrb[4].mxu1 %vm13203_vm2, %v9108_v59  ;;  %vm13206_vm9 = vnez %v13100_v56  ;;  %vm13207_vm2 = vmmov %vm13205_vm13  ;;  %v1510_v29 = vpack.c.bf16 %v1502_v48, %v1502_v48  ;;  %v1484_v17 = vsel %vm12923_vm8, %v8733_v57, %v8727_v38  ;;  %v1505_v48 = vsel %vm9913_vm7, %v1479_v8, 0.0 }
  0xcc   :  { %1316 = vmatpush1.bf16.msra.mxu1 %v1255_v44  ;;  %1347 = vmatprep.mubr.bf16.mxu1 %v13166_v58  ;;  %v1504_v59 = vsel %vm13206_vm9, %v1480_v18, 0.0  ;;  %v1261_v53 = vsel %vm13207_vm2, %v1233_v6, 0  ;;  %vm13210_vm9 = vnez %v13123_v19  ;;  %v8743_v44 = vunpack.i.h.bf16 %v10097_v31  ;;  %vm13212_vm0 = vmmov %vm13207_vm2 }
  0xcd   :  { %7142 = vmatprep.subr.msk.bf16.mxu1 %vm13205_vm13, %v1236_v4  ;;  %v1512_v2 = vpack.c.bf16 %v1504_v59, %v1504_v59  ;;  %vm13209_vm13 = vmmov %vm13207_vm2  ;;  %v1503_v5 = vsel %vm13210_vm9, %v1481_v13, 0.0  ;;  %v1508_v38 = vsel %vm9896_vm4, %v1484_v17, 0.0  ;;  %v1514_v6 = vpack.c.bf16 %v1506_v0, %v1506_v0  ;;  %v1751_v17 = vpop.permute.xlu1 %1750 }
  0xce   :  { %v1267_v40 = vsel %vm13209_vm13, %v1235_v28, 0  ;;  %vm12926_vm13 = vcmp.lt.s32.totalorder %v9564_v32, 15  ;;  %v1511_v4 = vpack.c.bf16 %v1503_v5, %v1503_v5  ;;  %v1529_v18 = vsel %vm13212_vm0, %v1509_v27, 0  ;;  %v10125_v28 = vpop.permute.xlu0 %8745 }
  0xcf   :  { %v8742_v59 = vunpack.i.l.bf16 %v10097_v31  ;;  %vm13217_vm0 = vcmp.lt.s32.totalorder %v9532_v16, 113  ;;  %vm12928_vm8 = vcmp.lt.s32.totalorder %v9570_v35, 15  ;;  %vm13218_vm7 = vcmask 1041408  }
  0xd0   :  { %v1762_v1 = vsel %vm13217_vm0, %v8743_v44, %v8737_v46  ;;  %v1535_v9 = vsel %vm13218_vm7, %v1511_v4, 0  ;;  %v1507_v13 = vsel %vm9952_vm1, %v1477_v41, 0.0  ;;  %v13221_v47 = vmov 0 }
  0xd1   :  { %7137 = vmatmul.mubr.msk.bf16.vlgmr.msra.gmra.mrb[0].mxu0 %vm13208_vm11, %v9109_v3  ;;  %v1760_v61 = vsel %vm13217_vm0, %v8738_v60, %v10099_v11  ;;  %v8747_v31 = vunpack.i.l.bf16 %v10125_v28  ;;  %v13225_v5 = vmov 0  ;;  %v1515_v27 = vpack.c.bf16 %v1507_v13, %v1507_v13 }
  0xd2   :  { %1359 = vmatpush1.bf16.msra.mxu0 %v1261_v53  ;;  %1390 = vmatprep.mubr.bf16.mxu0 %v13166_v58  ;;  %v1516_v53 = vpack.c.bf16 %v1508_v38, %v1508_v38  ;;  %v8748_v38 = vunpack.i.h.bf16 %v10125_v28  ;;  %v10211_v28 = vpop.permute.xlu1 %2028 }
  0xd3   :  { %7147 = vmatprep.subr.msk.bf16.mxu0 %vm13207_vm2, %v1510_v29  ;;  %7139 = vmatmul.mubr.msk.bf16.vlgmr.msra.gmra.mrb[0].mxu1 %vm13208_vm11, %v9109_v3  ;;  %v1513_v29 = vpack.c.bf16 %v1505_v48, %v1505_v48 }
  0xd4   :  { %1402 = vmatpush1.bf16.msra.mxu1 %v1267_v40  ;;  %1433 = vmatprep.mubr.bf16.mxu1 %v13166_v58  ;;  %v9110_v40 = vld [vmem:[%s12837_s1 + $0x28] sm:$0xff]  }
  0xd5   :  { %7149 = vmatprep.subr.msk.bf16.mxu1 %vm13207_vm2, %v1512_v2  ;;  %vm13213_vm2 = vmmov %vm13208_vm11  ;;  %v10160_v2 = vpop.permute.xlu0 %8750 }
  0xd6   :  { %vm10132_vm11 = vmand %vm12926_vm13, %vm9593_vm10  ;;  %vm13220_vm10 = vcmask 31744  }
  0xd7   :  { %v13215_v52 = vsel %vm10132_vm11, 4294967295, %v13214_v52  ;;  %vm13219_vm13 = vmmov %vm13218_vm7  ;;  %v1782_v57 = vsel %vm10132_vm11, %v1762_v1, 0.0 }
  0xd8   :  { %13216 = vst [vmem:[#allocation28_spill] sm:$0xff] %v13215_v52  ;;  %vm10153_vm7 = vmand %vm12928_vm8, %vm9600_vm12 }
  0xd9   :  { %7141 = vmatmul.mubr.msk.bf16.vlgmr.msra.gmra.mrb[4].mxu0 %vm13213_vm2, %v9109_v3  ;;  %vm12931_vm2 = vcmp.lt.s32.totalorder %v9561_v30, 15  ;;  %v13222_v47 = vsel %vm10153_vm7, 4294967295, %v13221_v47  ;;  %vm13228_vm8 = vmmov %vm13219_vm13  ;;  %v1784_v0 = vsel %vm10153_vm7, %v1760_v61, 0.0  ;;  %v10213_v1 = vpop.permute.xlu0 %8755  ;;  %v13250_v61 = vmov 0 }
  0xda   :  { %1553 = vmatpush1.bf16.msra.mxu0 %v1529_v18  ;;  %1584 = vmatprep.mubr.bf16.mxu0 %v13166_v58  ;;  %13223 = vst [vmem:[#allocation29_spill] sm:$0xff] %v13222_v47  ;;  %vm13229_vm11 = vmmov %vm13228_vm8  ;;  %v1792_v48 = vpack.c.bf16 %v1784_v0, %v1784_v0 }
  0xdb   :  { %7151 = vmatprep.subr.msk.bf16.mxu0 %vm13219_vm13, %v1514_v6  ;;  %7143 = vmatmul.mubr.msk.bf16.vlgmr.msra.gmra.mrb[4].mxu1 %vm13220_vm10, %v9109_v3  ;;  %vm13224_vm10 = vmmov %vm13217_vm0  ;;  %v1541_v8 = vsel %vm13229_vm11, %v1513_v29, 0  ;;  %v13232_v6 = vmov 0  ;;  %vm12938_vm11 = vcmp.lt.s32.totalorder %v9578_v39, 15  ;;  %v13245_v29 = vmov 0 }
  0xdc   :  { %1596 = vmatpush1.bf16.msra.mxu1 %v1535_v9  ;;  %v1763_v3 = vsel %vm13224_vm10, %v8742_v59, %v8743_v44  ;;  %1627 = vmatprep.mubr.bf16.mxu1 %v13166_v58  ;;  %vm10174_vm0 = vmand %vm12931_vm2, %vm9630_vm15  ;;  %v1790_v44 = vpack.c.bf16 %v1782_v57, %v1782_v57  ;;  %vm13231_vm2 = vcmp.lt.s32.totalorder %v9572_v36, 15  ;;  %vm13241_vm15 = vcmask 1041408  }
  0xdd   :  { %v13226_v5 = vsel %vm10174_vm0, 4294967295, %v13225_v5  ;;  %7153 = vmatprep.subr.msk.bf16.mxu1 %vm13228_vm8, %v1516_v53  ;;  %vm13230_vm13 = vmmov %vm13224_vm10  ;;  %v1781_v18 = vsel %vm10174_vm0, %v1763_v3, 0.0  ;;  %vm13235_vm10 = vcmask 31744   ;;  %vm13248_vm0 = vcmp.lt.s32.totalorder %v9532_v16, 113 }
  0xde   :  { %13227 = vst [vmem:[#allocation30_spill] sm:$0xff] %v13226_v5  ;;  %v1761_v4 = vsel %vm13230_vm13, %v8737_v46, %v8738_v60  ;;  %vm10190_vm8 = vmand %vm13231_vm2, %vm9624_vm14  ;;  %vm13236_vm13 = vcmp.lt.s32.totalorder %v9568_v34, 15  ;;  %v13237_v46 = vmov 0  ;;  %vm13240_vm2 = vcmp.lt.s32.totalorder %v9532_v16, 113 }
  0xdf   :  { %v13233_v6 = vsel %vm10190_vm8, 4294967295, %v13232_v6  ;;  %vm10202_vm7 = vmand %vm13236_vm13, %vm9691_vm6  ;;  %v1758_v41 = vsel %vm13240_vm2, %v1751_v17, %v8747_v31  ;;  %v1547_v60 = vsel %vm13241_vm15, %v1515_v27, 0  ;;  %v1783_v9 = vsel %vm10190_vm8, %v1761_v4, 0.0 }
  0xe0   :  { %13234 = vst [vmem:[#allocation31_spill] sm:$0xff] %v13233_v6  ;;  %v13238_v46 = vsel %vm10202_vm7, 4294967295, %v13237_v46  ;;  %v1789_v53 = vpack.c.bf16 %v1781_v18, %v1781_v18  ;;  %vm13243_vm13 = vcmask 31744   ;;  %vm13244_vm2 = vnez %v13083_v49 }
  0xe1   :  { %7148 = vmatmul.mubr.msk.bf16.vlgmr.msra.gmra.mrb[0].mxu0 %vm13235_vm10, %v9110_v40  ;;  %13239 = vst [vmem:[#allocation32_spill] sm:$0xff] %v13238_v46  ;;  %vm13242_vm10 = vmmov %vm13241_vm15  ;;  %v1764_v13 = vsel %vm13248_vm0, %v8748_v38, %v8742_v59  ;;  %v1786_v57 = vsel %vm10202_vm7, %v1758_v41, 0.0  ;;  %v8752_v59 = vunpack.i.l.bf16 %v10160_v2  ;;  %v8758_v27 = vunpack.i.h.bf16 %v10213_v1  ;;  %v8761_v41 = vpop.permute.xlu1 %8760 }
  0xe2   :  { %1639 = vmatpush1.bf16.msra.mxu0 %v1541_v8  ;;  %1670 = vmatprep.mubr.bf16.mxu0 %v13166_v58  ;;  %vm10223_vm15 = vmand %vm12938_vm11, %vm13244_vm2  ;;  %vm13254_vm7 = vcmask 1041408   ;;  %v1791_v0 = vpack.c.bf16 %v1783_v9, %v1783_v9  ;;  %v8753_v18 = vunpack.i.h.bf16 %v10160_v2  ;;  %vm13299_vm6 = vcmp.lt.s32.totalorder %v9532_v16, 111 }
  0xe3   :  { %7158 = vmatprep.subr.msk.bf16.mxu0 %vm13242_vm10, %v1790_v44  ;;  %7150 = vmatmul.mubr.msk.bf16.vlgmr.msra.gmra.mrb[0].mxu1 %vm13243_vm13, %v9110_v40  ;;  %v13246_v29 = vsel %vm10223_vm15, 4294967295, %v13245_v29  ;;  %vm13249_vm10 = vcmp.lt.s32.totalorder %v9566_v33, 15  ;;  %vm13253_vm11 = vmmov %vm13248_vm0  ;;  %vm12945_vm0 = vcmp.lt.s32.totalorder %v9587_v43, 15  ;;  %v1788_v8 = vsel %vm10223_vm15, %v1764_v13, 0.0 }
  0xe4   :  { %13247 = vst [vmem:[#allocation33_spill] sm:$0xff] %v13246_v29  ;;  %1682 = vmatpush1.bf16.msra.mxu1 %v1547_v60  ;;  %vm10235_vm13 = vmand %vm13249_vm10, %vm13189_vm3  ;;  %v1759_v3 = vsel %vm13253_vm11, %v10099_v11, %v1751_v17  ;;  %1713 = vmatprep.mubr.bf16.mxu1 %v13166_v58  ;;  %v1794_v44 = vpack.c.bf16 %v1786_v57, %v1786_v57  ;;  %vm13259_vm10 = vcmask 31744   ;;  %v8757_v60 = vunpack.i.l.bf16 %v10213_v1 }
  0xe5   :  { %v13251_v61 = vsel %vm10235_vm13, 4294967295, %v13250_v61  ;;  %7160 = vmatprep.subr.msk.bf16.mxu1 %vm13254_vm7, %v1792_v48  ;;  %vm13255_vm8 = vmmov %vm13254_vm7  ;;  %v1757_v11 = vsel %vm13253_vm11, %v8747_v31, %v8748_v38  ;;  %v1785_v17 = vsel %vm10235_vm13, %v1759_v3, 0.0  ;;  %v13256_v48 = vmov 0  ;;  %v10279_v57 = vpop.permute.xlu1 %8765 }
  0xe6   :  { %13252 = vst [vmem:[#allocation34_spill] sm:$0xff] %v13251_v61  ;;  %v1809_v4 = vsel %vm13255_vm8, %v1789_v53, 0  ;;  %vm10260_vm7 = vmand %vm12945_vm0, %vm13192_vm5  ;;  %vm13260_vm8 = vcmp.lt.s32.totalorder %v9532_v16, 112  ;;  %vm13261_vm11 = vcmask 1041408   ;;  %v1796_v2 = vpack.c.bf16 %v1788_v8, %v1788_v8 }
  0xe7   :  { %v13257_v48 = vsel %vm10260_vm7, 4294967295, %v13256_v48  ;;  %v2042_v31 = vsel %vm13260_vm8, %v8758_v27, %v8752_v59  ;;  %v1815_v38 = vsel %vm13261_vm11, %v1791_v0, 0  ;;  %v1793_v9 = vpack.c.bf16 %v1785_v17, %v1785_v17  ;;  %vm13262_vm15 = vmmov %vm13261_vm11  ;;  %v9111_v0 = vld [vmem:[%s12837_s1 + $0x30] sm:$0xff]  }
  0xe8   :  { %13258 = vst [vmem:[#allocation35_spill] sm:$0xff] %v13257_v48  ;;  %v1787_v53 = vsel %vm10260_vm7, %v1757_v11, 0.0  ;;  %vm13263_vm0 = vmmov %vm13259_vm10  ;;  %vm13271_vm7 = vcmask 31744   ;;  %v13310_v29 = vmov 0 }
  0xe9   :  { %7152 = vmatmul.mubr.msk.bf16.vlgmr.msra.gmra.mrb[4].mxu0 %vm13259_vm10, %v9110_v40  ;;  %vm13264_vm10 = vmmov %vm13260_vm8  ;;  %vm13265_vm8 = vcmp.lt.s32.totalorder %v9564_v32, 15  ;;  %v1795_v8 = vpack.c.bf16 %v1787_v53, %v1787_v53 }
  0xea   :  { %1833 = vmatpush1.bf16.msra.mxu0 %v1809_v4  ;;  %1864 = vmatprep.mubr.bf16.mxu0 %v13166_v58  ;;  %v2040_v1 = vsel %vm13264_vm10, %v8753_v18, %v10211_v28  ;;  %v2062_v13 = vsel %vm13265_vm8, %v2042_v31, 0.0  ;;  %vm13266_vm11 = vmmov %vm13264_vm10  ;;  %v8763_v31 = vunpack.i.h.bf16 %v8761_v41 }
  0xeb   :  { %7162 = vmatprep.subr.msk.bf16.mxu0 %vm13262_vm15, %v1794_v44  ;;  %7154 = vmatmul.mubr.msk.bf16.vlgmr.msra.gmra.mrb[4].mxu1 %vm13263_vm0, %v9110_v40  ;;  %v2043_v3 = vsel %vm13266_vm11, %v8757_v60, %v8758_v27  ;;  %v8762_v40 = vunpack.i.l.bf16 %v8761_v41  ;;  %v2031_v44 = vpop.permute.xlu0 %2030  ;;  %vm13267_vm0 = vcmp.lt.s32.totalorder %v9570_v35, 15  ;;  %vm13268_vm10 = vmmov %vm13262_vm15  ;;  %v2070_v17 = vpack.c.bf16 %v2062_v13, %v2062_v13 }
  0xec   :  { %1876 = vmatpush1.bf16.msra.mxu1 %v1815_v38  ;;  %1907 = vmatprep.mubr.bf16.mxu1 %v13166_v58  ;;  %v2064_v4 = vsel %vm13267_vm0, %v2040_v1, 0.0  ;;  %v1821_v11 = vsel %vm13268_vm10, %v1793_v9, 0  ;;  %vm13269_vm8 = vmmov %vm13266_vm11  ;;  %vm13270_vm11 = vcmp.lt.s32.totalorder %v9561_v30, 15  ;;  %v10300_v9 = vpop.permute.xlu1 %8770 }
  0xed   :  { %7164 = vmatprep.subr.msk.bf16.mxu1 %vm13262_vm15, %v1796_v2  ;;  %v2041_v27 = vsel %vm13269_vm8, %v8752_v59, %v8753_v18  ;;  %v2061_v38 = vsel %vm13270_vm11, %v2043_v3, 0.0  ;;  %vm13272_vm13 = vmmov %vm13269_vm8  ;;  %v2072_v53 = vpack.c.bf16 %v2064_v4, %v2064_v4  ;;  %v8767_v3 = vunpack.i.l.bf16 %v10279_v57 }
  0xee   :  { %v2038_v2 = vsel %vm13272_vm13, %v2031_v44, %v8762_v40  ;;  %vm13273_vm15 = vmmov %vm13268_vm10  ;;  %v2069_v18 = vpack.c.bf16 %v2061_v38, %v2061_v38  ;;  %v13287_v38 = vmov 0 }
  0xef   :  { %v1827_v48 = vsel %vm13273_vm15, %v1795_v8, 0  ;;  %vm13274_vm0 = vmmov %vm13268_vm10  ;;  %vm13275_vm10 = vcmp.lt.s32.totalorder %v9572_v36, 15  ;;  %v8773_v8 = vunpack.i.h.bf16 %v10300_v9 }
  0xf0   :  { %v2063_v59 = vsel %vm13275_vm10, %v2041_v27, 0.0  ;;  %vm13276_vm8 = vmmov %vm13271_vm7  ;;  %vm13281_vm10 = vcmp.lt.s32.totalorder %v9578_v39, 15  ;;  %v8768_v27 = vunpack.i.h.bf16 %v10279_v57 }
  0xf1   :  { %7159 = vmatmul.mubr.msk.bf16.vlgmr.msra.gmra.mrb[0].mxu0 %vm13271_vm7, %v9111_v0  ;;  %vm13277_vm7 = vmmov %vm13272_vm13  ;;  %vm13278_vm13 = vcmp.lt.s32.totalorder %v9568_v34, 15  ;;  %v2071_v4 = vpack.c.bf16 %v2063_v59, %v2063_v59 }
  0xf2   :  { %1919 = vmatpush1.bf16.msra.mxu0 %v1821_v11  ;;  %1950 = vmatprep.mubr.bf16.mxu0 %v13166_v58  ;;  %v2044_v41 = vsel %vm13277_vm7, %v8763_v31, %v8757_v60  ;;  %v2066_v1 = vsel %vm13278_vm13, %v2038_v2, 0.0  ;;  %vm13279_vm11 = vmmov %vm13277_vm7  ;;  %v2309_v60 = vpop.permute.xlu0 %2308  ;;  %vm13283_vm13 = vcmp.lt.s32.totalorder %v9566_v33, 15  ;;  %v8772_v2 = vunpack.i.l.bf16 %v10300_v9 }
  0xf3   :  { %7169 = vmatprep.subr.msk.bf16.mxu0 %vm13274_vm0, %v2070_v17  ;;  %7161 = vmatmul.mubr.msk.bf16.vlgmr.msra.gmra.mrb[0].mxu1 %vm13276_vm8, %v9111_v0  ;;  %v2039_v13 = vsel %vm13279_vm11, %v10211_v28, %v2031_v44  ;;  %vm13280_vm15 = vmmov %vm13274_vm0  ;;  %v2068_v11 = vsel %vm13281_vm10, %v2044_v41, 0.0  ;;  %v2037_v28 = vsel %vm13277_vm7, %v8762_v40, %v8763_v31  ;;  %vm13284_vm11 = vcmask 31744  }
  0xf4   :  { %1962 = vmatpush1.bf16.msra.mxu1 %v1827_v48  ;;  %1993 = vmatprep.mubr.bf16.mxu1 %v13166_v58  ;;  %v2074_v48 = vpack.c.bf16 %v2066_v1, %v2066_v1  ;;  %vm13282_vm8 = vmmov %vm13274_vm0  ;;  %v2065_v44 = vsel %vm13283_vm13, %v2039_v13, 0.0  ;;  %vm13286_vm0 = vcmp.lt.s32.totalorder %v9564_v32, 15  ;;  %vm13290_vm10 = vcmp.lt.s32.totalorder %v9532_v16, 111 }
  0xf5   :  { %7171 = vmatprep.subr.msk.bf16.mxu1 %vm13280_vm15, %v2072_v53  ;;  %v2089_v17 = vsel %vm13282_vm8, %v2069_v18, 0  ;;  %vm13285_vm15 = vnez %v13106_v20  ;;  %v2322_v40 = vsel %vm13290_vm10, %v8773_v8, %v8767_v3  ;;  %v2095_v31 = vsel %vm13282_vm8, %v2071_v4, 0  ;;  %vm13291_vm7 = vmmov %vm13282_vm8 }
  0xf6   :  { %vm10331_vm3 = vmand %vm13286_vm0, %vm13285_vm15  ;;  %v2076_v53 = vpack.c.bf16 %v2068_v11, %v2068_v11  ;;  %v2073_v57 = vpack.c.bf16 %v2065_v44, %v2065_v44  ;;  %vm13292_vm13 = vcmp.lt.s32.totalorder %v9587_v43, 15  ;;  %vm13295_vm10 = vcmp.lt.s32.totalorder %v9570_v35, 15  ;;  %v8776_v1 = vpop.permute.xlu0 %8775 }
  0xf7   :  { %v13288_v38 = vsel %vm10331_vm3, 4294967295, %v13287_v38  ;;  %v2067_v59 = vsel %vm13292_vm13, %v2037_v28, 0.0  ;;  %vm13293_vm0 = vmmov %vm13284_vm11  ;;  %v2342_v9 = vsel %vm10331_vm3, %v2322_v40, 0.0  ;;  %v13296_v18 = vmov 0 }
  0xf8   :  { %13289 = vst [vmem:[#allocation36_spill] sm:$0xff] %v13288_v38  ;;  %v2320_v41 = vsel %vm13299_vm6, %v8768_v27, %v2309_v60  ;;  %v8777_v4 = vunpack.i.l.bf16 %v8776_v1  ;;  %vm13301_vm13 = vnez %v13130_v62  ;;  %v13303_v11 = vmov 0 }
  0xf9   :  { %7163 = vmatmul.mubr.msk.bf16.vlgmr.msra.gmra.mrb[4].mxu0 %vm13284_vm11, %v9111_v0  ;;  %vm13294_vm11 = vnez %v13100_v56  ;;  %v2350_v44 = vpack.c.bf16 %v2342_v9, %v2342_v9  ;;  %vm13308_vm3 = vcmp.lt.s32.totalorder %v9532_v16, 111 }
  0xfa   :  { %2113 = vmatpush1.bf16.msra.mxu0 %v2089_v17  ;;  %2144 = vmatprep.mubr.bf16.mxu0 %v13166_v58  ;;  %vm10350_vm8 = vmand %vm13295_vm10, %vm13294_vm11  ;;  %v2311_v17 = vpop.permute.xlu1 %2310  ;;  %v2321_v40 = vsel %vm13308_vm3, %v8767_v3, %v8768_v27  ;;  %v13316_v3 = vmov 0 }
  0xfb   :  { %7173 = vmatprep.subr.msk.bf16.mxu0 %vm13291_vm7, %v2074_v48  ;;  %7165 = vmatmul.mubr.msk.bf16.vlgmr.msra.gmra.mrb[4].mxu1 %vm13293_vm0, %v9111_v0  ;;  %v13297_v18 = vsel %vm10350_vm8, 4294967295, %v13296_v18  ;;  %vm13300_vm7 = vmmov %vm13299_vm6  ;;  %v9112_v0 = vld [vmem:[%s12837_s1 + $0x38] sm:$0xff]   ;;  %vm13302_vm0 = vcmp.lt.s32.totalorder %v9561_v30, 15  ;;  %vm13306_vm6 = vcmask 1041408   ;;  %v2075_v48 = vpack.c.bf16 %v2067_v59, %v2067_v59 }
  0xfc   :  { %13298 = vst [vmem:[#allocation37_spill] sm:$0xff] %v13297_v18  ;;  %2156 = vmatpush1.bf16.msra.mxu1 %v2095_v31  ;;  %v2323_v13 = vsel %vm13300_vm7, %v8772_v2, %v8773_v8  ;;  %2187 = vmatprep.mubr.bf16.mxu1 %v13166_v58  ;;  %vm10366_vm10 = vmand %vm13302_vm0, %vm13301_vm13  ;;  %v2344_v8 = vsel %vm10350_vm8, %v2320_v41, 0.0  ;;  %v8778_v31 = vunpack.i.h.bf16 %v8776_v1  ;;  %vm13309_vm0 = vcmp.lt.s32.totalorder %v9572_v36, 15 }
  0xfd   :  { %v13304_v11 = vsel %vm10366_vm10, 4294967295, %v13303_v11  ;;  %7175 = vmatprep.subr.msk.bf16.mxu1 %vm13306_vm6, %v2076_v53  ;;  %vm13307_vm7 = vmmov %vm13306_vm6  ;;  %v2341_v53 = vsel %vm10366_vm10, %v2323_v13, 0.0  ;;  %vm13313_vm6 = vcmask 31744   ;;  %vm13315_vm8 = vcmp.lt.s32.totalorder %v9568_v34, 15 }
  0xfe   :  { %13305 = vst [vmem:[#allocation38_spill] sm:$0xff] %v13304_v11  ;;  %v2101_v28 = vsel %vm13307_vm7, %v2073_v57, 0  ;;  %vm10380_vm5 = vmand %vm13309_vm0, %vm13210_vm9  ;;  %vm13314_vm7 = vnez %v13119_v25  ;;  %v2318_v27 = vsel %vm13308_vm3, %v2311_v17, %v8777_v4  ;;  %v2352_v57 = vpack.c.bf16 %v2344_v8, %v2344_v8 }
  0xff   :  { %v13311_v29 = vsel %vm10380_vm5, 4294967295, %v13310_v29  ;;  %vm10391_vm13 = vmand %vm13315_vm8, %vm13314_vm7  ;;  %vm13319_vm0 = vcmask 1041408   ;;  %v2343_v9 = vsel %vm10380_vm5, %v2321_v40, 0.0  ;;  %v2349_v41 = vpack.c.bf16 %v2341_v53, %v2341_v53 }
 0x100   :  { %13312 = vst [vmem:[#allocation39_spill] sm:$0xff] %v13311_v29  ;;  %v13317_v3 = vsel %vm10391_vm13, 4294967295, %v13316_v3  ;;  %v2107_v59 = vsel %vm13319_vm0, %v2075_v48, 0  ;;  %vm13320_vm10 = vmmov %vm13319_vm0  ;;  %vm13321_vm8 = vcmp.lt.s32.totalorder %v9578_v39, 15  ;;  %v13322_v1 = vmov 0 }
 0x101   :  { %7170 = vmatmul.mubr.msk.bf16.vlgmr.msra.gmra.mrb[0].mxu0 %vm13313_vm6, %v9112_v0  ;;  %13318 = vst [vmem:[#allocation40_spill] sm:$0xff] %v13317_v3  ;;  %vm10407_vm7 = vmand %vm13321_vm8, %vm9896_vm4  ;;  %v2324_v13 = vsel %vm13308_vm3, %v8778_v31, %v8772_v2  ;;  %v2346_v48 = vsel %vm10391_vm13, %v2318_v27, 0.0  ;;  %vm13326_vm0 = vcmp.lt.s32.totalorder %v9566_v33, 15  ;;  %v13327_v8 = vmov 0 }
 0x102   :  { %2199 = vmatpush1.bf16.msra.mxu0 %v2101_v28  ;;  %2230 = vmatprep.mubr.bf16.mxu0 %v13166_v58  ;;  %v13323_v1 = vsel %vm10407_vm7, 4294967295, %v13322_v1  ;;  %vm13330_vm8 = vmmov %vm13308_vm3  ;;  %vm13331_vm5 = vcmask 1041408   ;;  %v2351_v2 = vpack.c.bf16 %v2343_v9, %v2343_v9  ;;  %v2354_v40 = vpack.c.bf16 %v2346_v48, %v2346_v48  ;;  %v9113_v9 = vld [vmem:[%s12837_s1 + $0x40] sm:$0xff]  }
 0x103   :  { %7180 = vmatprep.subr.msk.bf16.mxu0 %vm13320_vm10, %v2350_v44  ;;  %7172 = vmatmul.mubr.msk.bf16.vlgmr.msra.gmra.mrb[0].mxu1 %vm13313_vm6, %v9112_v0  ;;  %13324 = vst [vmem:[#allocation41_spill] sm:$0xff] %v13323_v1  ;;  %vm13325_vm10 = vnez %v13151_v23  ;;  %v2319_v28 = vsel %vm13330_vm8, %v2309_v60, %v2311_v17  ;;  %v2348_v44 = vsel %vm10407_vm7, %v2324_v13, 0.0  ;;  %vm13332_vm3 = vmmov %vm13331_vm5  ;;  %v13335_v60 = vmov 0 }
 0x104   :  { %2242 = vmatpush1.bf16.msra.mxu1 %v2107_v59  ;;  %vm10419_vm6 = vmand %vm13326_vm0, %vm13325_vm10  ;;  %2273 = vmatprep.mubr.bf16.mxu1 %v13166_v58  ;;  %v2369_v53 = vsel %vm13332_vm3, %v2349_v41, 0  ;;  %vm13334_vm0 = vcmp.lt.s32.totalorder %v9587_v43, 15 }
 0x105   :  { %v13328_v8 = vsel %vm10419_vm6, 4294967295, %v13327_v8  ;;  %7182 = vmatprep.subr.msk.bf16.mxu1 %vm13331_vm5, %v2352_v57  ;;  %vm13333_vm13 = vmmov %vm13330_vm8  ;;  %v2345_v59 = vsel %vm10419_vm6, %v2319_v28, 0.0  ;;  %vm13338_vm5 = vcmask 31744   ;;  %v2356_v57 = vpack.c.bf16 %v2348_v44, %v2348_v44 }
 0x106   :  { %13329 = vst [vmem:[#allocation42_spill] sm:$0xff] %v13328_v8  ;;  %v2317_v27 = vsel %vm13333_vm13, %v8777_v4, %v8778_v31  ;;  %vm10438_vm8 = vmand %vm13334_vm0, %vm9952_vm1  ;;  %v2353_v4 = vpack.c.bf16 %v2345_v59, %v2345_v59 }
 0x107   :  { %v13336_v60 = vsel %vm10438_vm8, 4294967295, %v13335_v60  ;;  %vm13339_vm7 = vmmov %vm13332_vm3  ;;  %v2347_v31 = vsel %vm10438_vm8, %v2317_v27, 0.0 }
 0x108   :  { %13337 = vst [vmem:[#allocation43_spill] sm:$0xff] %v13336_v60  ;;  %v2375_v17 = vsel %vm13339_vm7, %v2351_v2, 0  ;;  %vm13340_vm13 = vmmov %vm13332_vm3  ;;  %v2355_v41 = vpack.c.bf16 %v2347_v31, %v2347_v31 }
 0x109   :  { %7174 = vmatmul.mubr.msk.bf16.vlgmr.msra.gmra.mrb[4].mxu0 %vm13338_vm5, %v9112_v0  ;;  %vm13341_vm3 = vmmov %vm13338_vm5 }
 0x10a   :  { %2393 = vmatpush1.bf16.msra.mxu0 %v2369_v53  ;;  %2424 = vmatprep.mubr.bf16.mxu0 %v13166_v58  ;;  %vm13342_vm0 = vmmov %vm13339_vm7 }
 0x10b   :  { %7184 = vmatprep.subr.msk.bf16.mxu0 %vm13340_vm13, %v2354_v40  ;;  %7176 = vmatmul.mubr.msk.bf16.vlgmr.msra.gmra.mrb[4].mxu1 %vm13341_vm3, %v9112_v0  ;;  %v2381_v13 = vsel %vm13342_vm0, %v2353_v4, 0  ;;  %vm13343_vm5 = vmmov %vm13341_vm3 }
 0x10c   :  { %2436 = vmatpush1.bf16.msra.mxu1 %v2375_v17  ;;  %2467 = vmatprep.mubr.bf16.mxu1 %v13166_v58  ;;  %vm13344_vm13 = vmmov %vm13342_vm0 }
 0x10d   :  { %7186 = vmatprep.subr.msk.bf16.mxu1 %vm13339_vm7, %v2356_v57  ;;  %v2387_v48 = vsel %vm13344_vm13, %v2355_v41, 0  ;;  %vm13345_vm8 = vmmov %vm13341_vm3 }
 0x10e   :  { %vm13346_vm7 = vmmov %vm13341_vm3 }
 0x111   :  { %7181 = vmatmul.mubr.msk.bf16.vlgmr.msra.gmra.mrb[0].mxu0 %vm13343_vm5, %v9113_v9  ;;  %vm13349_vm5 = vnez %v13058_v50 }
 0x112   :  { %2479 = vmatpush1.bf16.msra.mxu0 %v2381_v13  ;;  %2510 = vmatprep.mubr.bf16.mxu0 %v13166_v58  ;;  %v2590_v2 = vpop.permute.xlu1 %2589  ;;  %vm7191_vm13 = vmpackc.low %vm13349_vm5, %vm13349_vm5 }
 0x113   :  { %7183 = vmatmul.mubr.msk.bf16.vlgmr.msra.gmra.mrb[0].mxu1 %vm13341_vm3, %v9113_v9  ;;  %vm7204_vm5 = vmpackc.low %vm9600_vm12, %vm9600_vm12  ;;  %vm13353_vm12 = vcmp.lt.s32.totalorder %v9532_v16, 127 }
 0x114   :  { %2522 = vmatpush1.bf16.msra.mxu1 %v2387_v48  ;;  %2553 = vmatprep.mubr.bf16.mxu1 %v13166_v58 }
 0x116   :  { %v2585_v0 = vpop.permute.xlu0 %2584 }
 0x119   :  { %7185 = vmatmul.mubr.msk.bf16.vlgmr.msra.gmra.mrb[4].mxu0 %vm13345_vm8, %v9113_v9  ;;  %vm13347_vm8 = vcmp.lt.s32.totalorder %v9532_v16, 1 }
 0x11a   :  { %3070 = vmatprep.mubr.bf16.mxu0 %v13166_v58  ;;  %vm13348_vm0 = vmmov %vm13347_vm8 }
 0x11b   :  { %7187 = vmatmul.mubr.msk.bf16.vlgmr.msra.gmra.mrb[4].mxu1 %vm13346_vm7, %v9113_v9  ;;  %vm13350_vm3 = vmmov %vm13348_vm0 }
 0x11c   :  { %3113 = vmatprep.mubr.bf16.mxu1 %v13166_v58  ;;  %vm13351_vm7 = vmmov %vm13348_vm0 }
 0x1e4   :  { %v2426_v28 = vpop.f32.mrb[0].mxu0 }
 0x1e5   :  { %v10464_v44 = vadd.f32 %v2585_v0, %v2426_v28  ;;  %v2428_v40 = vpop.f32.mrb[1].mxu0 }
 0x1e6   :  { %v10466_v53 = vadd.f32 %v2585_v0, %v2428_v40  ;;  %v2430_v27 = vpop.f32.mrb[2].mxu0  ;;  %v2469_v17 = vpop.f32.mrb[0].mxu1 }
 0x1e7   :  { %v10468_v59 = vadd.f32 %v2590_v2, %v2430_v27  ;;  %v2432_v57 = vpop.f32.mrb[3].mxu0  ;;  %v2594_v4 = vadd.f32 %v2585_v0, %v2469_v17  ;;  %v2471_v41 = vpop.f32.mrb[1].mxu1  ;;  %v2608_v9 = vmax.f32 %v10464_v44, 0.0 }
 0x1e8   :  { %v2601_v31 = vadd.f32 %v2590_v2, %v2432_v57  ;;  %v2595_v48 = vadd.f32 %v2585_v0, %v2471_v41  ;;  %v2473_v60 = vpop.f32.mrb[2].mxu1  ;;  %v2609_v28 = vmax.f32 %v10466_v53, 0.0 }
 0x1e9   :  { %v2616_v13 = vmax.f32 %v10468_v59, 0.0  ;;  %v2610_v8 = vmax.f32 %v2594_v4, 0.0  ;;  %v2602_v40 = vadd.f32 %v2590_v2, %v2473_v60  ;;  %v2475_v3 = vpop.f32.mrb[3].mxu1 }
 0x1ea   :  { %v2617_v1 = vmax.f32 %v2601_v31, 0.0  ;;  %v2611_v61 = vmax.f32 %v2595_v48, 0.0  ;;  %v2603_v27 = vadd.f32 %v2590_v2, %v2475_v3 }
 0x1eb   :  { %v10473_v46 = vpack.i.bf16 %v2616_v13, %v2608_v9  ;;  %v2618_v29 = vmax.f32 %v2602_v40, 0.0 }
 0x1ec   :  { %v2512_v17 = vpop.f32.mrb[4].mxu0  ;;  %v10475_v57 = vpack.i.bf16 %v2617_v1, %v2609_v28  ;;  %v2619_v11 = vmax.f32 %v2603_v27, 0.0 }
 0x1ed   :  { %v2596_v44 = vadd.f32 %v2585_v0, %v2512_v17  ;;  %8797 = vrot.lane.b32.xlu0 %v10473_v46, %s9380_s12  ;;  %8782 = vrot.lane.b32.xlu1 %v10473_v46, %s9379_s11  ;;  %v2514_v53 = vpop.f32.mrb[5].mxu0  ;;  %v10481_v4 = vpack.i.bf16 %v2618_v29, %v2610_v8 }
 0x1ee   :  { %v2597_v59 = vadd.f32 %v2585_v0, %v2514_v53  ;;  %v2516_v60 = vpop.f32.mrb[6].mxu0  ;;  %v2555_v41 = vpop.f32.mrb[4].mxu1  ;;  %v10483_v40 = vpack.i.bf16 %v2619_v11, %v2611_v61 }
 0x1ef   :  { %v2612_v3 = vmax.f32 %v2596_v44, 0.0  ;;  %v2604_v31 = vadd.f32 %v2590_v2, %v2516_v60  ;;  %v2518_v48 = vpop.f32.mrb[7].mxu0  ;;  %v2598_v27 = vadd.f32 %v2585_v0, %v2555_v41  ;;  %v2557_v38 = vpop.f32.mrb[5].mxu1 }
 0x1f0   :  { %v2613_v18 = vmax.f32 %v2597_v59, 0.0  ;;  %v2605_v17 = vadd.f32 %v2590_v2, %v2518_v48  ;;  %v2599_v5 = vadd.f32 %v2585_v0, %v2557_v38  ;;  %v2559_v47 = vpop.f32.mrb[6].mxu1 }
 0x1f1   :  { %v2620_v6 = vmax.f32 %v2604_v31, 0.0  ;;  %8812 = vrot.lane.b32.xlu0 %v10473_v46, %s9376_s0  ;;  %8787 = vrot.lane.b32.xlu1 %v10481_v4, %s9379_s11  ;;  %v2614_v53 = vmax.f32 %v2598_v27, 0.0  ;;  %v2606_v60 = vadd.f32 %v2590_v2, %v2559_v47  ;;  %v2561_v52 = vpop.f32.mrb[7].mxu1  ;;  %v10517_v47 = vpack.c.bf16 %v2617_v1, %v2609_v28  ;;  %v3806_v1 = vld [vmem:[%s12840_s4 + $0x8] sm:$0xff] }
 0x1f2   :  { %v2621_v44 = vmax.f32 %v2605_v17, 0.0  ;;  %v2615_v43 = vmax.f32 %v2599_v5, 0.0  ;;  %v2607_v33 = vadd.f32 %v2590_v2, %v2561_v52  ;;  %v10511_v52 = vpack.c.bf16 %v2618_v29, %v2610_v8 }
 0x1f3   :  { %v2622_v39 = vmax.f32 %v2606_v60, 0.0  ;;  %v10489_v59 = vpack.i.bf16 %v2620_v6, %v2612_v3  ;;  %v10519_v5 = vpack.c.bf16 %v2616_v13, %v2608_v9 }
 0x1f4   :  { %v2623_v41 = vmax.f32 %v2607_v33, 0.0  ;;  %v10499_v31 = vpack.i.bf16 %v2621_v44, %v2613_v18  ;;  %v10509_v33 = vpack.c.bf16 %v2619_v11, %v2611_v61  ;;  %v10525_v27 = vpack.c.bf16 %v2621_v44, %v2613_v18  ;;  %v3805_v11 = vld [vmem:[%s12840_s4] sm:$0xff] }
 0x1f5   :  { %8817 = vrot.lane.b32.xlu0 %v10481_v4, %s9376_s0  ;;  %8792 = vrot.lane.b32.xlu1 %v10481_v4, %s9380_s12  ;;  %v10495_v38 = vpack.i.bf16 %v2622_v39, %v2614_v53  ;;  %v10523_v48 = vpack.c.bf16 %v2622_v39, %v2614_v53  ;;  %v10527_v61 = vpack.c.bf16 %v2620_v6, %v2612_v3 }
 0x1f6   :  { %v10497_v0 = vpack.i.bf16 %v2623_v41, %v2615_v43  ;;  %v10521_v2 = vpack.c.bf16 %v2623_v41, %v2615_v43 }
 0x1f9   :  { %8802 = vrot.lane.b32.xlu1 %v10473_v46, %s9377_s9  ;;  %8832 = vrot.lane.b32.xlu0 %v10475_v57, %s9379_s11 }
 0x1fd   :  { %8807 = vrot.lane.b32.xlu1 %v10481_v4, %s9377_s9  ;;  %8837 = vrot.lane.b32.xlu0 %v10483_v40, %s9379_s11 }
 0x201   :  { %8822 = vrot.lane.b32.xlu1 %v10473_v46, %s9378_s10  ;;  %8842 = vrot.lane.b32.xlu0 %v10475_v57, %s9380_s12 }
 0x205   :  { %8827 = vrot.lane.b32.xlu1 %v10481_v4, %s9378_s10  ;;  %8852 = vrot.lane.b32.xlu0 %v10475_v57, %s9377_s9 }
 0x209   :  { %8847 = vrot.lane.b32.xlu1 %v10483_v40, %s9380_s12  ;;  %8857 = vrot.lane.b32.xlu0 %v10483_v40, %s9377_s9 }
 0x20d   :  { %8862 = vrot.lane.b32.xlu1 %v10475_v57, %s9376_s0  ;;  %8872 = vrot.lane.b32.xlu0 %v10475_v57, %s9378_s10 }
 0x211   :  { %8867 = vrot.lane.b32.xlu1 %v10483_v40, %s9376_s0  ;;  %8877 = vrot.lane.b32.xlu0 %v10483_v40, %s9378_s10 }
 0x215   :  { %8887 = vrot.lane.b32.xlu1 %v10489_v59, %s9379_s11  ;;  %8882 = vrot.lane.b32.xlu0 %v10489_v59, %s9380_s12 }
 0x219   :  { %8892 = vrot.lane.b32.xlu1 %v10495_v38, %s9379_s11  ;;  %8902 = vrot.lane.b32.xlu0 %v10489_v59, %s9377_s9 }
 0x21d   :  { %8897 = vrot.lane.b32.xlu1 %v10495_v38, %s9380_s12  ;;  %8907 = vrot.lane.b32.xlu0 %v10495_v38, %s9377_s9 }
 0x221   :  { %8912 = vrot.lane.b32.xlu1 %v10489_v59, %s9376_s0  ;;  %8927 = vrot.lane.b32.xlu0 %v10489_v59, %s9378_s10 }
 0x225   :  { %8917 = vrot.lane.b32.xlu1 %v10497_v0, %s9379_s11  ;;  %8932 = vrot.lane.b32.xlu0 %v10495_v38, %s9378_s10 }
 0x229   :  { %8922 = vrot.lane.b32.xlu1 %v10495_v38, %s9376_s0  ;;  %8942 = vrot.lane.b32.xlu0 %v10481_v4, %s9381_s13 }
 0x22d   :  { %8937 = vrot.lane.b32.xlu1 %v10475_v57, %s9381_s13  ;;  %8952 = vrot.lane.b32.xlu0 %v10499_v31, %s9379_s11 }
 0x231   :  { %8947 = vrot.lane.b32.xlu1 %v10473_v46, %s9381_s13  ;;  %8957 = vrot.lane.b32.xlu0 %v10483_v40, %s9381_s13 }
 0x235   :  { %8962 = vrot.lane.b32.xlu1 %v10489_v59, %s9381_s13  ;;  %8967 = vrot.lane.b32.xlu0 %v10499_v31, %s9380_s12 }
 0x239   :  { %8982 = vrot.lane.b32.xlu1 %v10481_v4, %s9382_s14  ;;  %8972 = vrot.lane.b32.xlu0 %v10497_v0, %s9380_s12 }
 0x23d   :  { %8987 = vrot.lane.b32.xlu1 %v10497_v0, %s9377_s9  ;;  %8977 = vrot.lane.b32.xlu0 %v10475_v57, %s9382_s14 }
 0x241   :  { %9002 = vrot.lane.b32.xlu1 %v10483_v40, %s9382_s14  ;;  %8992 = vrot.lane.b32.xlu0 %v10497_v0, %s9376_s0 }
 0x245   :  { %9007 = vrot.lane.b32.xlu1 %v10497_v0, %s9378_s10  ;;  %8997 = vrot.lane.b32.xlu0 %v10473_v46, %s9382_s14 }
 0x249   :  { %9012 = vrot.lane.b32.xlu1 %v10499_v31, %s9377_s9  ;;  %9017 = vrot.lane.b32.xlu0 %v10499_v31, %s9376_s0 }
 0x24d   :  { %9027 = vrot.lane.b32.xlu1 %v10475_v57, %s9383_s15  ;;  %9022 = vrot.lane.b32.xlu0 %v10489_v59, %s9382_s14 }
 0x251   :  { %9037 = vrot.lane.b32.xlu1 %v10499_v31, %s9378_s10  ;;  %9032 = vrot.lane.b32.xlu0 %v10481_v4, %s9383_s15 }
 0x255   :  { %9042 = vrot.lane.b32.xlu1 %v10473_v46, %s9383_s15  ;;  %9047 = vrot.lane.b32.xlu0 %v10483_v40, %s9383_s15 }
 0x259   :  { %9052 = vrot.lane.b32.xlu1 %v10489_v59, %s9383_s15  ;;  %9062 = vrot.lane.b32.xlu0 %v10495_v38, %s9382_s14 }
 0x25d   :  { %9057 = vrot.lane.b32.xlu1 %v10495_v38, %s9381_s13  ;;  %9067 = vrot.lane.b32.xlu0 %v10499_v31, %s9381_s13 }
 0x25f   :  { %v10621_v39 = vpop.permute.xlu0 %8797  ;;  %v10623_v43 = vpop.permute.xlu1 %8782 }
 0x260   :  { %v13001_v13 = vunpack.i.h.bf16 %v10623_v43  ;;  %v13000_v28 = vunpack.i.l.bf16 %v10623_v43  ;;  %v13362_v37 = vunpack.i.h.bf16 %v10623_v43 }
 0x261   :  { %9077 = vrot.lane.b32.xlu1 %v10499_v31, %s9382_s14  ;;  %9072 = vrot.lane.b32.xlu0 %v10497_v0, %s9381_s13 }
 0x263   :  { %v10629_v6 = vpop.permute.xlu0 %8812  ;;  %v8788_v46 = vpop.permute.xlu1 %8787 }
 0x264   :  { %v8790_v17 = vunpack.i.h.bf16 %v8788_v46  ;;  %v8789_v53 = vunpack.i.l.bf16 %v8788_v46 }
 0x265   :  { %9082 = vrot.lane.b32.xlu1 %v10497_v0, %s9382_s14  ;;  %9092 = vrot.lane.b32.xlu0 %v10499_v31, %s9383_s15 }
 0x267   :  { %v10635_v29 = vpop.permute.xlu0 %8817  ;;  %v10637_v18 = vpop.permute.xlu1 %8792 }
 0x269   :  { %9087 = vrot.lane.b32.xlu1 %v10495_v38, %s9383_s15  ;;  %9097 = vrot.lane.b32.xlu0 %v10497_v0, %s9383_s15 }
 0x26b   :  { %v10649_v8 = vpop.permute.xlu1 %8802  ;;  %v8833_v9 = vpop.permute.xlu0 %8832 }
 0x26c   :  { %v8835_v57 = vunpack.i.h.bf16 %v8833_v9  ;;  %v8834_v4 = vunpack.i.l.bf16 %v8833_v9 }
 0x26d   :  { %3809 = vperm.xlu1 %8780, %v3805_v11   ;;  %3814 = vperm.xlu0 %8779, %v3806_v1  }
 0x26e   :  { %v2919_v3 = vsel %vm13347_vm8, %v13001_v13, %v8835_v57  ;;  %v2918_v40 = vsel %vm13348_vm0, %v13000_v28, %v8834_v4  ;;  %v2917_v0 = vsel %vm13350_vm3, %v8835_v57, %v8790_v17  ;;  %v2916_v31 = vsel %vm13351_vm7, %v8834_v4, %v8789_v53  ;;  %vm13352_vm8 = vmmov %vm13348_vm0 }
 0x26f   :  { %v7192_v44 = vpack.c.bf16 %v2919_v3, %v2918_v40  ;;  %v10664_v60 = vpop.permute.xlu1 %8807  ;;  %v10666_v59 = vpop.permute.xlu0 %8837  ;;  %v7208_v57 = vpack.c.bf16 %v2917_v0, %v2916_v31  ;;  %vm13355_vm3 = vmmov %vm13353_vm12 }
 0x270   :  { %v12999_v41 = vunpack.i.h.bf16 %v10666_v59  ;;  %v12998_v38 = vunpack.i.l.bf16 %v10666_v59  ;;  %vm13356_vm7 = vmmov %vm13355_vm3  ;;  %v8810_v42 = vunpack.i.h.bf16 %v10664_v60  ;;  %v8809_v63 = vunpack.i.l.bf16 %v10664_v60 }
 0x271   :  { %7193 = vmatprep.subr.msk.bf16.mxu0 %vm7191_vm13, %v7192_v44  ;;  %vm7207_vm13 = vmpackc.low %vm9624_vm14, %vm9624_vm14 }
 0x272   :  { %v2915_v50 = vsel %vm13352_vm8, %v8790_v17, %v12999_v41  ;;  %v2914_v46 = vsel %vm13348_vm0, %v8789_v53, %v12998_v38  ;;  %vm13354_vm14 = vmmov %vm13353_vm12 }
 0x273   :  { %v7205_v11 = vpack.c.bf16 %v2915_v50, %v2914_v46  ;;  %v10685_v1 = vpop.permute.xlu1 %8822  ;;  %v10687_v9 = vpop.permute.xlu0 %8842  ;;  %vm7210_vm8 = vmpackc.low %vm13294_vm11, %vm13294_vm11 }
 0x274   :  { %vm7213_vm0 = vmpackc.low %vm13210_vm9, %vm13210_vm9 }
 0x275   :  { %7206 = vmatprep.subr.msk.bf16.mxu1 %vm7204_vm5, %v7205_v11  ;;  %vm3034_vm5 = vcmask 392192   ;;  %vm13359_vm9 = vmmov %vm13355_vm3 }
 0x276   :  { %7209 = vmatpush1.bf16.msk.msra.mxu1 %vm7207_vm13, %v7208_v57  ;;  %vm13360_vm11 = vmmov %vm13355_vm3  ;;  %vm13361_vm13 = vnez %v13064_v15 }
 0x277   :  { %v10692_v4 = vpop.permute.xlu1 %8827  ;;  %v10694_v3 = vpop.permute.xlu0 %8852  ;;  %3083 = vmatprep.subr.bf16.mxu1 %v10509_v33  ;;  %v8795_v33 = vunpack.i.h.bf16 %v10637_v18 }
 0x278   :  { %v8830_v49 = vunpack.i.h.bf16 %v10692_v4 }
 0x27a   :  { %3084 = vmatpush1.bf16.msra.mxu1 %v10511_v52  ;;  %v8794_v52 = vunpack.i.l.bf16 %v10637_v18 }
 0x27b   :  { %v8848_v51 = vpop.permute.xlu1 %8847  ;;  %v10698_v40 = vpop.permute.xlu0 %8857 }
 0x27c   :  { %v8850_v0 = vunpack.i.h.bf16 %v8848_v51  ;;  %v8849_v31 = vunpack.i.l.bf16 %v8848_v51 }
 0x27e   :  { %v2994_v38 = vsel %vm13353_vm12, %v8794_v52, %v8849_v31  ;;  %v2995_v41 = vsel %vm13354_vm14, %v8795_v33, %v8850_v0  ;;  %vm7194_vm12 = vmpackc.low %vm13361_vm13, %vm13361_vm13  ;;  %vm13363_vm14 = vcmp.lt.s32.totalorder %v9532_v16, 1 }
 0x27f   :  { %v10700_v17 = vpop.permute.xlu1 %8862  ;;  %v10702_v53 = vpop.permute.xlu0 %8872  ;;  %v7214_v26 = vpack.c.bf16 %v2995_v41, %v2994_v38  ;;  %v8844_v41 = vunpack.i.l.bf16 %v10687_v9 }
 0x280   :  { %v8864_v20 = vunpack.i.l.bf16 %v10700_v17 }
 0x283   :  { %v10704_v14 = vpop.permute.xlu1 %8867  ;;  %v10706_v44 = vpop.permute.xlu0 %8877 }
 0x284   :  { %v13437_v45 = vunpack.i.l.bf16 %v10706_v44 }
 0x287   :  { %v10708_v50 = vpop.permute.xlu1 %8887  ;;  %v10710_v46 = vpop.permute.xlu0 %8882 }
 0x288   :  { %v13007_v11 = vunpack.i.h.bf16 %v10710_v46  ;;  %v13006_v57 = vunpack.i.l.bf16 %v10710_v46 }
 0x28a   :  { %v2993_v51 = vsel %vm13355_vm3, %v8850_v0, %v13007_v11  ;;  %v2992_v18 = vsel %vm13356_vm7, %v8849_v31, %v13006_v57  ;;  %v10741_v0 = vld [vmem:[%s12839_s2 + $0x8] sm:$0xff]   ;;  %v8854_v11 = vunpack.i.l.bf16 %v10694_v3  ;;  %vm13364_vm3 = vmmov %vm13363_vm14 }
 0x28b   :  { %v10728_v28 = vpop.permute.xlu1 %8892  ;;  %v10730_v13 = vpop.permute.xlu0 %8902  ;;  %v7211_v34 = vpack.c.bf16 %v2993_v51, %v2992_v18  ;;  %v2996_v51 = vsel %vm13360_vm11, %v8844_v41, %v8794_v52  ;;  %v8855_v18 = vunpack.i.h.bf16 %v10694_v3  ;;  %vm13365_vm7 = vmmov %vm13364_vm3  ;;  %v13366_v52 = vunpack.i.l.bf16 %v10623_v43 }
 0x28c   :  { %v8895_v21 = vunpack.i.h.bf16 %v10728_v28  ;;  %v8894_v30 = vunpack.i.l.bf16 %v10728_v28  ;;  %vm13369_vm11 = vmmov %vm13359_vm9 }
 0x28d   :  { %7212 = vmatprep.subr.msk.bf16.mxu1 %vm7210_vm8, %v7211_v34  ;;  %v8845_v34 = vunpack.i.h.bf16 %v10687_v9  ;;  %vm13367_vm8 = vmmov %vm13364_vm3 }
 0x28e   :  { %7215 = vmatpush1.bf16.msk.msra.mxu1 %vm7213_vm0, %v7214_v26  ;;  %v13030_v26 = vunpack.i.h.bf16 %v10621_v39  ;;  %vm7230_vm0 = vmpackc.low %vm13244_vm2, %vm13244_vm2 }
 0x28f   :  { %v10743_v31 = vpop.permute.xlu1 %8897  ;;  %v10745_v57 = vpop.permute.xlu0 %8907  ;;  %v2997_v38 = vsel %vm13359_vm9, %v8845_v34, %v8795_v33 }
 0x290   :  { %13357 = vst [vmem:[#allocation44_spill] sm:$0xff] %v10745_v57  ;;  %v7198_v24 = vpack.c.bf16 %v2997_v38, %v2996_v51  ;;  %v13035_v38 = vunpack.i.l.bf16 %v10698_v40 }
 0x291   :  { %7216 = vmatmul.mubr.msk.bf16.vlgmr.msra.gmra.mrb[8].mxu1 %vm3034_vm5, %v10741_v0 }
 0x292   :  { %3199 = vmatprep.mubr.bf16.mxu1 %v13166_v58 }
 0x293   :  { %v10749_v56 = vpop.permute.xlu1 %8912  ;;  %v10751_v19 = vpop.permute.xlu0 %8927 }
 0x297   :  { %v8918_v54 = vpop.permute.xlu1 %8917  ;;  %v10762_v36 = vpop.permute.xlu0 %8932 }
 0x298   :  { %13358 = vst [vmem:[#allocation45_spill] sm:$0xff] %v10762_v36  ;;  %v8920_v9 = vunpack.i.h.bf16 %v8918_v54  ;;  %v8919_v35 = vunpack.i.l.bf16 %v8918_v54  ;;  %v13368_v36 = vunpack.i.l.bf16 %v10621_v39 }
 0x29a   :  { %v2921_v28 = vsel %vm13363_vm14, %v8920_v9, %v13362_v37  ;;  %v2906_v54 = vsel %vm13364_vm3, %v8894_v30, %v8919_v35  ;;  %v2907_v33 = vsel %vm13365_vm7, %v8895_v21, %v8920_v9  ;;  %v2920_v3 = vsel %vm13367_vm8, %v8919_v35, %v13366_v52 }
 0x29b   :  { %v2999_v37 = vsel %vm13359_vm9, %v13030_v26, %v8845_v34  ;;  %v2998_v55 = vsel %vm13369_vm11, %v13368_v36, %v8844_v41  ;;  %v7195_v9 = vpack.c.bf16 %v2921_v28, %v2920_v3  ;;  %v7231_v57 = vpack.c.bf16 %v2907_v33, %v2906_v54  ;;  %v10798_v43 = vpop.permute.xlu1 %8922  ;;  %v10800_v32 = vpop.permute.xlu0 %8942 }
 0x29c   :  { %v13034_v35 = vunpack.i.h.bf16 %v10649_v8  ;;  %v13033_v52 = vunpack.i.l.bf16 %v10649_v8  ;;  %v13037_v34 = vunpack.i.h.bf16 %v10685_v1  ;;  %v13036_v36 = vunpack.i.h.bf16 %v10698_v40 }
 0x29d   :  { %7196 = vmatpush1.bf16.msk.msra.mxu0 %vm7194_vm12, %v7195_v9  ;;  %7232 = vmatprep.subr.msk.bf16.mxu1 %vm7230_vm0, %v7231_v57  ;;  %v7201_v60 = vpack.c.bf16 %v2999_v37, %v2998_v55  ;;  %vm13370_vm14 = vcmp.lt.s32.totalorder %v9532_v16, 17  ;;  %v8829_v55 = vunpack.i.l.bf16 %v10692_v4  ;;  %vm7197_vm12 = vmpackc.low %vm13285_vm15, %vm13285_vm15  ;;  %v8889_v33 = vunpack.i.l.bf16 %v10708_v50 }
 0x29e   :  { %v10823_v41 = vsel %vm13370_vm14, %v13034_v35, %v8855_v18  ;;  %vm13371_vm3 = vmmov %vm13370_vm14  ;;  %3040 = vmatprep.subr.bf16.mxu0 %v10517_v47  ;;  %v8890_v47 = vunpack.i.h.bf16 %v10708_v50  ;;  %v8865_v9 = vunpack.i.h.bf16 %v10700_v17  ;;  %vm13375_vm15 = vnez %v13130_v62 }
 0x29f   :  { %v10829_v15 = vsel %vm13371_vm3, %v13033_v52, %v8854_v11  ;;  %vm13372_vm2 = vmmov %vm13371_vm3  ;;  %v10843_v28 = vpop.permute.xlu1 %8937  ;;  %v8953_v54 = vpop.permute.xlu0 %8952  ;;  %vm13377_vm9 = vcmp.lt.s32.totalorder %v9532_v16, 1  ;;  %vm13379_vm14 = vnez %v13092_v10  ;;  %v13389_v26 = vunpack.i.h.bf16 %v10629_v6 }
 0x2a0   :  { %v10837_v57 = vsel %vm13372_vm2, %v8855_v18, %v8810_v42  ;;  %vm13373_vm13 = vmmov %vm13372_vm2  ;;  %v8955_v3 = vunpack.i.h.bf16 %v8953_v54  ;;  %v8954_v37 = vunpack.i.l.bf16 %v8953_v54  ;;  %v8875_v54 = vunpack.i.h.bf16 %v10702_v53 }
 0x2a1   :  { %v10841_v51 = vsel %vm13373_vm13, %v8854_v11, %v8809_v63  ;;  %vm13374_vm7 = vmmov %vm13372_vm2  ;;  %3041 = vmatpush1.bf16.msra.mxu0 %v10519_v5  ;;  %v8874_v18 = vunpack.i.l.bf16 %v10702_v53  ;;  %v13385_v53 = vunpack.i.l.bf16 %v10666_v59  ;;  %v8870_v62 = vunpack.i.h.bf16 %v10704_v14 }
 0x2a2   :  { %v10856_v11 = vsel %vm13374_vm7, %v8810_v42, %v13036_v36  ;;  %vm7200_vm8 = vmpackc.low %vm13375_vm15, %vm13375_vm15  ;;  %v2909_v42 = vsel %vm13377_vm9, %v8955_v3, %v8895_v21  ;;  %7199 = vmatprep.subr.msk.bf16.mxu0 %vm7197_vm12, %v7198_v24  ;;  %vm13382_vm12 = vnez %v13074_v22  ;;  %v13383_v24 = vunpack.i.h.bf16 %v10666_v59 }
 0x2a3   :  { %vm13376_vm0 = vmmov %vm13372_vm2  ;;  %v10885_v21 = vpop.permute.xlu1 %8947  ;;  %v10887_v35 = vpop.permute.xlu0 %8957  ;;  %v13387_v36 = vunpack.i.h.bf16 %v10635_v29  ;;  %v13391_v59 = vunpack.i.l.bf16 %v10635_v29  ;;  %vm13397_vm15 = vnez %v13072_v7  ;;  %v8869_v10 = vunpack.i.l.bf16 %v10704_v14 }
 0x2a4   :  { %v10868_v50 = vsel %vm13376_vm0, %v8809_v63, %v13035_v38  ;;  %vm13378_vm11 = vmmov %vm13377_vm9  ;;  %v13042_v4 = vunpack.i.l.bf16 %v10749_v56  ;;  %v13418_v38 = vunpack.i.l.bf16 %v10621_v39  ;;  %v13041_v12 = vunpack.i.l.bf16 %v10800_v32 }
 0x2a5   :  { %v2911_v17 = vsel %vm13378_vm11, %v8890_v47, %v8955_v3  ;;  %vm7233_vm3 = vmpackc.low %vm13379_vm14, %vm13379_vm14  ;;  %vm13388_vm11 = vcmp.lt.s32.totalorder %v9532_v16, 16  ;;  %7202 = vmatpush1.bf16.msk.msra.mxu0 %vm7200_vm8, %v7201_v60 }
 0x2a6   :  { %vm13380_vm2 = vmmov %vm13377_vm9  ;;  %v10906_v22 = vsel %vm13388_vm11, %v8865_v9, %v13387_v36  ;;  %v13393_v36 = vunpack.i.l.bf16 %v10629_v6 }
 0x2a7   :  { %v2908_v63 = vsel %vm13380_vm2, %v8954_v37, %v8894_v30  ;;  %vm13381_vm13 = vmmov %vm13380_vm2 }
 0x2a8   :  { %v2910_v52 = vsel %vm13381_vm13, %v8889_v33, %v8954_v37  ;;  %vm7217_vm7 = vmpackc.low %vm13382_vm12, %vm13382_vm12  ;;  %v7234_v37 = vpack.c.bf16 %v2909_v42, %v2908_v63  ;;  %v8880_v63 = vunpack.i.h.bf16 %v10706_v44  ;;  %7203 = vmatmul.mubr.msk.bf16.vlgmr.msra.gmra.mrb[8].mxu0 %vm3034_vm5, %v10741_v0 }
 0x2a9   :  { %vm13384_vm0 = vmmov %vm13380_vm2  ;;  %v7218_v5 = vpack.c.bf16 %v2911_v17, %v2910_v52  ;;  %v10966_v17 = vpop.permute.xlu1 %8962  ;;  %3156 = vmatprep.mubr.bf16.mxu0 %v13166_v58 }
 0x2aa   :  { %v2913_v3 = vsel %vm13384_vm0, %v13383_v24, %v8890_v47  ;;  %vm13386_vm9 = vmmov %vm13384_vm0  ;;  %vm13395_vm0 = vcmp.lt.s32.totalorder %v9532_v16, 15  ;;  %7235 = vmatpush1.bf16.msk.msra.mxu1 %vm7233_vm3, %v7234_v37  ;;  %v13038_v24 = vunpack.i.l.bf16 %v10706_v44  ;;  %vm13403_vm3 = vcmp.lt.s32.totalorder %v9532_v16, 127 }
 0x2ab   :  { %v2912_v30 = vsel %vm13386_vm9, %v13385_v53, %v8889_v33  ;;  %vm13390_vm2 = vmmov %vm13388_vm11  ;;  %7219 = vmatprep.subr.msk.bf16.mxu0 %vm7217_vm7, %v7218_v5  ;;  %3169 = vmatprep.subr.bf16.mxu1 %v10521_v2  ;;  %v8968_v5 = vpop.permute.xlu0 %8967  ;;  %v8900_v53 = vunpack.i.h.bf16 %v10743_v31  ;;  %v8899_v2 = vunpack.i.l.bf16 %v10743_v31  ;;  %v13440_v44 = vpack.c.bf16 %v10856_v11, %v10868_v50 }
 0x2ac   :  { %v10912_v47 = vsel %vm13390_vm2, %v13389_v26, %v8865_v9  ;;  %vm13392_vm13 = vmmov %vm13390_vm2  ;;  %v10935_v26 = vsel %vm13395_vm0, %v8875_v54, %v8830_v49  ;;  %v7221_v42 = vpack.c.bf16 %v2913_v3, %v2912_v30  ;;  %v8970_v37 = vunpack.i.h.bf16 %v8968_v5 }
 0x2ad   :  { %v10918_v52 = vsel %vm13392_vm13, %v8864_v20, %v13391_v59  ;;  %vm13394_vm12 = vmmov %vm13390_vm2  ;;  %v8969_v30 = vunpack.i.l.bf16 %v8968_v5 }
 0x2ae   :  { %v10929_v33 = vsel %vm13394_vm12, %v13393_v36, %v8864_v20  ;;  %vm13396_vm9 = vmmov %vm13395_vm0  ;;  %v13399_v20 = vunpack.i.l.bf16 %v10685_v1  ;;  %v2989_v7 = vsel %vm13403_vm3, %v8970_v37, %v8900_v53  ;;  %3170 = vmatpush1.bf16.msra.mxu1 %v10523_v48  ;;  %v13406_v36 = vunpack.i.h.bf16 %v10710_v46 }
 0x2af   :  { %v10941_v9 = vsel %vm13396_vm9, %v13037_v34, %v8875_v54  ;;  %vm7220_vm8 = vmpackc.low %vm13397_vm15, %vm13397_vm15  ;;  %v8973_v34 = vpop.permute.xlu0 %8972  ;;  %vm13411_vm9 = vnez %v13119_v25  ;;  %v8905_v25 = vunpack.i.h.bf16 %v10730_v13 }
 0x2b0   :  { %vm13398_vm11 = vmmov %vm13395_vm0  ;;  %7222 = vmatpush1.bf16.msk.msra.mxu0 %vm7220_vm8, %v7221_v42  ;;  %v13404_v42 = vmov %v13391_v59  ;;  %v13409_v59 = vunpack.i.l.bf16 %v10710_v46 }
 0x2b1   :  { %v10956_v60 = vsel %vm13398_vm11, %v8874_v18, %v8829_v55  ;;  %vm13400_vm2 = vmmov %vm13395_vm0  ;;  %3126 = vmatprep.subr.bf16.mxu0 %v10525_v27 }
 0x2b2   :  { %v10962_v54 = vsel %vm13400_vm2, %v13399_v20, %v8874_v18  ;;  %v13401_v20 = vunpack.i.h.bf16 %v10635_v29  ;;  %vm13402_vm14 = vmmov %vm13394_vm12  ;;  %v11018_v29 = vpop.permute.xlu1 %8982 }
 0x2b3   :  { %vm13405_vm7 = vmmov %vm13394_vm12 }
 0x2b4   :  { %v10994_v31 = vsel %vm13402_vm14, %v13401_v20, %v8870_v62  ;;  %v11005_v5 = vsel %vm13405_vm7, %v13404_v42, %v8869_v10  ;;  %vm13407_vm13 = vmmov %vm13403_vm3  ;;  %v8974_v42 = vunpack.i.l.bf16 %v8973_v34  ;;  %3127 = vmatpush1.bf16.msra.mxu0 %v10527_v61  ;;  %v13415_v61 = vunpack.i.h.bf16 %v10621_v39 }
 0x2b5   :  { %v2991_v3 = vsel %vm13407_vm13, %v13406_v36, %v8970_v37  ;;  %vm13408_vm12 = vmmov %vm13403_vm3  ;;  %v8975_v36 = vunpack.i.h.bf16 %v8973_v34  ;;  %v7270_v39 = vpack.c.bf16 %v10994_v31, %v11005_v5  ;;  %v13424_v31 = vld [vmem:[#allocation13_spill] sm:$0xff]  ;;  %v13426_v5 = vunpack.i.l.bf16 %v10698_v40 }
 0x2b6   :  { %v2988_v20 = vsel %vm13408_vm12, %v8969_v30, %v8899_v2  ;;  %vm13410_vm0 = vmmov %vm13403_vm3 }
 0x2b7   :  { %v2990_v48 = vsel %vm13410_vm0, %v13409_v59, %v8969_v30  ;;  %vm7223_vm15 = vmpackc.low %vm13411_vm9, %vm13411_vm9  ;;  %v7224_v46 = vpack.c.bf16 %v2989_v7, %v2988_v20  ;;  %v8904_v30 = vunpack.i.l.bf16 %v10730_v13  ;;  %v13043_v59 = vunpack.i.h.bf16 %v10749_v56 }
 0x2b8   :  { %vm13412_vm8 = vmmov %vm13400_vm2  ;;  %v7227_v18 = vpack.c.bf16 %v2991_v3, %v2990_v48  ;;  %v11064_v48 = vpop.permute.xlu1 %8987 }
 0x2b9   :  { %v11029_v37 = vsel %vm13412_vm8, %v8830_v49, %v8880_v63  ;;  %vm13413_vm11 = vmmov %vm13400_vm2  ;;  %v13040_v49 = vunpack.i.h.bf16 %v10751_v19  ;;  %7225 = vmatprep.subr.msk.bf16.mxu0 %vm7223_vm15, %v7224_v46  ;;  %v11066_v46 = vpop.permute.xlu0 %8977  ;;  %vm13423_vm8 = vcmp.lt.s32.totalorder %v9532_v16, 17 }
 0x2ba   :  { %v11037_v27 = vsel %vm13413_vm11, %v8829_v55, %v13038_v24  ;;  %vm7226_vm2 = vmpackc.low %vm13325_vm10, %vm13325_vm10  ;;  %v13039_v55 = vunpack.i.l.bf16 %v10751_v19  ;;  %vm13425_vm11 = vnez %v13424_v31  ;;  %v13447_v31 = vld [vmem:[#allocation12_spill] sm:$0xff] }
 0x2bb   :  { %vm7236_vm14 = vmpackc.low %vm9896_vm4, %vm9896_vm4  ;;  %7228 = vmatpush1.bf16.msk.msra.mxu0 %vm7226_vm2, %v7227_v18  ;;  %v13430_v18 = vunpack.i.l.bf16 %v10649_v8 }
 0x2bc   :  { %vm13414_vm3 = vmmov %vm13410_vm0 }
 0x2bd   :  { %v2987_v34 = vsel %vm13414_vm3, %v8900_v53, %v8975_v36  ;;  %vm13416_vm7 = vmmov %vm13410_vm0 }
 0x2be   :  { %v3001_v7 = vsel %vm13416_vm7, %v8975_v36, %v13415_v61  ;;  %vm13417_vm13 = vmmov %vm13410_vm0  ;;  %v8990_v36 = vunpack.i.h.bf16 %v11064_v48  ;;  %v8989_v61 = vunpack.i.l.bf16 %v11064_v48  ;;  %7229 = vmatmul.mubr.msk.bf16.vlgmr.msra.gmra.mrb[12].mxu0 %vm3034_vm5, %v10741_v0  ;;  %v8965_v48 = vunpack.i.h.bf16 %v10966_v17 }
 0x2bf   :  { %v2986_v20 = vsel %vm13417_vm13, %v8899_v2, %v8974_v42  ;;  %vm13419_vm12 = vmmov %vm13410_vm0  ;;  %v13420_v2 = vld [vmem:[#allocation14_spill] sm:$0xff]  ;;  %vm13432_vm13 = vcmp.lt.s32.totalorder %v9532_v16, 16  ;;  %3250 = vmatprep.mubr.bf16.mxu0 %v13166_v58 }
 0x2c0   :  { %v3000_v3 = vsel %vm13419_vm12, %v8974_v42, %v13418_v38  ;;  %vm7239_vm0 = vmpackc.low %vm9952_vm1, %vm9952_vm1  ;;  %v7240_v24 = vpack.c.bf16 %v2987_v34, %v2986_v20  ;;  %vm13421_vm9 = vnez %v13420_v2  ;;  %v7276_v38 = vpack.c.bf16 %v11029_v37, %v11037_v27  ;;  %v13445_v2 = vld [vmem:[#allocation44_spill] sm:$0xff] }
 0x2c1   :  { %v7237_v53 = vpack.c.bf16 %v3001_v7, %v3000_v3  ;;  %vm7244_vm15 = vmpackc.low %vm13421_vm9, %vm13421_vm9  ;;  %v13422_v42 = vunpack.i.h.bf16 %v10698_v40  ;;  %v8939_v7 = vunpack.i.l.bf16 %v10843_v28  ;;  %v8940_v3 = vunpack.i.h.bf16 %v10843_v28 }
 0x2c2   :  { %vm7263_vm3 = vmpackc.low %vm13425_vm11, %vm13425_vm11  ;;  %v11129_v28 = vsel %vm13432_vm13, %v8870_v62, %v13043_v59  ;;  %v11147_v62 = vpop.permute.xlu0 %8992  ;;  %vm13446_vm9 = vcmp.lt.s32.totalorder %v9532_v16, 113 }
 0x2c3   :  { %v11086_v34 = vsel %vm13423_vm8, %v13422_v42, %v8905_v25  ;;  %vm13427_vm7 = vmmov %vm13423_vm8  ;;  %v13428_v42 = vunpack.i.h.bf16 %v10649_v8  ;;  %7238 = vmatprep.subr.msk.bf16.mxu1 %vm7236_vm14, %v7237_v53  ;;  %v11145_v53 = vpop.permute.xlu1 %9002  ;;  %vm13436_vm8 = vcmp.lt.s32.totalorder %v9532_v16, 15  ;;  %v11200_v11 = vsel %vm13446_vm9, %v8939_v7, %v13041_v12 }
 0x2c4   :  { %v11103_v20 = vsel %vm13427_vm7, %v13426_v5, %v8904_v30  ;;  %vm13429_vm10 = vmmov %vm13427_vm7  ;;  %7241 = vmatpush1.bf16.msk.msra.mxu1 %vm7239_vm0, %v7240_v24  ;;  %v11158_v14 = vsel %vm13436_vm8, %v8880_v63, %v13040_v49  ;;  %v8945_v24 = vunpack.i.h.bf16 %v10800_v32  ;;  %v13044_v63 = vunpack.i.h.bf16 %v11147_v62 }
 0x2c5   :  { %v2703_v23 = vsel %vm13429_vm10, %v8990_v36, %v13428_v42  ;;  %vm13431_vm2 = vmmov %vm13427_vm7  ;;  %v13434_v42 = vld [vmem:[#allocation15_spill] sm:$0xff]  ;;  %7265 = vmatprep.subr.msk.bf16.mxu1 %vm7263_vm3, %v13440_v44  ;;  %v13045_v50 = vunpack.i.l.bf16 %v11147_v62  ;;  %v13046_v44 = vunpack.i.l.bf16 %v10885_v21  ;;  %v13473_v12 = vunpack.i.h.bf16 %v10685_v1 }
 0x2c6   :  { %v2702_v40 = vsel %vm13431_vm2, %v8989_v61, %v13430_v18  ;;  %vm13433_vm12 = vmmov %vm13432_vm13  ;;  %vm13435_vm4 = vnez %v13434_v42  ;;  %v13441_v18 = vld [vmem:[#allocation5_spill] sm:$0xff]  ;;  %v13458_v42 = vpack.c.bf16 %v10912_v47, %v10929_v33  ;;  %v11254_v59 = vpop.permute.xlu0 %8997  ;;  %v13464_v47 = vpack.c.bf16 %v10837_v57, %v10841_v51 }
 0x2c7   :  { %v11137_v8 = vsel %vm13433_vm12, %v8869_v10, %v13042_v4  ;;  %v7248_v5 = vpack.c.bf16 %v2703_v23, %v2702_v40  ;;  %vm7247_vm14 = vmpackc.low %vm13435_vm4, %vm13435_vm4  ;;  %v13439_v23 = vpack.c.bf16 %v10823_v41, %v10829_v15  ;;  %vm13442_vm0 = vcmp.ge.s32.totalorder %v13441_v18, 1  ;;  %v13452_v15 = vld [vmem:[#allocation8_spill] sm:$0xff]  ;;  %7242 = vmatmul.mubr.msk.bf16.vlgmr.msra.gmra.mrb[12].mxu1 %vm3034_vm5, %v10741_v0 }
 0x2c8   :  { %vm13438_vm1 = vmmov %vm13436_vm8  ;;  %v8910_v40 = vunpack.i.h.bf16 %v13445_v2  ;;  %vm13453_vm2 = vcmp.ge.s32.totalorder %v13452_v15, 1  ;;  %v8909_v4 = vunpack.i.l.bf16 %v13445_v2  ;;  %v11252_v2 = vpop.permute.xlu1 %9007  ;;  %v8925_v57 = vunpack.i.h.bf16 %v10798_v43  ;;  %3293 = vmatprep.mubr.bf16.mxu1 %v13166_v58 }
 0x2c9   :  { %v11166_v10 = vsel %vm13438_vm1, %v13437_v45, %v13039_v55  ;;  %7246 = vmatprep.subr.msk.bf16.mxu0 %vm7244_vm15, %v13439_v23  ;;  %vm11189_vm7 = vmpackc.low %vm13442_vm0, %vm13442_vm0  ;;  %vm13448_vm15 = vnez %v13447_v31  ;;  %v13047_v23 = vunpack.i.h.bf16 %v10885_v21  ;;  %v13450_v55 = vunpack.i.h.bf16 %v10629_v6 }
 0x2ca   :  { %vm7266_vm11 = vmpackc.low %vm13448_vm15, %vm13448_vm15  ;;  %7249 = vmatpush1.bf16.msk.msra.mxu0 %vm7247_vm14, %v7248_v5  ;;  %v13048_v33 = vunpack.i.h.bf16 %v11252_v2  ;;  %v9009_v41 = vunpack.i.l.bf16 %v11252_v2  ;;  %v8924_v51 = vunpack.i.l.bf16 %v10798_v43 }
 0x2cb   :  { %vm13449_vm3 = vmmov %vm13446_vm9  ;;  %7252 = vmatprep.subr.msk.bf16.mxu0 %vm11189_vm7, %v13458_v42  ;;  %7268 = vmatpush1.bf16.msk.msra.mxu1 %vm7266_vm11, %v13464_v47  ;;  %v13465_v42 = vld [vmem:[#allocation21_spill] sm:$0xff]  ;;  %vm13474_vm11 = vcmp.lt.s32.totalorder %v9532_v16, 15 }
 0x2cc   :  { %v11212_v45 = vsel %vm13449_vm3, %v8940_v3, %v8945_v24  ;;  %vm13451_vm10 = vmmov %vm13433_vm12  ;;  %vm13466_vm8 = vnez %v13465_v42  ;;  %v2847_v31 = vsel %vm13474_vm11, %v13048_v33, %v13473_v12  ;;  %v13481_v33 = vld [vmem:[#allocation24_spill] sm:$0xff] }
 0x2cd   :  { %v2775_v49 = vsel %vm13451_vm10, %v13044_v63, %v13450_v55  ;;  %vm11230_vm13 = vmpackc.low %vm13453_vm2, %vm13453_vm2  ;;  %v13456_v63 = vunpack.i.l.bf16 %v10629_v6  ;;  %v13459_v55 = vld [vmem:[#allocation4_spill] sm:$0xff]  ;;  %v9013_v6 = vpop.permute.xlu1 %9012 }
 0x2ce   :  { %vm13457_vm12 = vmmov %vm13451_vm10  ;;  %vm13460_vm4 = vcmp.ge.s32.totalorder %v13459_v55, 1  ;;  %7271 = vmatprep.subr.msk.bf16.mxu1 %vm11230_vm13, %v7270_v39  ;;  %vm13479_vm13 = vcmp.lt.s32.totalorder %v9532_v16, 17 }
 0x2cf   :  { %v2774_v5 = vsel %vm13457_vm12, %v13045_v50, %v13456_v63  ;;  %vm11259_vm14 = vmpackc.low %vm13460_vm4, %vm13460_vm4  ;;  %v13463_v63 = vld [vmem:[#allocation45_spill] sm:$0xff]  ;;  %v13475_v50 = vunpack.i.l.bf16 %v10685_v1  ;;  %v2688_v1 = vsel %vm13479_vm13, %v8909_v4, %v8989_v61  ;;  %vm13482_vm12 = vnez %v13481_v33 }
 0x2d0   :  { %v7254_v0 = vpack.c.bf16 %v2775_v49, %v2774_v5  ;;  %vm7256_vm1 = vmpackc.low %vm13466_vm8, %vm13466_vm8  ;;  %v8934_v49 = vunpack.i.l.bf16 %v13463_v63  ;;  %v13467_v5 = vld [vmem:[#allocation9_spill] sm:$0xff]  ;;  %v9014_v61 = vunpack.i.l.bf16 %v9013_v6 }
 0x2d1   :  { %vm13468_vm0 = vcmp.ge.s32.totalorder %v13467_v5, 1  ;;  %vm13471_vm9 = vmmov %vm13449_vm3  ;;  %v11401_v33 = vpop.permute.xlu1 %9027 }
 0x2d2   :  { %vm11288_vm7 = vmpackc.low %vm13468_vm0, %vm13468_vm0  ;;  %v11297_v43 = vsel %vm13471_vm9, %v13046_v44, %v8939_v7  ;;  %7255 = vmatpush1.bf16.msk.msra.mxu0 %vm11259_vm14, %v7254_v0  ;;  %v13477_v44 = vld [vmem:[#allocation20_spill] sm:$0xff]  ;;  %v9018_v0 = vpop.permute.xlu0 %9017 }
 0x2d3   :  { %vm13472_vm15 = vmmov %vm13449_vm3  ;;  %vm13478_vm10 = vnez %v13477_v44  ;;  %v9020_v42 = vunpack.i.h.bf16 %v9018_v0 }
 0x2d4   :  { %v11303_v39 = vsel %vm13472_vm15, %v13047_v23, %v8940_v3  ;;  %vm13476_vm3 = vmmov %vm13474_vm11  ;;  %v8960_v3 = vunpack.i.h.bf16 %v10887_v35  ;;  %v8959_v23 = vunpack.i.l.bf16 %v10887_v35 }
 0x2d5   :  { %v2846_v7 = vsel %vm13476_vm3, %v9009_v41, %v13475_v50  ;;  %vm7275_vm2 = vmpackc.low %vm13478_vm10, %vm13478_vm10  ;;  %v13480_v50 = vpack.c.bf16 %v10941_v9, %v10962_v54  ;;  %v13484_v9 = vpack.c.bf16 %v10906_v22, %v10918_v52  ;;  %v9015_v54 = vunpack.i.h.bf16 %v9013_v6  ;;  %v13487_v22 = vld [vmem:[#allocation18_spill] sm:$0xff]  ;;  %v13498_v6 = vld [vmem:[#allocation16_spill] sm:$0xff] }
 0x2d6   :  { %v7260_v12 = vpack.c.bf16 %v2847_v31, %v2846_v7  ;;  %vm7259_vm4 = vmpackc.low %vm13482_vm12, %vm13482_vm12  ;;  %v13485_v31 = vld [vmem:[#allocation23_spill] sm:$0xff]  ;;  %v7327_v7 = vpack.c.bf16 %v11303_v39, %v11297_v43  ;;  %vm13488_vm0 = vnez %v13487_v22  ;;  %vm13497_vm12 = vcmp.lt.s32.totalorder %v9532_v16, 16 }
 0x2d7   :  { %7258 = vmatprep.subr.msk.bf16.mxu0 %vm7256_vm1, %v13480_v50  ;;  %vm13483_vm14 = vmmov %vm13479_vm13  ;;  %7274 = vmatpush1.bf16.msk.msra.mxu1 %vm11288_vm7, %v13484_v9  ;;  %vm13486_vm8 = vnez %v13485_v31  ;;  %v9019_v50 = vunpack.i.l.bf16 %v9018_v0  ;;  %v13500_v0 = vunpack.i.h.bf16 %v11147_v62  ;;  %v8985_v31 = vunpack.i.h.bf16 %v11018_v29 }
 0x2d8   :  { %v2689_v35 = vsel %vm13483_vm14, %v8910_v40, %v8990_v36  ;;  %vm7278_vm1 = vmpackc.low %vm13486_vm8, %vm13486_vm8  ;;  %v8964_v36 = vunpack.i.l.bf16 %v10966_v17  ;;  %7277 = vmatprep.subr.msk.bf16.mxu1 %vm7275_vm2, %v7276_v38  ;;  %7261 = vmatpush1.bf16.msk.msra.mxu0 %vm7259_vm4, %v7260_v12  ;;  %v13493_v38 = vld [vmem:[#allocation17_spill] sm:$0xff]  ;;  %v11403_v12 = vpop.permute.xlu0 %9022  ;;  %vm13499_vm4 = vnez %v13498_v6  ;;  %v13529_v6 = vunpack.i.h.bf16 %v13463_v63  ;;  %v13599_v17 = vld [vmem:[#allocation39_spill] sm:$0xff] }
 0x2d9   :  { %vm7301_vm7 = vmpackc.low %vm13488_vm0, %vm13488_vm0  ;;  %vm13494_vm10 = vnez %v13493_v38  ;;  %v13518_v38 = vld [vmem:[#allocation10_spill] sm:$0xff]  ;;  %v9025_v63 = vunpack.i.h.bf16 %v11403_v12 }
 0x2da   :  { %vm13489_vm9 = vmmov %vm13479_vm13  ;;  %vm13495_vm13 = vcmp.lt.s32.totalorder %v9532_v16, 113 }
 0x2db   :  { %v2691_v52 = vsel %vm13489_vm9, %v9015_v54, %v8910_v40  ;;  %vm13490_vm15 = vmmov %vm13489_vm9  ;;  %v11395_v13 = vsel %vm13495_vm13, %v8945_v24, %v8960_v3  ;;  %v13496_v40 = vunpack.i.h.bf16 %v10749_v56 }
 0x2dc   :  { %v2693_v47 = vsel %vm13490_vm15, %v8905_v25, %v9015_v54  ;;  %vm13491_vm11 = vmmov %vm13489_vm9  ;;  %v11389_v25 = vld [vmem:[%s12839_s2] sm:$0xff]   ;;  %v13504_v54 = vunpack.i.l.bf16 %v10749_v56 }
 0x2dd   :  { %v2690_v37 = vsel %vm13491_vm11, %v9014_v61, %v8909_v4  ;;  %vm13492_vm3 = vmmov %vm13489_vm9  ;;  %v2765_v44 = vsel %vm13497_vm12, %v13496_v40, %v9020_v42  ;;  %7262 = vmatmul.mubr.msk.bf16.vlgmr.msra.gmra.mrb[8].mxu0 %vm3034_vm5, %v11389_v25  ;;  %v11494_v40 = vpop.permute.xlu0 %9032 }
 0x2de   :  { %v2692_v27 = vsel %vm13492_vm3, %v8904_v30, %v9014_v61  ;;  %vm7282_vm2 = vmpackc.low %vm13494_vm10, %vm13494_vm10  ;;  %v7302_v30 = vpack.c.bf16 %v2689_v35, %v2688_v1  ;;  %v13502_v1 = vunpack.i.l.bf16 %v11147_v62  ;;  %v7305_v9 = vpack.c.bf16 %v2691_v52, %v2690_v37  ;;  %3336 = vmatprep.mubr.bf16.mxu0 %v13166_v58 }
 0x2df   :  { %v7283_v4 = vpack.c.bf16 %v2693_v47, %v2692_v27  ;;  %vm7285_vm14 = vmpackc.low %vm13499_vm4, %vm13499_vm4  ;;  %v13506_v47 = vpack.c.bf16 %v10935_v26, %v10956_v60  ;;  %v13507_v27 = vld [vmem:[#allocation19_spill] sm:$0xff]  ;;  %v13509_v62 = vunpack.i.l.bf16 %v10800_v32 }
 0x2e0   :  { %vm13501_vm9 = vmmov %vm13497_vm12  ;;  %vm13508_vm3 = vnez %v13507_v27  ;;  %vm13510_vm12 = vcmp.lt.s32.totalorder %v9532_v16, 113  ;;  %v13513_v32 = vld [vmem:[#allocation7_spill] sm:$0xff]  ;;  %v13537_v27 = vmov %v13529_v6 }
 0x2e1   :  { %v2761_v24 = vsel %vm13501_vm9, %v8925_v57, %v13500_v0  ;;  %vm13503_vm15 = vmmov %vm13501_vm9  ;;  %7280 = vmatpush1.bf16.msk.msra.mxu1 %vm7278_vm1, %v13506_v47  ;;  %v11435_v56 = vsel %vm13510_vm12, %v13509_v62, %v8959_v23  ;;  %7284 = vmatprep.subr.msk.bf16.mxu0 %vm7282_vm2, %v7283_v4  ;;  %vm13514_vm1 = vcmp.ge.s32.totalorder %v13513_v32, 1  ;;  %v8980_v4 = vunpack.i.h.bf16 %v11066_v46 }
 0x2e2   :  { %v2760_v35 = vsel %vm13503_vm15, %v8924_v51, %v13502_v1  ;;  %vm13505_vm11 = vmmov %vm13501_vm9  ;;  %7303 = vmatprep.subr.msk.bf16.mxu1 %vm7301_vm7, %v7302_v30  ;;  %vm13519_vm7 = vcmp.ge.s32.totalorder %v13518_v38, 1  ;;  %v13544_v30 = vld [vmem:[#allocation22_spill] sm:$0xff] }
 0x2e3   :  { %v2764_v61 = vsel %vm13505_vm11, %v13504_v54, %v9019_v50  ;;  %vm7304_vm13 = vmpackc.low %vm13508_vm3, %vm13508_vm3  ;;  %v2763_v22 = vsel %vm13505_vm11, %v9020_v42, %v8925_v57  ;;  %v9005_v57 = vunpack.i.h.bf16 %v11145_v53  ;;  %v7308_v42 = vpack.c.bf16 %v2761_v24, %v2760_v35  ;;  %v13531_v35 = vld [vmem:[#allocation11_spill] sm:$0xff] }
 0x2e4   :  { %vm13511_vm9 = vmmov %vm13510_vm12  ;;  %v7289_v37 = vpack.c.bf16 %v2765_v44, %v2764_v61  ;;  %7281 = vmatmul.mubr.msk.bf16.vlgmr.msra.gmra.mrb[8].mxu1 %vm3034_vm5, %v11389_v25  ;;  %v13523_v44 = vld [vmem:[#allocation6_spill] sm:$0xff]  ;;  %v9000_v54 = vunpack.i.h.bf16 %v11254_v59  ;;  %v8999_v61 = vunpack.i.l.bf16 %v11254_v59 }
 0x2e5   :  { %v11441_v26 = vsel %vm13511_vm9, %v8959_v23, %v8964_v36  ;;  %vm13512_vm8 = vmmov %vm13511_vm9  ;;  %vm13524_vm2 = vcmp.ge.s32.totalorder %v13523_v44, 1  ;;  %vm13527_vm9 = vcmp.lt.s32.totalorder %v9532_v16, 15  ;;  %7306 = vmatpush1.bf16.msk.msra.mxu1 %vm7304_vm13, %v7305_v9  ;;  %v13535_v9 = vld [vmem:[#allocation25_spill] sm:$0xff]  ;;  %3379 = vmatprep.mubr.bf16.mxu1 %v13166_v58 }
 0x2e6   :  { %v11447_v60 = vsel %vm13512_vm8, %v8960_v3, %v8965_v48  ;;  %vm11463_vm15 = vmpackc.low %vm13514_vm1, %vm13514_vm1  ;;  %v8984_v3 = vunpack.i.l.bf16 %v11018_v29  ;;  %v8979_v29 = vunpack.i.l.bf16 %v11066_v46  ;;  %vm13536_vm3 = vnez %v13535_v9 }
 0x2e7   :  { %vm13517_vm0 = vmmov %vm13505_vm11  ;;  %v9030_v46 = vunpack.i.h.bf16 %v11401_v33 }
 0x2e8   :  { %v2762_v52 = vsel %vm13517_vm0, %v9019_v50, %v8924_v51  ;;  %vm11477_vm10 = vmpackc.low %vm13519_vm7, %vm13519_vm7  ;;  %v13522_v51 = vpack.c.bf16 %v11086_v34, %v11103_v20  ;;  %v9038_v50 = vpop.permute.xlu1 %9037  ;;  %v2832_v34 = vsel %vm13527_vm9, %v8934_v49, %v9009_v41  ;;  %v13528_v20 = vunpack.i.h.bf16 %v11252_v2 }
 0x2e9   :  { %vm11499_vm12 = vmpackc.low %vm13524_vm2, %vm13524_vm2  ;;  %v9040_v24 = vunpack.i.h.bf16 %v9038_v50  ;;  %v9039_v1 = vunpack.i.l.bf16 %v9038_v50  ;;  %v9004_v41 = vunpack.i.l.bf16 %v11145_v53  ;;  %v7311_v47 = vpack.c.bf16 %v2763_v22, %v2762_v52  ;;  %7309 = vmatprep.subr.msk.bf16.mxu1 %vm11477_vm10, %v7308_v42  ;;  %v13546_v42 = vld [vmem:[#allocation26_spill] sm:$0xff] }
 0x2ea   :  { %7287 = vmatpush1.bf16.msk.msra.mxu0 %vm7285_vm14, %v13522_v51  ;;  %vm13530_vm4 = vmmov %vm13527_vm9  ;;  %vm13532_vm14 = vcmp.ge.s32.totalorder %v13531_v35, 1  ;;  %v13539_v53 = vunpack.i.h.bf16 %v10751_v19  ;;  %v13542_v52 = vunpack.i.l.bf16 %v10751_v19  ;;  %vm13545_vm7 = vnez %v13544_v30 }
 0x2eb   :  { %v2833_v0 = vsel %vm13530_vm4, %v13529_v6, %v13528_v20  ;;  %7290 = vmatprep.subr.msk.bf16.mxu0 %vm11463_vm15, %v7289_v37  ;;  %vm11525_vm8 = vmpackc.low %vm13532_vm14, %vm13532_vm14  ;;  %vm13547_vm2 = vnez %v13546_v42  ;;  %v13548_v19 = vpack.c.bf16 %v11129_v28, %v11137_v8  ;;  %v11570_v6 = vpop.permute.xlu0 %9047  ;;  %v7343_v28 = vpack.c.bf16 %v11447_v60, %v11441_v26 }
 0x2ec   :  { %vm7313_vm13 = vmpackc.low %vm13536_vm3, %vm13536_vm3  ;;  %v7314_v51 = vpack.c.bf16 %v2833_v0, %v2832_v34  ;;  %v11568_v20 = vpop.permute.xlu1 %9042  ;;  %v9035_v34 = vunpack.i.h.bf16 %v11494_v40  ;;  %v9034_v0 = vunpack.i.l.bf16 %v11494_v40  ;;  %7312 = vmatpush1.bf16.msk.msra.mxu1 %vm11525_vm8, %v7311_v47  ;;  %v9029_v2 = vunpack.i.l.bf16 %v11401_v33  ;;  %v13557_v47 = vld [vmem:[#allocation29_spill] sm:$0xff] }
 0x2ed   :  { %vm13538_vm1 = vmmov %vm13530_vm4  ;;  %vm13558_vm3 = vnez %v13557_v47  ;;  %v9050_v30 = vunpack.i.h.bf16 %v11570_v6  ;;  %v9049_v42 = vunpack.i.l.bf16 %v11570_v6  ;;  %v13610_v6 = vunpack.i.h.bf16 %v10885_v21 }
 0x2ee   :  { %v2835_v62 = vsel %vm13538_vm1, %v9040_v24, %v13537_v27  ;;  %vm13540_vm15 = vmmov %vm13538_vm1  ;;  %7293 = vmatpush1.bf16.msk.msra.mxu0 %vm11499_vm12, %v13548_v19  ;;  %v13549_v27 = vld [vmem:[#allocation27_spill] sm:$0xff]  ;;  %vm13551_vm12 = vcmp.lt.s32.totalorder %v9532_v16, 112  ;;  %7315 = vmatprep.subr.msk.bf16.mxu1 %vm7313_vm13, %v7314_v51 }
 0x2ef   :  { %v2837_v23 = vsel %vm13540_vm15, %v13539_v53, %v9040_v24  ;;  %vm13541_vm11 = vmmov %vm13538_vm1  ;;  %v7346_v24 = vpack.c.bf16 %v11395_v13, %v11435_v56  ;;  %vm13550_vm4 = vnez %v13549_v27  ;;  %v3505_v8 = vsel %vm13551_vm12, %v8980_v4, %v8985_v31  ;;  %v13553_v56 = vld [vmem:[#allocation28_spill] sm:$0xff]  ;;  %v13564_v53 = vld [vmem:[#allocation30_spill] sm:$0xff] }
 0x2f0   :  { %v2834_v22 = vsel %vm13541_vm11, %v9039_v1, %v8934_v49  ;;  %vm13543_vm0 = vmmov %vm13538_vm1  ;;  %v9024_v49 = vunpack.i.l.bf16 %v11403_v12  ;;  %vm13554_vm8 = vnez %v13553_v56 }
 0x2f1   :  { %v2836_v37 = vsel %vm13543_vm0, %v13542_v52, %v9039_v1  ;;  %vm7294_vm10 = vmpackc.low %vm13545_vm7, %vm13545_vm7  ;;  %v7317_v1 = vpack.c.bf16 %v2835_v62, %v2834_v22  ;;  %v13563_v62 = vpack.c.bf16 %v11158_v14, %v11166_v10  ;;  %v13569_v22 = vld [vmem:[#allocation31_spill] sm:$0xff]  ;;  %v9045_v52 = vunpack.i.h.bf16 %v11568_v20 }
 0x2f2   :  { %vm7297_vm9 = vmpackc.low %vm13547_vm2, %vm13547_vm2  ;;  %v7295_v50 = vpack.c.bf16 %v2837_v23, %v2836_v37  ;;  %v13568_v23 = vpack.c.bf16 %v11212_v45, %v11200_v11  ;;  %vm13570_vm2 = vnez %v13569_v22  ;;  %v9044_v37 = vunpack.i.l.bf16 %v11568_v20  ;;  %v11802_v11 = vld [vmem:[%s12839_s2 + $0x10] sm:$0xff]  }
 0x2f3   :  { %vm7316_vm14 = vmpackc.low %vm13550_vm4, %vm13550_vm4  ;;  %vm13571_vm4 = vcmp.lt.s32.totalorder %v13441_v18, 15 }
 0x2f4   :  { %vm13552_vm1 = vmmov %vm13551_vm12  ;;  %7296 = vmatprep.subr.msk.bf16.mxu0 %vm7294_vm10, %v7295_v50  ;;  %7318 = vmatpush1.bf16.msk.msra.mxu1 %vm7316_vm14, %v7317_v1 }
 0x2f5   :  { %v3504_v13 = vsel %vm13552_vm1, %v8979_v29, %v8984_v3  ;;  %vm7323_vm15 = vmpackc.low %vm13554_vm8, %vm13554_vm8  ;;  %7299 = vmatpush1.bf16.msk.msra.mxu0 %vm7297_vm9, %v13563_v62  ;;  %vm13574_vm8 = vcmp.lt.s32.totalorder %v13452_v15, 15 }
 0x2f6   :  { %vm13555_vm11 = vmmov %vm13552_vm1  ;;  %7325 = vmatprep.subr.msk.bf16.mxu0 %vm7323_vm15, %v13568_v23  ;;  %v7330_v45 = vpack.c.bf16 %v3505_v8, %v3504_v13  ;;  %v13614_v8 = vld [vmem:[#allocation33_spill] sm:$0xff] }
 0x2f7   :  { %v11602_v26 = vsel %vm13555_vm11, %v8984_v3, %v9004_v41  ;;  %vm13556_vm0 = vmmov %vm13552_vm1  ;;  %vm13565_vm11 = vnez %v13564_v53  ;;  %7319 = vmatmul.mubr.msk.bf16.vlgmr.msra.gmra.mrb[12].mxu1 %vm3034_vm5, %v11389_v25 }
 0x2f8   :  { %v11606_v60 = vsel %vm13556_vm0, %v8985_v31, %v9005_v57  ;;  %vm7342_vm13 = vmpackc.low %vm13558_vm3, %vm13558_vm3  ;;  %7300 = vmatmul.mubr.msk.bf16.vlgmr.msra.gmra.mrb[12].mxu0 %vm3034_vm5, %v11389_v25  ;;  %3692 = vmatprep.mubr.bf16.mxu1 %v13166_v58 }
 0x2f9   :  { %vm13559_vm7 = vmmov %vm13556_vm0  ;;  %7344 = vmatprep.subr.msk.bf16.mxu1 %vm7342_vm13, %v7343_v28  ;;  %v7352_v51 = vpack.c.bf16 %v11606_v60, %v11602_v26  ;;  %3649 = vmatprep.mubr.bf16.mxu0 %v13166_v58 }
 0x2fa   :  { %v3506_v9 = vsel %vm13559_vm7, %v8999_v61, %v8979_v29  ;;  %vm13560_vm10 = vmmov %vm13556_vm0  ;;  %v11639_v29 = vpop.permute.xlu0 %9062  ;;  %vm13566_vm7 = vcmp.lt.s32.totalorder %v9532_v16, 111 }
 0x2fb   :  { %v3507_v3 = vsel %vm13560_vm10, %v9000_v54, %v8980_v4  ;;  %vm13561_vm12 = vmmov %vm13556_vm0  ;;  %v11637_v4 = vpop.permute.xlu1 %9052 }
 0x2fc   :  { %v3501_v31 = vsel %vm13561_vm12, %v9005_v57, %v9025_v63  ;;  %vm13562_vm1 = vmmov %vm13556_vm0  ;;  %v3577_v57 = vsel %vm13566_vm7, %v9030_v46, %v9035_v34  ;;  %v9055_v10 = vunpack.i.h.bf16 %v11637_v4  ;;  %v7333_v50 = vpack.c.bf16 %v3507_v3, %v3506_v9 }
 0x2fd   :  { %v3500_v33 = vsel %vm13562_vm1, %v9004_v41, %v9024_v49  ;;  %vm7326_vm0 = vmpackc.low %vm13565_vm11, %vm13565_vm11  ;;  %v9054_v41 = vunpack.i.l.bf16 %v11637_v4  ;;  %vm13579_vm12 = vcmp.lt.s32.totalorder %v13459_v55, 15  ;;  %vm13582_vm11 = vcmp.lt.s32.totalorder %v13467_v5, 15  ;;  %v13588_v5 = vld [vmem:[#allocation36_spill] sm:$0xff] }
 0x2fe   :  { %vm13567_vm10 = vmmov %vm13566_vm7  ;;  %v7349_v19 = vpack.c.bf16 %v3501_v31, %v3500_v33  ;;  %7328 = vmatpush1.bf16.msk.msra.mxu0 %vm7326_vm0, %v7327_v7  ;;  %v9068_v28 = vpop.permute.xlu0 %9067  ;;  %v13597_v33 = vld [vmem:[#allocation38_spill] sm:$0xff] }
 0x2ff   :  { %v3576_v14 = vsel %vm13567_vm10, %v9029_v2, %v9034_v0  ;;  %vm7345_vm9 = vmpackc.low %vm13570_vm2, %vm13570_vm2  ;;  %v9058_v15 = vpop.permute.xlu1 %9057  ;;  %v9070_v25 = vunpack.i.h.bf16 %v9068_v28  ;;  %v9069_v13 = vunpack.i.l.bf16 %v9068_v28 }
 0x300   :  { %vm11680_vm14 = vmpackc.low %vm13571_vm4, %vm13571_vm4  ;;  %v7336_v18 = vpack.c.bf16 %v3577_v57, %v3576_v14  ;;  %7347 = vmatpush1.bf16.msk.msra.mxu1 %vm7345_vm9, %v7346_v24  ;;  %v9060_v43 = vunpack.i.h.bf16 %v9058_v15  ;;  %v9059_v39 = vunpack.i.l.bf16 %v9058_v15  ;;  %vm13589_vm9 = vnez %v13588_v5  ;;  %v13601_v14 = vld [vmem:[#allocation32_spill] sm:$0xff] }
 0x301   :  { %vm11691_vm15 = vmpackc.low %vm13574_vm8, %vm13574_vm8  ;;  %7331 = vmatprep.subr.msk.bf16.mxu0 %vm11680_vm14, %v7330_v45  ;;  %v13605_v45 = vld [vmem:[#allocation34_spill] sm:$0xff] }
 0x302   :  { %vm13577_vm3 = vmmov %vm13566_vm7  ;;  %7350 = vmatprep.subr.msk.bf16.mxu1 %vm11691_vm15, %v7349_v19  ;;  %v9073_v31 = vpop.permute.xlu0 %9072 }
 0x303   :  { %v3572_v1 = vsel %vm13577_vm3, %v9049_v42, %v9054_v41  ;;  %vm13578_vm13 = vmmov %vm13577_vm3  ;;  %v9078_v3 = vpop.permute.xlu1 %9077  ;;  %v9074_v53 = vunpack.i.l.bf16 %v9073_v31 }
 0x304   :  { %v3573_v27 = vsel %vm13578_vm13, %v9050_v30, %v9055_v10  ;;  %vm11716_vm1 = vmpackc.low %vm13579_vm12, %vm13579_vm12  ;;  %v9079_v62 = vunpack.i.l.bf16 %v9078_v3 }
 0x305   :  { %vm11730_vm0 = vmpackc.low %vm13582_vm11, %vm13582_vm11  ;;  %v7355_v60 = vpack.c.bf16 %v3573_v27, %v3572_v1  ;;  %7334 = vmatpush1.bf16.msk.msra.mxu0 %vm11716_vm1, %v7333_v50  ;;  %vm13600_vm1 = vnez %v13599_v17  ;;  %v9119_v17 = vld [vmem:[%s12841_s5 + $0x80] sm:$0xff]  }
 0x306   :  { %vm13585_vm7 = vmmov %vm13577_vm3  ;;  %7353 = vmatpush1.bf16.msk.msra.mxu1 %vm11730_vm0, %v7352_v51  ;;  %vm13602_vm0 = vnez %v13601_v14  ;;  %v9093_v1 = vpop.permute.xlu0 %9092  ;;  %v9122_v14 = vld [vmem:[%s12841_s5 + $0x48] sm:$0xff]  }
 0x307   :  { %v3578_v7 = vsel %vm13585_vm7, %v9044_v37, %v9029_v2  ;;  %vm13586_vm10 = vmmov %vm13577_vm3  ;;  %v9064_v2 = vunpack.i.l.bf16 %v11639_v29  ;;  %vm13598_vm7 = vnez %v13597_v33 }
 0x308   :  { %v3579_v24 = vsel %vm13586_vm10, %v9045_v52, %v9030_v46  ;;  %vm13587_vm2 = vmmov %vm13577_vm3  ;;  %v9065_v46 = vunpack.i.h.bf16 %v11639_v29  ;;  %vm13593_vm3 = vcmp.lt.s32.totalorder %v9532_v16, 113  ;;  %v9075_v29 = vunpack.i.h.bf16 %v9073_v31 }
 0x309   :  { %v3575_v56 = vsel %vm13587_vm2, %v9035_v34, %v9050_v30  ;;  %vm7335_vm4 = vmpackc.low %vm13589_vm9, %vm13589_vm9  ;;  %v13591_v34 = vld [vmem:[#allocation37_spill] sm:$0xff]  ;;  %v3425_v47 = vsel %vm13593_vm3, %v9070_v25, %v9060_v43  ;;  %vm13603_vm9 = vcmp.lt.s32.totalorder %v9532_v16, 112 }
 0x30a   :  { %vm13590_vm14 = vmmov %vm13587_vm2  ;;  %vm13592_vm8 = vnez %v13591_v34  ;;  %7337 = vmatprep.subr.msk.bf16.mxu0 %vm7335_vm4, %v7336_v18  ;;  %v3496_v30 = vsel %vm13603_vm9, %v9079_v62, %v9064_v2  ;;  %v9098_v59 = vpop.permute.xlu0 %9097 }
 0x30b   :  { %v3574_v26 = vsel %vm13590_vm14, %v9034_v0, %v9049_v42  ;;  %vm7354_vm15 = vmpackc.low %vm13592_vm8, %vm13592_vm8  ;;  %vm13606_vm8 = vnez %v13605_v45  ;;  %v9128_v45 = vld [vmem:[%s12841_s5 + $0x10] sm:$0xff]  }
 0x30c   :  { %vm13594_vm13 = vmmov %vm13593_vm3  ;;  %v7358_v57 = vpack.c.bf16 %v3575_v56, %v3574_v26  ;;  %7356 = vmatprep.subr.msk.bf16.mxu1 %vm7354_vm15, %v7355_v60 }
 0x30d   :  { %v3427_v40 = vsel %vm13594_vm13, %v8965_v48, %v9070_v25  ;;  %vm13595_vm12 = vmmov %vm13593_vm3  ;;  %v9080_v48 = vunpack.i.h.bf16 %v9078_v3  ;;  %v9094_v25 = vunpack.i.l.bf16 %v9093_v1 }
 0x30e   :  { %v3424_v0 = vsel %vm13595_vm12, %v9069_v13, %v9059_v39  ;;  %vm13596_vm11 = vmmov %vm13593_vm3 }
 0x30f   :  { %v3426_v9 = vsel %vm13596_vm11, %v8964_v36, %v9069_v13  ;;  %vm7338_vm10 = vmpackc.low %vm13598_vm7, %vm13598_vm7  ;;  %v7339_v36 = vpack.c.bf16 %v3579_v24, %v3578_v7  ;;  %v7362_v23 = vpack.c.bf16 %v3425_v47, %v3424_v0  ;;  %v3437_v18 = vsel %vm13596_vm11, %v9075_v29, %v13610_v6  ;;  %v13616_v13 = vld [vmem:[#allocation35_spill] sm:$0xff] }
 0x310   :  { %vm7357_vm2 = vmpackc.low %vm13600_vm1, %vm13600_vm1  ;;  %v7365_v22 = vpack.c.bf16 %v3427_v40, %v3426_v9  ;;  %vm13615_vm7 = vnez %v13614_v8  ;;  %v9132_v6 = vld [vmem:[%s12841_s5 + $0x18] sm:$0xff]   ;;  %v9141_v8 = vld [vmem:[%s12841_s5 + $0xf0] sm:$0xff]  }
 0x311   :  { %vm7361_vm14 = vmpackc.low %vm13602_vm0, %vm13602_vm0  ;;  %7340 = vmatpush1.bf16.msk.msra.mxu0 %vm7338_vm10, %v7339_v36  ;;  %7359 = vmatpush1.bf16.msk.msra.mxu1 %vm7357_vm2, %v7358_v57  ;;  %v9120_v36 = vld [vmem:[%s12841_s5] sm:$0xff]   ;;  %v9121_v57 = vld [vmem:[%s12841_s5 + $0xc8] sm:$0xff]  }
 0x312   :  { %vm13604_vm4 = vmmov %vm13603_vm9  ;;  %7363 = vmatprep.subr.msk.bf16.mxu0 %vm7361_vm14, %v7362_v23  ;;  %v9123_v23 = vld [vmem:[%s12841_s5 + $0x88] sm:$0xff]  }
 0x313   :  { %v3497_v42 = vsel %vm13604_vm4, %v9080_v48, %v9065_v46  ;;  %vm7364_vm15 = vmpackc.low %vm13606_vm8, %vm13606_vm8 }
 0x314   :  { %vm13607_vm3 = vmmov %vm13604_vm4  ;;  %7341 = vmatmul.mubr.msk.bf16.vlgmr.msra.gmra.mrb[8].mxu0 %vm3034_vm5, %v11802_v11  ;;  %v7368_v26 = vpack.c.bf16 %v3497_v42, %v3496_v30  ;;  %7360 = vmatmul.mubr.msk.bf16.vlgmr.msra.gmra.mrb[8].mxu1 %vm3034_vm5, %v11802_v11  ;;  %v9125_v30 = vld [vmem:[%s12841_s5 + $0xd0] sm:$0xff]  }
 0x315   :  { %v3498_v51 = vsel %vm13607_vm3, %v9024_v49, %v9079_v62  ;;  %vm13608_vm13 = vmmov %vm13607_vm3  ;;  %v9083_v49 = vpop.permute.xlu1 %9082  ;;  %vm13617_vm3 = vnez %v13616_v13  ;;  %7366 = vmatpush1.bf16.msk.msra.mxu0 %vm7364_vm15, %v7365_v22  ;;  %vm13633_vm15 = vcmp.lt.s32.totalorder %v13531_v35, 15  ;;  %v13640_v35 = vld [vmem:[#allocation40_spill] sm:$0xff]  ;;  %v13644_v62 = vld [vmem:[#allocation41_spill] sm:$0xff]  ;;  %3735 = vmatprep.mubr.bf16.mxu0 %v13166_v58 }
 0x316   :  { %v3499_v50 = vsel %vm13608_vm13, %v9025_v63, %v9080_v48  ;;  %vm13609_vm12 = vmmov %vm13596_vm11  ;;  %v13612_v63 = vunpack.i.l.bf16 %v10885_v21  ;;  %v9085_v15 = vunpack.i.h.bf16 %v9083_v49  ;;  %v9084_v28 = vunpack.i.l.bf16 %v9083_v49  ;;  %3778 = vmatprep.mubr.bf16.mxu1 %v13166_v58  ;;  %v9117_v58 = vld [vmem:[%s12841_s5 + $0xc0] sm:$0xff]   ;;  %v9124_v22 = vld [vmem:[%s12841_s5 + $0x8] sm:$0xff]  }
 0x317   :  { %v3423_v19 = vsel %vm13609_vm12, %v9060_v43, %v9075_v29  ;;  %vm13611_vm9 = vmmov %vm13596_vm11  ;;  %vm13622_vm12 = vcmp.lt.s32.totalorder %v13513_v32, 15  ;;  %v7371_v32 = vpack.c.bf16 %v3499_v50, %v3498_v51  ;;  %v9126_v42 = vld [vmem:[%s12841_s5 + $0x50] sm:$0xff]   ;;  %v9129_v51 = vld [vmem:[%s12841_s5 + $0xd8] sm:$0xff]  }
 0x318   :  { %v3422_v12 = vsel %vm13611_vm9, %v9059_v39, %v9074_v53  ;;  %vm13613_vm4 = vmmov %vm13611_vm9  ;;  %v9095_v39 = vunpack.i.h.bf16 %v9093_v1  ;;  %vm13625_vm9 = vcmp.lt.s32.totalorder %v13518_v38, 15  ;;  %v9130_v50 = vld [vmem:[%s12841_s5 + $0x58] sm:$0xff]   ;;  %v9134_v49 = vld [vmem:[%s12841_s5 + $0x60] sm:$0xff]  }
 0x319   :  { %v3436_v27 = vsel %vm13613_vm4, %v9074_v53, %v13612_v63  ;;  %vm7380_vm10 = vmpackc.low %vm13615_vm7, %vm13615_vm7  ;;  %v7384_v43 = vpack.c.bf16 %v3423_v19, %v3422_v12  ;;  %vm13631_vm7 = vcmp.lt.s32.totalorder %v9532_v16, 111  ;;  %v9118_v53 = vld [vmem:[%s12841_s5 + $0x40] sm:$0xff]   ;;  %v9131_v19 = vld [vmem:[%s12841_s5 + $0x98] sm:$0xff]  }
 0x31a   :  { %v7381_v21 = vpack.c.bf16 %v3437_v18, %v3436_v27  ;;  %vm7383_vm1 = vmpackc.low %vm13617_vm3, %vm13617_vm3  ;;  %v3571_v40 = vsel %vm13631_vm7, %v9055_v10, %v9095_v39  ;;  %v9133_v18 = vld [vmem:[%s12841_s5 + $0xe0] sm:$0xff]   ;;  %v9137_v63 = vld [vmem:[%s12841_s5 + $0xe8] sm:$0xff]  }
 0x31b   :  { %vm13618_vm2 = vmmov %vm13608_vm13  ;;  %v9135_v1 = vld [vmem:[%s12841_s5 + $0xa0] sm:$0xff]   ;;  %v9138_v27 = vld [vmem:[%s12841_s5 + $0x68] sm:$0xff]  }
 0x31c   :  { %v3494_v55 = vsel %vm13618_vm2, %v9064_v2, %v9084_v28  ;;  %vm13619_vm13 = vmmov %vm13618_vm2  ;;  %7382 = vmatprep.subr.msk.bf16.mxu1 %vm7380_vm10, %v7381_v21  ;;  %v9100_v2 = vunpack.i.h.bf16 %v9098_v59  ;;  %v9136_v12 = vld [vmem:[%s12841_s5 + $0x20] sm:$0xff]   ;;  %v9142_v21 = vld [vmem:[%s12841_s5 + $0x70] sm:$0xff]  }
 0x31d   :  { %v3495_v7 = vsel %vm13619_vm13, %v9065_v46, %v9085_v15  ;;  %vm13620_vm0 = vmmov %vm13618_vm2  ;;  %vm13628_vm2 = vcmp.lt.s32.totalorder %v13523_v44, 15  ;;  %7385 = vmatpush1.bf16.msk.msra.mxu1 %vm7383_vm1, %v7384_v43  ;;  %v9099_v44 = vunpack.i.l.bf16 %v9098_v59  ;;  %v9143_v43 = vld [vmem:[%s12841_s5 + $0xb0] sm:$0xff]   ;;  %v9146_v13 = vld [vmem:[%s12841_s5 + $0x78] sm:$0xff]  }
 0x31e   :  { %v3508_v24 = vsel %vm13620_vm0, %v9084_v28, %v8999_v61  ;;  %vm13621_vm14 = vmmov %vm13620_vm0  ;;  %v9088_v61 = vpop.permute.xlu1 %9087  ;;  %v7390_v47 = vpack.c.bf16 %v3495_v7, %v3494_v55  ;;  %v9140_v28 = vld [vmem:[%s12841_s5 + $0x28] sm:$0xff]   ;;  %v9147_v55 = vld [vmem:[%s12841_s5 + $0xb8] sm:$0xff]  }
 0x31f   :  { %v3509_v56 = vsel %vm13621_vm14, %v9085_v15, %v9000_v54  ;;  %vm11865_vm11 = vmpackc.low %vm13622_vm12, %vm13622_vm12  ;;  %v9090_v46 = vunpack.i.h.bf16 %v9088_v61  ;;  %v9089_v38 = vunpack.i.l.bf16 %v9088_v61  ;;  %vm13641_vm12 = vnez %v13640_v35  ;;  %v9139_v15 = vld [vmem:[%s12841_s5 + $0xa8] sm:$0xff]   ;;  %v9148_v7 = vld [vmem:[%s12841_s5 + $0x38] sm:$0xff]  }
 0x320   :  { %v7387_v60 = vpack.c.bf16 %v3509_v56, %v3508_v24  ;;  %vm11874_vm4 = vmpackc.low %vm13625_vm9, %vm13625_vm9  ;;  %7369 = vmatprep.subr.msk.bf16.mxu0 %vm11865_vm11, %v7368_v26  ;;  %v9149_v24 = vld [vmem:[%s12841_s5 + $0x140] sm:$0xff]   ;;  %v3815_v26 = vpop.permute.xlu0 %3814 }
 0x321   :  { %vm11891_vm13 = vmpackc.low %vm13628_vm2, %vm13628_vm2  ;;  %v9150_v56 = vld [vmem:[%s12841_s5 + $0x1c0] sm:$0xff]  }
 0x322   :  { %vm13632_vm8 = vmmov %vm13631_vm7  ;;  %7388 = vmatprep.subr.msk.bf16.mxu1 %vm11874_vm4, %v7387_v60  ;;  %7372 = vmatpush1.bf16.msk.msra.mxu0 %vm11891_vm13, %v7371_v32  ;;  %v3810_v5 = vpop.permute.xlu1 %3809  ;;  %vm3964_vm13 = vcmask 1043459  }
 0x323   :  { %v3570_v0 = vsel %vm13632_vm8, %v9054_v41, %v9094_v25  ;;  %vm11913_vm10 = vmpackc.low %vm13633_vm15, %vm13633_vm15 }
 0x324   :  { %vm13636_vm0 = vmmov %vm13631_vm7  ;;  %vm13645_vm7 = vnez %v13644_v62  ;;  %7391 = vmatpush1.bf16.msk.msra.mxu1 %vm11913_vm10, %v7390_v47  ;;  %v7377_v16 = vpack.c.bf16 %v3571_v40, %v3570_v0  ;;  %vm7059_vm10 = vcmask 257024  }
 0x325   :  { %v3568_v4 = vsel %vm13636_vm0, %v9094_v25, %v9089_v38  ;;  %vm13637_vm14 = vmmov %vm13636_vm0  ;;  %v9145_v25 = vld [vmem:[%s12841_s5 + $0xf8] sm:$0xff]  }
 0x326   :  { %v3569_v41 = vsel %vm13637_vm14, %v9095_v39, %v9090_v46  ;;  %vm13638_vm3 = vmmov %vm13636_vm0  ;;  %v9144_v39 = vld [vmem:[%s12841_s5 + $0x30] sm:$0xff]  }
 0x327   :  { %v3567_v9 = vsel %vm13638_vm3, %v9090_v46, %v9100_v2  ;;  %vm13639_vm1 = vmmov %vm13636_vm0  ;;  %v7374_v31 = vpack.c.bf16 %v3569_v41, %v3568_v4 }
 0x328   :  { %v3581_v3 = vsel %vm13639_vm1, %v9100_v2, %v9045_v52  ;;  %vm7373_vm11 = vmpackc.low %vm13641_vm12, %vm13641_vm12 }
 0x329   :  { %vm13642_vm9 = vmmov %vm13636_vm0  ;;  %7375 = vmatprep.subr.msk.bf16.mxu0 %vm7373_vm11, %v7374_v31 }
 0x32a   :  { %v3566_v33 = vsel %vm13642_vm9, %v9089_v38, %v9099_v44  ;;  %vm13643_vm2 = vmmov %vm13636_vm0 }
 0x32b   :  { %v3580_v48 = vsel %vm13643_vm2, %v9099_v44, %v9044_v37  ;;  %vm7392_vm8 = vmpackc.low %vm13645_vm7, %vm13645_vm7  ;;  %v7396_v20 = vpack.c.bf16 %v3567_v9, %v3566_v33  ;;  %v13647_v37 = vld [vmem:[#allocation43_spill] sm:$0xff] }
 0x32c   :  { %v7393_v52 = vpack.c.bf16 %v3581_v3, %v3580_v48  ;;  %vm7376_vm4 = vmpackc.low %vm10419_vm6, %vm10419_vm6  ;;  %vm13648_vm15 = vnez %v13647_v37  ;;  %vm3958_vm6 = vcmask 1041409  }
 0x32d   :  { %vm7395_vm0 = vmpackc.low %vm13648_vm15, %vm13648_vm15  ;;  %7378 = vmatpush1.bf16.msk.msra.mxu0 %vm7376_vm4, %v7377_v16 }
 0x32e   :  { %7394 = vmatprep.subr.msk.bf16.mxu1 %vm7392_vm8, %v7393_v52  ;;  %8138 = vmatprep.subr.bf16.mxu0 %v9117_v58 }
 0x32f   :  { %7397 = vmatpush1.bf16.msk.msra.mxu1 %vm7395_vm0, %v7396_v20 }
 0x330   :  { %7379 = vmatmul.mubr.msk.bf16.vlgmr.msra.gmra.mrb[12].mxu0 %vm3034_vm5, %v11802_v11  ;;  %8160 = vmatprep.subr.bf16.mxu1 %v9118_v53 }
 0x331   :  { %8139 = vmatpush3.bf16.msra.mxu0 %v9119_v17 }
 0x332   :  { %7398 = vmatmul.mubr.msk.bf16.vlgmr.msra.gmra.mrb[12].mxu1 %vm3034_vm5, %v11802_v11  ;;  %8140 = vmatprep.subr.bf16.mxu0 %v9121_v57  ;;  %v9127_v11 = vld [vmem:[%s12841_s5 + $0x90] sm:$0xff]   ;;  %vm3961_vm5 = vcmask 1042434  }
 0x333   :  { %8161 = vmatpush3.bf16.msra.mxu1 %v9120_v36 }
 0x334   :  { %8162 = vmatprep.subr.bf16.mxu1 %v9122_v14 }
 0x335   :  { %8141 = vmatpush3.bf16.msra.mxu0 %v9123_v23 }
 0x336   :  { %8142 = vmatprep.subr.bf16.mxu0 %v9125_v30 }
 0x337   :  { %8163 = vmatpush3.bf16.msra.mxu1 %v9124_v22 }
 0x338   :  { %8164 = vmatprep.subr.bf16.mxu1 %v9126_v42 }
 0x339   :  { %8143 = vmatpush3.bf16.msra.mxu0 %v9127_v11 }
 0x33a   :  { %8144 = vmatprep.subr.bf16.mxu0 %v9129_v51 }
 0x33b   :  { %8165 = vmatpush3.bf16.msra.mxu1 %v9128_v45 }
 0x33c   :  { %8166 = vmatprep.subr.bf16.mxu1 %v9130_v50 }
 0x33d   :  { %8145 = vmatpush3.bf16.msra.mxu0 %v9131_v19 }
 0x33e   :  { %8146 = vmatprep.subr.bf16.mxu0 %v9133_v18 }
 0x33f   :  { %8167 = vmatpush3.bf16.msra.mxu1 %v9132_v6 }
 0x340   :  { %8168 = vmatprep.subr.bf16.mxu1 %v9134_v49 }
 0x341   :  { %8147 = vmatpush3.bf16.msra.mxu0 %v9135_v1 }
 0x342   :  { %8148 = vmatprep.subr.bf16.mxu0 %v9137_v63 }
 0x343   :  { %8169 = vmatpush3.bf16.msra.mxu1 %v9136_v12 }
 0x344   :  { %8170 = vmatprep.subr.bf16.mxu1 %v9138_v27 }
 0x345   :  { %8149 = vmatpush3.bf16.msra.mxu0 %v9139_v15 }
 0x346   :  { %8150 = vmatprep.subr.bf16.mxu0 %v9141_v8 }
 0x347   :  { %8171 = vmatpush3.bf16.msra.mxu1 %v9140_v28 }
 0x348   :  { %8172 = vmatprep.subr.bf16.mxu1 %v9142_v21 }
 0x349   :  { %8151 = vmatpush3.bf16.msra.mxu0 %v9143_v43 }
 0x34a   :  { %8152 = vmatprep.subr.bf16.mxu0 %v9145_v25 }
 0x34b   :  { %8173 = vmatpush3.bf16.msra.mxu1 %v9144_v39 }
 0x34c   :  { %8174 = vmatprep.subr.bf16.mxu1 %v9146_v13 }
 0x34d   :  { %8153 = vmatpush3.bf16.msra.mxu0 %v9147_v55 }
 0x34e   :  { %8182 = vmatprep.subr.bf16.mxu0 %v9149_v24 }
 0x34f   :  { %8175 = vmatpush3.bf16.msra.mxu1 %v9148_v7 }
 0x350   :  { %8204 = vmatprep.subr.bf16.mxu1 %v9150_v56 }
 0x3e7   :  { %v3651_v60 = vpop.f32.mrb[8].mxu0  ;;  %v3694_v59 = vpop.f32.mrb[8].mxu1 }
 0x3e8   :  { %v3817_v61 = vadd.f32 %v3810_v5, %v3651_v60  ;;  %v3653_v54 = vpop.f32.mrb[9].mxu0  ;;  %v3819_v32 = vadd.f32 %v3810_v5, %v3694_v59  ;;  %v3696_v38 = vpop.f32.mrb[9].mxu1 }
 0x3e9   :  { %v3818_v46 = vadd.f32 %v3810_v5, %v3653_v54  ;;  %v3655_v2 = vpop.f32.mrb[10].mxu0  ;;  %v3820_v34 = vadd.f32 %v3810_v5, %v3696_v38  ;;  %v3698_v40 = vpop.f32.mrb[10].mxu1 }
 0x3ea   :  { %v3825_v47 = vadd.f32 %v3815_v26, %v3655_v2  ;;  %v3657_v0 = vpop.f32.mrb[11].mxu0  ;;  %v3833_v44 = vmax.f32 %v3817_v61, 0.0  ;;  %v3835_v10 = vmax.f32 %v3819_v32, 0.0  ;;  %v3827_v4 = vadd.f32 %v3815_v26, %v3698_v40  ;;  %v3700_v9 = vpop.f32.mrb[11].mxu1 }
 0x3eb   :  { %v3826_v41 = vadd.f32 %v3815_v26, %v3657_v0  ;;  %v3834_v3 = vmax.f32 %v3818_v46, 0.0  ;;  %v3828_v31 = vadd.f32 %v3815_v26, %v3700_v9  ;;  %v3836_v62 = vmax.f32 %v3820_v34, 0.0 }
 0x3ec   :  { %v3841_v35 = vmax.f32 %v3825_v47, 0.0  ;;  %v3843_v33 = vmax.f32 %v3827_v4, 0.0 }
 0x3ed   :  { %v3842_v48 = vmax.f32 %v3826_v41, 0.0  ;;  %v3844_v29 = vmax.f32 %v3828_v31, 0.0 }
 0x3ee   :  { %v3849_v52 = vpack.c.bf16 %v3841_v35, %v3833_v44  ;;  %v3851_v20 = vpack.c.bf16 %v3843_v33, %v3835_v10 }
 0x3ef   :  { %v3850_v16 = vpack.c.bf16 %v3842_v48, %v3834_v3  ;;  %v3852_v37 = vpack.c.bf16 %v3844_v29, %v3836_v62 }
 0x3f0   :  { %3857 = vst [vmem:[#allocation3] sm:$0xff] %v3849_v52  ;;  %3860 = vst [vmem:[#allocation3 + $0x10] sm:$0xff] %v3851_v20 }
 0x3f1   :  { %3858 = vst [vmem:[#allocation3 + $0x8] sm:$0xff] %v3850_v16  ;;  %3861 = vst [vmem:[#allocation3 + $0x18] sm:$0xff] %v3852_v37 }
 0x3f7   :  { %v3868_v18 = vld [vmem:[#allocation3] sm:$0x1]  ;;  %v3870_v21 = vld [vmem:[#allocation3 + $0x10] sm:$0x1] }
 0x3f8   :  { %v3869_v27 = vld [vmem:[#allocation3 + $0x8] sm:$0x1]  ;;  %v3871_v8 = vld [vmem:[#allocation3 + $0x18] sm:$0x1]  ;;  %v3951_v60 = vunpack.c.l.b16 %v3870_v21  ;;  %v4265_v61 = vld [vmem:[#allocation3 + $0x8] sm:$0x2] }
 0x3f9   :  { %v3950_v7 = vunpack.c.l.b16 %v3869_v27  ;;  %v3952_v56 = vunpack.c.l.b16 %v3871_v8  ;;  %v4267_v59 = vld [vmem:[#allocation3 + $0x18] sm:$0x2]  ;;  %v4314_v54 = vunpack.c.l.b16 %v4265_v61 }
 0x3fa   :  { %v4316_v32 = vunpack.c.l.b16 %v4267_v59  ;;  %v4112_v2 = vrot.slane %v3951_v60, 7  ;;  %v9158_v59 = vld [vmem:[%s12841_s5 + $0x1d0] sm:$0xff]  }
 0x3fb   :  { %v4118_v46 = vrot.slane %v3952_v56, 7  ;;  %v4327_v40 = vrot.slane %v4314_v54, 2  ;;  %v4513_v44 = vrot.slane %v4314_v54, 3  ;;  %v9160_v54 = vld [vmem:[%s12841_s5 + $0x190] sm:$0xff]  }
 0x3fc   :  { %v4328_v0 = vrot.slane %v4316_v32, 1  ;;  %v4514_v20 = vrot.slane %v4316_v32, 2  ;;  %v9161_v32 = vld [vmem:[%s12841_s5 + $0x158] sm:$0xff]  }
 0x3fd   :  { %v4119_v4 = vsel %vm3958_vm6, %v4118_v46, %v3950_v7  ;;  %v9162_v46 = vld [vmem:[%s12841_s5 + $0x1d8] sm:$0xff]  }
 0x403   :  { %v3737_v58 = vpop.f32.mrb[12].mxu0 }
 0x404   :  { %v3821_v53 = vadd.f32 %v3810_v5, %v3737_v58  ;;  %v3739_v36 = vpop.f32.mrb[13].mxu0 }
 0x405   :  { %v3780_v17 = vpop.f32.mrb[12].mxu1  ;;  %v3822_v14 = vadd.f32 %v3810_v5, %v3739_v36  ;;  %v3741_v22 = vpop.f32.mrb[14].mxu0 }
 0x406   :  { %v3823_v57 = vadd.f32 %v3810_v5, %v3780_v17  ;;  %v3782_v23 = vpop.f32.mrb[13].mxu1  ;;  %v3829_v42 = vadd.f32 %v3815_v26, %v3741_v22  ;;  %v3743_v45 = vpop.f32.mrb[15].mxu0  ;;  %v3837_v51 = vmax.f32 %v3821_v53, 0.0 }
 0x407   :  { %v3824_v30 = vadd.f32 %v3810_v5, %v3782_v23  ;;  %v3784_v11 = vpop.f32.mrb[14].mxu1  ;;  %v3830_v19 = vadd.f32 %v3815_v26, %v3743_v45  ;;  %v3838_v1 = vmax.f32 %v3822_v14, 0.0  ;;  %v3949_v5 = vunpack.c.l.b16 %v3868_v18  ;;  %v9151_v18 = vld [vmem:[%s12841_s5 + $0x100] sm:$0xff]  }
 0x408   :  { %v3831_v50 = vadd.f32 %v3815_v26, %v3784_v11  ;;  %v3786_v6 = vpop.f32.mrb[15].mxu1  ;;  %v3839_v49 = vmax.f32 %v3823_v57, 0.0  ;;  %v3845_v12 = vmax.f32 %v3829_v42, 0.0 }
 0x409   :  { %v3832_v63 = vadd.f32 %v3815_v26, %v3786_v6  ;;  %v3846_v28 = vmax.f32 %v3830_v19, 0.0  ;;  %v3840_v43 = vmax.f32 %v3824_v30, 0.0  ;;  %v3966_v26 = vrot.slane %v3950_v7, 1 }
 0x40a   :  { %v3847_v15 = vmax.f32 %v3831_v50, 0.0  ;;  %v3853_v39 = vpack.c.bf16 %v3845_v12, %v3837_v51  ;;  %v3957_v38 = vrot.slane %v3949_v5, 1  ;;  %v4113_v35 = vsel %vm3958_vm6, %v4112_v2, %v3949_v5  ;;  %v9156_v5 = vld [vmem:[%s12841_s5 + $0x188] sm:$0xff]   ;;  %v4264_v2 = vld [vmem:[#allocation3] sm:$0x2] }
 0x40b   :  { %v3848_v25 = vmax.f32 %v3832_v63, 0.0  ;;  %v3854_v55 = vpack.c.bf16 %v3846_v28, %v3838_v1  ;;  %v3967_v34 = vsel %vm3958_vm6, %v3952_v56, %v3966_v26  ;;  %v9152_v63 = vld [vmem:[%s12841_s5 + $0x180] sm:$0xff]   ;;  %v9159_v26 = vld [vmem:[%s12841_s5 + $0x110] sm:$0xff]  }
 0x40c   :  { %v3855_v13 = vpack.c.bf16 %v3847_v15, %v3839_v49  ;;  %3863 = vst [vmem:[#allocation3 + $0x20] sm:$0xff] %v3853_v39  ;;  %v3959_v3 = vsel %vm3958_vm6, %v3951_v60, %v3957_v38  ;;  %v4329_v49 = vsel %vm3958_vm6, %v4328_v0, %v4327_v40  ;;  %v9154_v39 = vld [vmem:[%s12841_s5 + $0x1c8] sm:$0xff]   ;;  %v9157_v60 = vld [vmem:[%s12841_s5 + $0x150] sm:$0xff]   ;;  %v9163_v38 = vld [vmem:[%s12841_s5 + $0x118] sm:$0xff]  }
 0x40d   :  { %v3856_v24 = vpack.c.bf16 %v3848_v25, %v3840_v43  ;;  %3864 = vst [vmem:[#allocation3 + $0x28] sm:$0xff] %v3854_v55  ;;  %v9153_v43 = vld [vmem:[%s12841_s5 + $0x148] sm:$0xff]   ;;  %v9166_v40 = vld [vmem:[%s12841_s5 + $0x1e0] sm:$0xff]   ;;  %v4266_v0 = vld [vmem:[#allocation3 + $0x10] sm:$0x2] }
 0x40e   :  { %3866 = vst [vmem:[#allocation3 + $0x30] sm:$0xff] %v3855_v13  ;;  %v4515_v13 = vsel %vm3958_vm6, %v4514_v20, %v4513_v44  ;;  %v9167_v44 = vld [vmem:[%s12841_s5 + $0x120] sm:$0xff]  }
 0x40f   :  { %3867 = vst [vmem:[#allocation3 + $0x38] sm:$0xff] %v3856_v24  ;;  %v9155_v24 = vld [vmem:[%s12841_s5 + $0x108] sm:$0xff]  }
 0x413   :  { %v3872_v47 = vld [vmem:[#allocation3 + $0x20] sm:$0x1] }
 0x414   :  { %v3873_v10 = vld [vmem:[#allocation3 + $0x28] sm:$0x1]  ;;  %v3953_v9 = vunpack.c.l.b16 %v3872_v47  ;;  %v4269_v31 = vld [vmem:[#allocation3 + $0x28] sm:$0x2]  ;;  %v9165_v47 = vld [vmem:[%s12841_s5 + $0x160] sm:$0xff]  }
 0x415   :  { %v3874_v41 = vld [vmem:[#allocation3 + $0x30] sm:$0x1]  ;;  %v3954_v48 = vunpack.c.l.b16 %v3873_v10  ;;  %v4318_v29 = vunpack.c.l.b16 %v4269_v31  ;;  %v9168_v10 = vld [vmem:[%s12841_s5 + $0x1a0] sm:$0xff]  }
 0x416   :  { %v3875_v33 = vld [vmem:[#allocation3 + $0x38] sm:$0x1]  ;;  %v3955_v62 = vunpack.c.l.b16 %v3874_v41  ;;  %v4271_v52 = vld [vmem:[#allocation3 + $0x38] sm:$0x2]  ;;  %v3960_v37 = vrot.slane %v3953_v9, 7  ;;  %v4114_v58 = vrot.slane %v3953_v9, 6 }
 0x417   :  { %v3956_v16 = vunpack.c.l.b16 %v3875_v33  ;;  %v4320_v53 = vunpack.c.l.b16 %v4271_v52  ;;  %v3968_v17 = vrot.slane %v3954_v48, 7  ;;  %v4120_v36 = vrot.slane %v3954_v48, 6  ;;  %v4661_v41 = vld [vmem:[#allocation3 + $0x8] sm:$0x4]  ;;  %v4268_v31 = vld [vmem:[#allocation3 + $0x20] sm:$0x2] }
 0x418   :  { %v3963_v57 = vrot.slane %v3955_v62, 6  ;;  %v4116_v14 = vrot.slane %v3955_v62, 5  ;;  %v3962_v30 = vsel %vm3961_vm5, %v3960_v37, %v3959_v3  ;;  %v4115_v42 = vsel %vm3961_vm5, %v4114_v58, %v4113_v35  ;;  %v9169_v9 = vld [vmem:[%s12841_s5 + $0x168] sm:$0xff]   ;;  %v4663_v35 = vld [vmem:[#allocation3 + $0x18] sm:$0x4]  ;;  %v9173_v37 = vld [vmem:[%s12841_s5 + $0x170] sm:$0xff]  }
 0x419   :  { %v3970_v23 = vrot.slane %v3956_v16, 6  ;;  %v4122_v22 = vrot.slane %v3956_v16, 5  ;;  %v3969_v11 = vsel %vm3961_vm5, %v3968_v17, %v3967_v34  ;;  %v4121_v45 = vsel %vm3961_vm5, %v4120_v36, %v4119_v4  ;;  %v9164_v34 = vld [vmem:[%s12841_s5 + $0x198] sm:$0xff]   ;;  %v9170_v3 = vld [vmem:[%s12841_s5 + $0x1e8] sm:$0xff]   ;;  %v9174_v58 = vld [vmem:[%s12841_s5 + $0x1f0] sm:$0xff]  }
 0x41a   :  { %v3965_v51 = vsel %vm3964_vm13, %v3963_v57, %v3962_v30  ;;  %v4117_v50 = vsel %vm3964_vm13, %v4116_v14, %v4115_v42  ;;  %v4330_v27 = vsel %vm3961_vm5, %v4318_v29, %v4329_v49  ;;  %v4331_v15 = vrot.slane %v4320_v53, 7  ;;  %v4665_v48 = vld [vmem:[#allocation3 + $0x28] sm:$0x4]  ;;  %v4667_v36 = vld [vmem:[#allocation3 + $0x38] sm:$0x4]  ;;  %v9176_v30 = vld [vmem:[%s12841_s5 + $0x1b0] sm:$0xff]  }
 0x41b   :  { %v3971_v19 = vsel %vm3964_vm13, %v3970_v23, %v3969_v11  ;;  %v4123_v6 = vsel %vm3964_vm13, %v4122_v22, %v4121_v45  ;;  %v3972_v28 = vpack.c.b16 %v3965_v51, %v3965_v51  ;;  %v4124_v8 = vpack.c.b16 %v4117_v50, %v4117_v50  ;;  %v9171_v62 = vld [vmem:[%s12841_s5 + $0x128] sm:$0xff]   ;;  %v9175_v22 = vld [vmem:[%s12841_s5 + $0x130] sm:$0xff]   ;;  %v9177_v50 = vld [vmem:[%s12841_s5 + $0x178] sm:$0xff]  }
 0x41c   :  { %v3973_v1 = vpack.c.b16 %v3971_v19, %v3971_v19  ;;  %v4125_v12 = vpack.c.b16 %v4123_v6, %v4123_v6  ;;  %v4516_v21 = vrot.slane %v4318_v29, 1  ;;  %v4332_v25 = vsel %vm3964_vm13, %v4331_v15, %v4330_v27  ;;  %v9172_v52 = vld [vmem:[%s12841_s5 + $0x1a8] sm:$0xff]  }
 0x41d   :  { %v4334_v55 = vpack.c.b16 %v4332_v25, %v4332_v25  ;;  %v4313_v4 = vunpack.c.l.b16 %v4264_v2  ;;  %v4315_v33 = vunpack.c.l.b16 %v4266_v0  ;;  %v4710_v20 = vunpack.c.l.b16 %v4661_v41  ;;  %v9184_v2 = vld [vmem:[%s12841_s5 + $0x280] sm:$0xff]   ;;  %v9190_v41 = vld [vmem:[%s12841_s5 + $0x2d0] sm:$0xff]  }
 0x41e   :  { %4104 = vmatprep.mubr.bf16.mxu0 %v3973_v1  ;;  %4256 = vmatprep.mubr.bf16.mxu1 %v4125_v12  ;;  %v4517_v7 = vsel %vm3961_vm5, %v4516_v21, %v4515_v13  ;;  %v4712_v16 = vunpack.c.l.b16 %v4663_v35  ;;  %v4317_v17 = vunpack.c.l.b16 %v4268_v31  ;;  %v4714_v57 = vunpack.c.l.b16 %v4665_v48  ;;  %v9178_v12 = vld [vmem:[%s12841_s5 + $0x1f8] sm:$0xff]  }
 0x41f   :  { %4105 = vmatmul.mubr.bf16.vlgmr.msra.gmra.mrb[16].mxu0 %v3972_v28  ;;  %4257 = vmatmul.mubr.bf16.vlgmr.msra.gmra.mrb[16].mxu1 %v4124_v8  ;;  %v4518_v56 = vsel %vm3964_vm13, %v4320_v53, %v4517_v7  ;;  %v4321_v29 = vrot.slane %v4313_v4, 2  ;;  %v4270_v53 = vld [vmem:[#allocation3 + $0x30] sm:$0x2]  ;;  %v4322_v14 = vrot.slane %v4315_v33, 1  ;;  %v4507_v23 = vrot.slane %v4313_v4, 3  ;;  %v9179_v8 = vld [vmem:[%s12841_s5 + $0x138] sm:$0xff]  }
 0x420   :  { %8183 = vmatpush3.bf16.msra.mxu0 %v9151_v18  ;;  %8205 = vmatpush3.bf16.msra.mxu1 %v9152_v63  ;;  %v4520_v61 = vpack.c.b16 %v4518_v56, %v4518_v56  ;;  %v4319_v42 = vunpack.c.l.b16 %v4270_v53  ;;  %v4508_v11 = vrot.slane %v4315_v33, 2  ;;  %v4724_v45 = vrot.slane %v4710_v20, 4  ;;  %v9180_v13 = vld [vmem:[%s12841_s5 + $0x1b8] sm:$0xff]   ;;  %v9181_v56 = vld [vmem:[%s12841_s5 + $0x240] sm:$0xff]   ;;  %v9189_v4 = vld [vmem:[%s12841_s5 + $0x250] sm:$0xff]  }
 0x421   :  { %4465 = vmatprep.mubr.bf16.mxu0 %v4334_v55  ;;  %8184 = vmatprep.subr.bf16.mxu0 %v9153_v43  ;;  %v4725_v51 = vrot.slane %v4712_v16, 3  ;;  %v4510_v19 = vrot.slane %v4317_v17, 1  ;;  %v4716_v6 = vunpack.c.l.b16 %v4667_v36  ;;  %v4912_v18 = vrot.slane %v4710_v20, 5  ;;  %v9193_v35 = vld [vmem:[%s12841_s5 + $0x258] sm:$0xff]   ;;  %v4662_v20 = vld [vmem:[#allocation3 + $0x10] sm:$0x4] }
 0x422   :  { %8206 = vmatprep.subr.bf16.mxu1 %v9154_v39  ;;  %4651 = vmatprep.mubr.bf16.mxu1 %v4520_v61  ;;  %v4727_v49 = vrot.slane %v4714_v57, 2  ;;  %v4913_v1 = vrot.slane %v4712_v16, 4  ;;  %v4915_v63 = vrot.slane %v4714_v57, 3  ;;  %v4323_v27 = vsel %vm3958_vm6, %v4322_v14, %v4321_v29  ;;  %v9194_v31 = vld [vmem:[%s12841_s5 + $0x2d8] sm:$0xff]   ;;  %v4660_v29 = vld [vmem:[#allocation3] sm:$0x4] }
 0x423   :  { %v4325_v15 = vrot.slane %v4319_v42, 7  ;;  %v4509_v28 = vsel %vm3958_vm6, %v4508_v11, %v4507_v23  ;;  %v4324_v21 = vsel %vm3961_vm5, %v4317_v17, %v4323_v27  ;;  %v4726_v39 = vsel %vm3958_vm6, %v4725_v51, %v4724_v45  ;;  %v9195_v33 = vld [vmem:[%s12841_s5 + $0x218] sm:$0xff]   ;;  %v9199_v16 = vld [vmem:[%s12841_s5 + $0x220] sm:$0xff]   ;;  %v9201_v53 = vld [vmem:[%s12841_s5 + $0x268] sm:$0xff]  }
 0x424   :  { %8185 = vmatpush3.bf16.msra.mxu0 %v9155_v24  ;;  %8207 = vmatpush3.bf16.msra.mxu1 %v9156_v5  ;;  %v4511_v43 = vsel %vm3961_vm5, %v4510_v19, %v4509_v28  ;;  %v4729_v25 = vrot.slane %v4716_v6, 1  ;;  %v4728_v55 = vsel %vm3961_vm5, %v4727_v49, %v4726_v39  ;;  %v4914_v7 = vsel %vm3958_vm6, %v4913_v1, %v4912_v18  ;;  %v9182_v5 = vld [vmem:[%s12841_s5 + $0x2c0] sm:$0xff]   ;;  %v9196_v48 = vld [vmem:[%s12841_s5 + $0x298] sm:$0xff]   ;;  %v5061_v17 = vld [vmem:[#allocation3 + $0x8] sm:$0x8] }
 0x425   :  { %8186 = vmatprep.subr.bf16.mxu0 %v9157_v60  ;;  %8208 = vmatprep.subr.bf16.mxu1 %v9158_v59  ;;  %v4917_v24 = vrot.slane %v4716_v6, 2  ;;  %v4916_v60 = vsel %vm3961_vm5, %v4915_v63, %v4914_v7  ;;  %v4326_v61 = vsel %vm3964_vm13, %v4325_v15, %v4324_v21  ;;  %v4512_v59 = vsel %vm3964_vm13, %v4319_v42, %v4511_v43  ;;  %v9202_v36 = vld [vmem:[%s12841_s5 + $0x2e8] sm:$0xff]   ;;  %v5063_v14 = vld [vmem:[#allocation3 + $0x18] sm:$0x8]  ;;  %v4666_v11 = vld [vmem:[#allocation3 + $0x30] sm:$0x4] }
 0x426   :  { %v4709_v57 = vunpack.c.l.b16 %v4660_v29  ;;  %v4711_v23 = vunpack.c.l.b16 %v4662_v20  ;;  %v9203_v42 = vld [vmem:[%s12841_s5 + $0x228] sm:$0xff]   ;;  %v9205_v51 = vld [vmem:[%s12841_s5 + $0x270] sm:$0xff]   ;;  %v5110_v19 = vunpack.c.l.b16 %v5061_v17  ;;  %v5112_v49 = vunpack.c.l.b16 %v5063_v14  ;;  %v9209_v43 = vld [vmem:[%s12841_s5 + $0x278] sm:$0xff]  }
 0x427   :  { %v9204_v45 = vld [vmem:[%s12841_s5 + $0x2a8] sm:$0xff]   ;;  %v9206_v6 = vld [vmem:[%s12841_s5 + $0x2f0] sm:$0xff]   ;;  %v4715_v15 = vunpack.c.l.b16 %v4666_v11  ;;  %v9229_v11 = vld [vmem:[%s12841_s5 + $0x360] sm:$0xff]  }
 0x428   :  { %8187 = vmatpush3.bf16.msra.mxu0 %v9159_v26  ;;  %8209 = vmatpush3.bf16.msra.mxu1 %v9160_v54  ;;  %v4730_v26 = vsel %vm3964_vm13, %v4729_v25, %v4728_v55  ;;  %v9183_v54 = vld [vmem:[%s12841_s5 + $0x200] sm:$0xff]   ;;  %v4717_v18 = vrot.slane %v4709_v57, 4  ;;  %v9207_v27 = vld [vmem:[%s12841_s5 + $0x230] sm:$0xff]   ;;  %v4905_v28 = vrot.slane %v4709_v57, 5  ;;  %v5124_v25 = vrot.slane %v5110_v19, 6  ;;  %v9217_v29 = vld [vmem:[%s12841_s5 + $0x348] sm:$0xff]  }
 0x429   :  { %8188 = vmatprep.subr.bf16.mxu0 %v9161_v32  ;;  %8210 = vmatprep.subr.bf16.mxu1 %v9162_v46  ;;  %v4918_v32 = vsel %vm3964_vm13, %v4917_v24, %v4916_v60  ;;  %v4333_v46 = vpack.c.b16 %v4326_v61, %v4326_v61  ;;  %v9208_v21 = vld [vmem:[%s12841_s5 + $0x2b0] sm:$0xff]   ;;  %v5125_v7 = vrot.slane %v5112_v49, 5  ;;  %v4722_v61 = vrot.slane %v4715_v15, 1 }
 0x42a   :  { %v4920_v0 = vpack.c.b16 %v4918_v32, %v4918_v32  ;;  %v9221_v17 = vld [vmem:[%s12841_s5 + $0x350] sm:$0xff]  }
 0x42b   :  { %v9223_v57 = vld [vmem:[%s12841_s5 + $0x310] sm:$0xff]  }
 0x42c   :  { %8189 = vmatpush3.bf16.msra.mxu0 %v9163_v38  ;;  %8211 = vmatpush3.bf16.msra.mxu1 %v9164_v34  ;;  %v4519_v38 = vpack.c.b16 %v4512_v59, %v4512_v59  ;;  %v4732_v34 = vpack.c.b16 %v4730_v26, %v4730_v26  ;;  %v9211_v26 = vld [vmem:[%s12841_s5 + $0x238] sm:$0xff]   ;;  %v9224_v14 = vld [vmem:[%s12841_s5 + $0x390] sm:$0xff]  }
 0x42d   :  { %8190 = vmatprep.subr.bf16.mxu0 %v9165_v47  ;;  %8212 = vmatprep.subr.bf16.mxu1 %v9166_v40  ;;  %v9185_v47 = vld [vmem:[%s12841_s5 + $0x248] sm:$0xff]  }
 0x42e   :  { %v9186_v40 = vld [vmem:[%s12841_s5 + $0x2c8] sm:$0xff]  }
 0x430   :  { %8191 = vmatpush3.bf16.msra.mxu0 %v9167_v44  ;;  %8213 = vmatpush3.bf16.msra.mxu1 %v9168_v10  ;;  %v9187_v44 = vld [vmem:[%s12841_s5 + $0x208] sm:$0xff]  }
 0x431   :  { %8192 = vmatprep.subr.bf16.mxu0 %v9169_v9  ;;  %8214 = vmatprep.subr.bf16.mxu1 %v9170_v3  ;;  %v9188_v10 = vld [vmem:[%s12841_s5 + $0x288] sm:$0xff]   ;;  %v9191_v9 = vld [vmem:[%s12841_s5 + $0x210] sm:$0xff]  }
 0x432   :  { %v9192_v3 = vld [vmem:[%s12841_s5 + $0x290] sm:$0xff]  }
 0x434   :  { %8193 = vmatpush3.bf16.msra.mxu0 %v9171_v62  ;;  %8215 = vmatpush3.bf16.msra.mxu1 %v9172_v52  ;;  %v9197_v62 = vld [vmem:[%s12841_s5 + $0x260] sm:$0xff]  }
 0x435   :  { %8194 = vmatprep.subr.bf16.mxu0 %v9173_v37  ;;  %8216 = vmatprep.subr.bf16.mxu1 %v9174_v58  ;;  %v9198_v52 = vld [vmem:[%s12841_s5 + $0x2e0] sm:$0xff]  }
 0x436   :  { %v4664_v37 = vld [vmem:[#allocation3 + $0x20] sm:$0x4] }
 0x437   :  { %v9200_v58 = vld [vmem:[%s12841_s5 + $0x2a0] sm:$0xff]  }
 0x438   :  { %8195 = vmatpush3.bf16.msra.mxu0 %v9175_v22  ;;  %8217 = vmatpush3.bf16.msra.mxu1 %v9176_v30  ;;  %v4713_v22 = vunpack.c.l.b16 %v4664_v37  ;;  %v5065_v30 = vld [vmem:[#allocation3 + $0x28] sm:$0x8] }
 0x439   :  { %8196 = vmatprep.subr.bf16.mxu0 %v9177_v50  ;;  %8218 = vmatprep.subr.bf16.mxu1 %v9178_v12  ;;  %v5067_v50 = vld [vmem:[#allocation3 + $0x38] sm:$0x8]  ;;  %v5114_v1 = vunpack.c.l.b16 %v5065_v30  ;;  %v4718_v12 = vrot.slane %v4711_v23, 3 }
 0x43a   :  { %v4720_v63 = vrot.slane %v4713_v22, 2  ;;  %v4908_v39 = vrot.slane %v4713_v22, 3  ;;  %v5116_v55 = vunpack.c.l.b16 %v5067_v50  ;;  %v9226_v22 = vld [vmem:[%s12841_s5 + $0x3d8] sm:$0xff]   ;;  %v9231_v50 = vld [vmem:[%s12841_s5 + $0x320] sm:$0xff]  }
 0x43b   :  { %v5127_v24 = vrot.slane %v5114_v1, 4  ;;  %v4719_v60 = vsel %vm3958_vm6, %v4718_v12, %v4717_v18  ;;  %v5315_v59 = vrot.slane %v5114_v1, 5  ;;  %v9227_v30 = vld [vmem:[%s12841_s5 + $0x318] sm:$0xff]   ;;  %v9233_v18 = vld [vmem:[%s12841_s5 + $0x368] sm:$0xff]  }
 0x43c   :  { %8197 = vmatpush3.bf16.msra.mxu0 %v9179_v8  ;;  %8219 = vmatpush3.bf16.msra.mxu1 %v9180_v13  ;;  %v4906_v8 = vrot.slane %v4711_v23, 4  ;;  %v9210_v13 = vld [vmem:[%s12841_s5 + $0x2f8] sm:$0xff]   ;;  %v9234_v1 = vld [vmem:[%s12841_s5 + $0x3e8] sm:$0xff]  }
 0x43d   :  { %8226 = vmatprep.subr.bf16.mxu0 %v9181_v56  ;;  %8248 = vmatprep.subr.bf16.mxu1 %v9182_v5  ;;  %v5312_v56 = vrot.slane %v5110_v19, 7  ;;  %v5313_v5 = vrot.slane %v5112_v49, 6  ;;  %v9225_v23 = vld [vmem:[%s12841_s5 + $0x358] sm:$0xff]   ;;  %v5062_v19 = vld [vmem:[#allocation3 + $0x10] sm:$0x8] }
 0x43e   :  { %v4907_v32 = vsel %vm3958_vm6, %v4906_v8, %v4905_v28  ;;  %v5064_v49 = vld [vmem:[#allocation3 + $0x20] sm:$0x8]  ;;  %v5461_v12 = vld [vmem:[#allocation3 + $0x8] sm:$0x10]  ;;  %v5111_v28 = vunpack.c.l.b16 %v5062_v19 }
 0x43f   :  { %4466 = vmatmul.mubr.bf16.vlgmr.msra.gmra.mrb[20].mxu0 %v4333_v46  ;;  %4652 = vmatmul.mubr.bf16.vlgmr.msra.gmra.mrb[20].mxu1 %v4519_v38  ;;  %v4910_v46 = vrot.slane %v4715_v15, 2  ;;  %v9212_v38 = vld [vmem:[%s12841_s5 + $0x2b8] sm:$0xff]   ;;  %v9235_v15 = vld [vmem:[%s12841_s5 + $0x328] sm:$0xff]   ;;  %v5113_v8 = vunpack.c.l.b16 %v5064_v49  ;;  %v9254_v49 = vld [vmem:[%s12841_s5 + $0x4d0] sm:$0xff]  }
 0x440   :  { %8227 = vmatpush3.bf16.msra.mxu0 %v9183_v54  ;;  %4863 = vmatprep.mubr.bf16.mxu0 %v4732_v34  ;;  %v4721_v54 = vsel %vm3961_vm5, %v4720_v63, %v4719_v60  ;;  %v5126_v34 = vsel %vm3958_vm6, %v5125_v7, %v5124_v25  ;;  %v5066_v25 = vld [vmem:[#allocation3 + $0x30] sm:$0x8]  ;;  %v9251_v19 = vld [vmem:[%s12841_s5 + $0x408] sm:$0xff]  }
 0x441   :  { %8249 = vmatpush3.bf16.msra.mxu1 %v9184_v2  ;;  %5051 = vmatprep.mubr.bf16.mxu1 %v4920_v0  ;;  %v4909_v2 = vsel %vm3961_vm5, %v4908_v39, %v4907_v32  ;;  %v5128_v0 = vsel %vm3961_vm5, %v5127_v24, %v5126_v34  ;;  %v9237_v39 = vld [vmem:[%s12841_s5 + $0x370] sm:$0xff]   ;;  %v9241_v32 = vld [vmem:[%s12841_s5 + $0x378] sm:$0xff]   ;;  %v5308_v34 = vrot.slane %v5113_v8, 5 }
 0x442   :  { %8228 = vmatprep.subr.bf16.mxu0 %v9185_v47  ;;  %8250 = vmatprep.subr.bf16.mxu1 %v9186_v40  ;;  %v5129_v47 = vrot.slane %v5116_v55, 3  ;;  %v9213_v40 = vld [vmem:[%s12841_s5 + $0x340] sm:$0xff]   ;;  %v9238_v7 = vld [vmem:[%s12841_s5 + $0x3f0] sm:$0xff]  }
 0x443   :  { %v9239_v60 = vld [vmem:[%s12841_s5 + $0x330] sm:$0xff]  }
 0x444   :  { %8229 = vmatpush3.bf16.msra.mxu0 %v9187_v44  ;;  %v5314_v44 = vsel %vm3958_vm6, %v5313_v5, %v5312_v56  ;;  %v5510_v56 = vunpack.c.h.b16 %v5461_v12  ;;  %v9256_v12 = vld [vmem:[%s12841_s5 + $0x490] sm:$0xff]  }
 0x445   :  { %8251 = vmatpush3.bf16.msra.mxu1 %v9188_v10  ;;  %8230 = vmatprep.subr.bf16.mxu0 %v9189_v4  ;;  %v5317_v10 = vrot.slane %v5116_v55, 4  ;;  %v4723_v4 = vsel %vm3964_vm13, %v4722_v61, %v4721_v54  ;;  %v5115_v61 = vunpack.c.l.b16 %v5066_v25  ;;  %v9240_v54 = vld [vmem:[%s12841_s5 + $0x3b0] sm:$0xff]   ;;  %v9264_v25 = vld [vmem:[%s12841_s5 + $0x4a0] sm:$0xff]  }
 0x446   :  { %8252 = vmatprep.subr.bf16.mxu1 %v9190_v41  ;;  %v9214_v41 = vld [vmem:[%s12841_s5 + $0x3c0] sm:$0xff]  }
 0x448   :  { %8231 = vmatpush3.bf16.msra.mxu0 %v9191_v9  ;;  %v5316_v9 = vsel %vm3961_vm5, %v5315_v59, %v5314_v44  ;;  %v5118_v59 = vrot.slane %v5111_v28, 5  ;;  %v5709_v44 = vrot.slane %v5510_v56, 1 }
 0x449   :  { %8253 = vmatpush3.bf16.msra.mxu1 %v9192_v3  ;;  %8232 = vmatprep.subr.bf16.mxu0 %v9193_v35  ;;  %v4911_v3 = vsel %vm3964_vm13, %v4910_v46, %v4909_v2  ;;  %v9215_v35 = vld [vmem:[%s12841_s5 + $0x300] sm:$0xff]   ;;  %v9242_v2 = vld [vmem:[%s12841_s5 + $0x3f8] sm:$0xff]  }
 0x44a   :  { %8254 = vmatprep.subr.bf16.mxu1 %v9194_v31  ;;  %v5130_v31 = vsel %vm3964_vm13, %v5129_v47, %v5128_v0 }
 0x44b   :  { %v5132_v20 = vpack.c.b16 %v5130_v31, %v5130_v31  ;;  %v5310_v31 = vrot.slane %v5115_v61, 4 }
 0x44c   :  { %8233 = vmatpush3.bf16.msra.mxu0 %v9195_v33  ;;  %v4731_v33 = vpack.c.b16 %v4723_v4, %v4723_v4  ;;  %v5122_v4 = vrot.slane %v5115_v61, 3  ;;  %v5466_v61 = vld [vmem:[#allocation3 + $0x30] sm:$0x10] }
 0x44d   :  { %8255 = vmatpush3.bf16.msra.mxu1 %v9196_v48  ;;  %8234 = vmatprep.subr.bf16.mxu0 %v9197_v62  ;;  %v9216_v48 = vld [vmem:[%s12841_s5 + $0x380] sm:$0xff]   ;;  %v5318_v62 = vsel %vm3964_vm13, %v5317_v10, %v5316_v9  ;;  %v9243_v9 = vld [vmem:[%s12841_s5 + $0x338] sm:$0xff]  }
 0x44e   :  { %8256 = vmatprep.subr.bf16.mxu1 %v9198_v52  ;;  %v4919_v52 = vpack.c.b16 %v4911_v3, %v4911_v3  ;;  %v5320_v37 = vpack.c.b16 %v5318_v62, %v5318_v62 }
 0x450   :  { %8235 = vmatpush3.bf16.msra.mxu0 %v9199_v16  ;;  %v9218_v16 = vld [vmem:[%s12841_s5 + $0x3c8] sm:$0xff]  }
 0x451   :  { %8257 = vmatpush3.bf16.msra.mxu1 %v9200_v58  ;;  %8236 = vmatprep.subr.bf16.mxu0 %v9201_v53  ;;  %v9219_v58 = vld [vmem:[%s12841_s5 + $0x308] sm:$0xff]  }
 0x452   :  { %8258 = vmatprep.subr.bf16.mxu1 %v9202_v36  ;;  %v9220_v53 = vld [vmem:[%s12841_s5 + $0x388] sm:$0xff]   ;;  %v9222_v36 = vld [vmem:[%s12841_s5 + $0x3d0] sm:$0xff]  }
 0x454   :  { %8237 = vmatpush3.bf16.msra.mxu0 %v9203_v42  ;;  %v9228_v42 = vld [vmem:[%s12841_s5 + $0x398] sm:$0xff]  }
 0x455   :  { %8259 = vmatpush3.bf16.msra.mxu1 %v9204_v45  ;;  %8238 = vmatprep.subr.bf16.mxu0 %v9205_v51  ;;  %v9230_v45 = vld [vmem:[%s12841_s5 + $0x3e0] sm:$0xff]  }
 0x456   :  { %8260 = vmatprep.subr.bf16.mxu1 %v9206_v6  ;;  %v5060_v51 = vld [vmem:[#allocation3] sm:$0x8] }
 0x457   :  { %v9232_v6 = vld [vmem:[%s12841_s5 + $0x3a0] sm:$0xff]   ;;  %v5109_v63 = vunpack.c.l.b16 %v5060_v51  ;;  %v9250_v51 = vld [vmem:[%s12841_s5 + $0x4c8] sm:$0xff]  }
 0x458   :  { %8239 = vmatpush3.bf16.msra.mxu0 %v9207_v27  ;;  %v5463_v27 = vld [vmem:[#allocation3 + $0x18] sm:$0x10] }
 0x459   :  { %8261 = vmatpush3.bf16.msra.mxu1 %v9208_v21  ;;  %8240 = vmatprep.subr.bf16.mxu0 %v9209_v43  ;;  %v5465_v21 = vld [vmem:[#allocation3 + $0x28] sm:$0x10]  ;;  %v5512_v55 = vunpack.c.h.b16 %v5463_v27  ;;  %v5117_v24 = vrot.slane %v5109_v63, 6  ;;  %v5305_v46 = vrot.slane %v5109_v63, 7  ;;  %v9257_v63 = vld [vmem:[%s12841_s5 + $0x458] sm:$0xff]  }
 0x45a   :  { %8262 = vmatprep.subr.bf16.mxu1 %v9210_v13  ;;  %v9236_v43 = vld [vmem:[%s12841_s5 + $0x3a8] sm:$0xff]   ;;  %v5467_v13 = vld [vmem:[#allocation3 + $0x38] sm:$0x10]  ;;  %v5514_v5 = vunpack.c.h.b16 %v5465_v21  ;;  %v9262_v21 = vld [vmem:[%s12841_s5 + $0x4e0] sm:$0xff]  }
 0x45b   :  { %v5516_v47 = vunpack.c.h.b16 %v5467_v13  ;;  %v5119_v10 = vsel %vm3958_vm6, %v5118_v59, %v5117_v24  ;;  %v9258_v27 = vld [vmem:[%s12841_s5 + $0x4d8] sm:$0xff]   ;;  %v9265_v13 = vld [vmem:[%s12841_s5 + $0x468] sm:$0xff]  }
 0x45c   :  { %8241 = vmatpush3.bf16.msra.mxu0 %v9211_v26  ;;  %v5120_v26 = vrot.slane %v5113_v8, 4  ;;  %v5525_v0 = vrot.slane %v5514_v5, 6  ;;  %v9261_v8 = vld [vmem:[%s12841_s5 + $0x460] sm:$0xff]   ;;  %v9266_v24 = vld [vmem:[%s12841_s5 + $0x4e8] sm:$0xff]  }
 0x45d   :  { %8263 = vmatpush3.bf16.msra.mxu1 %v9212_v38  ;;  %8270 = vmatprep.subr.bf16.mxu0 %v9213_v40  ;;  %v5306_v38 = vrot.slane %v5111_v28, 6  ;;  %v5523_v40 = vrot.slane %v5512_v55, 7  ;;  %v9260_v28 = vld [vmem:[%s12841_s5 + $0x498] sm:$0xff]  }
 0x45e   :  { %8292 = vmatprep.subr.bf16.mxu1 %v9214_v41  ;;  %v5711_v41 = vrot.slane %v5514_v5, 7  ;;  %v5121_v3 = vsel %vm3961_vm5, %v5120_v26, %v5119_v10  ;;  %v5859_v5 = vld [vmem:[#allocation3 + $0x18] sm:$0x20] }
 0x45f   :  { %4864 = vmatmul.mubr.bf16.vlgmr.msra.gmra.mrb[24].mxu0 %v4731_v33  ;;  %v9244_v33 = vld [vmem:[%s12841_s5 + $0x3b8] sm:$0xff]   ;;  %v5524_v62 = vsel %vm3958_vm6, %v5523_v40, %v5510_v56  ;;  %v5857_v56 = vld [vmem:[#allocation3 + $0x8] sm:$0x20] }
 0x460   :  { %5052 = vmatmul.mubr.bf16.vlgmr.msra.gmra.mrb[24].mxu1 %v4919_v52  ;;  %8271 = vmatpush3.bf16.msra.mxu0 %v9215_v35  ;;  %v5307_v35 = vsel %vm3958_vm6, %v5306_v38, %v5305_v46  ;;  %v5527_v52 = vrot.slane %v5516_v47, 5  ;;  %v5861_v38 = vld [vmem:[#allocation3 + $0x28] sm:$0x20]  ;;  %v5863_v40 = vld [vmem:[#allocation3 + $0x38] sm:$0x20] }
 0x461   :  { %5263 = vmatprep.mubr.bf16.mxu0 %v5132_v20  ;;  %8293 = vmatpush3.bf16.msra.mxu1 %v9216_v48  ;;  %v5309_v48 = vsel %vm3961_vm5, %v5308_v34, %v5307_v35  ;;  %v5526_v20 = vsel %vm3961_vm5, %v5525_v0, %v5524_v62  ;;  %v5906_v34 = vunpack.c.h.b16 %v5857_v56  ;;  %v9271_v0 = vld [vmem:[%s12841_s5 + $0x430] sm:$0xff]   ;;  %v9290_v56 = vld [vmem:[%s12841_s5 + $0x5d8] sm:$0xff]  }
 0x462   :  { %5451 = vmatprep.mubr.bf16.mxu1 %v5320_v37  ;;  %8272 = vmatprep.subr.bf16.mxu0 %v9217_v29  ;;  %v9245_v29 = vld [vmem:[%s12841_s5 + $0x440] sm:$0xff]   ;;  %v5713_v37 = vrot.slane %v5516_v47, 6  ;;  %v5908_v47 = vunpack.c.h.b16 %v5859_v5  ;;  %v9291_v5 = vld [vmem:[%s12841_s5 + $0x518] sm:$0xff]  }
 0x463   :  { %8294 = vmatprep.subr.bf16.mxu1 %v9218_v16  ;;  %v5710_v16 = vsel %vm3958_vm6, %v5512_v55, %v5709_v44  ;;  %v5462_v55 = vld [vmem:[#allocation3 + $0x10] sm:$0x10]  ;;  %v5515_v44 = vunpack.c.h.b16 %v5466_v61  ;;  %v5919_v62 = vrot.slane %v5906_v34, 2  ;;  %v9293_v61 = vld [vmem:[%s12841_s5 + $0x560] sm:$0xff]  }
 0x464   :  { %8273 = vmatpush3.bf16.msra.mxu0 %v9219_v58  ;;  %v5123_v58 = vsel %vm3964_vm13, %v5122_v4, %v5121_v3  ;;  %v5511_v59 = vunpack.c.h.b16 %v5462_v55  ;;  %v9273_v3 = vld [vmem:[%s12841_s5 + $0x478] sm:$0xff]   ;;  %v9287_v55 = vld [vmem:[%s12841_s5 + $0x510] sm:$0xff]  }
 0x465   :  { %8295 = vmatpush3.bf16.msra.mxu1 %v9220_v53  ;;  %8274 = vmatprep.subr.bf16.mxu0 %v9221_v17  ;;  %v9246_v53 = vld [vmem:[%s12841_s5 + $0x4c0] sm:$0xff]   ;;  %v5712_v17 = vsel %vm3961_vm5, %v5711_v41, %v5710_v16  ;;  %v5910_v41 = vunpack.c.h.b16 %v5861_v38  ;;  %v9297_v38 = vld [vmem:[%s12841_s5 + $0x568] sm:$0xff]  }
 0x466   :  { %8296 = vmatprep.subr.bf16.mxu1 %v9222_v36  ;;  %v5311_v36 = vsel %vm3964_vm13, %v5310_v31, %v5309_v48  ;;  %v5517_v10 = vrot.slane %v5511_v59, 7  ;;  %v5912_v48 = vunpack.c.h.b16 %v5863_v40  ;;  %v9298_v40 = vld [vmem:[%s12841_s5 + $0x5e8] sm:$0xff]  }
 0x468   :  { %8275 = vmatpush3.bf16.msra.mxu0 %v9223_v57  ;;  %v9247_v57 = vld [vmem:[%s12841_s5 + $0x400] sm:$0xff]  }
 0x469   :  { %8297 = vmatpush3.bf16.msra.mxu1 %v9224_v14  ;;  %8276 = vmatprep.subr.bf16.mxu0 %v9225_v23  ;;  %v5528_v14 = vsel %vm3964_vm13, %v5527_v52, %v5526_v20  ;;  %v5131_v23 = vpack.c.b16 %v5123_v58, %v5123_v58  ;;  %v5920_v52 = vrot.slane %v5908_v47, 1  ;;  %v6106_v20 = vrot.slane %v5908_v47, 2  ;;  %v6255_v47 = vld [vmem:[#allocation3 + $0x18] sm:$0x40] }
 0x46a   :  { %8298 = vmatprep.subr.bf16.mxu1 %v9226_v22  ;;  %v9248_v22 = vld [vmem:[%s12841_s5 + $0x480] sm:$0xff]   ;;  %v6108_v58 = vrot.slane %v5910_v41, 1 }
 0x46c   :  { %8277 = vmatpush3.bf16.msra.mxu0 %v9227_v30  ;;  %v5714_v30 = vsel %vm3964_vm13, %v5713_v37, %v5712_v17  ;;  %v5521_v37 = vrot.slane %v5515_v44, 5 }
 0x46d   :  { %8299 = vmatpush3.bf16.msra.mxu1 %v9228_v42  ;;  %8278 = vmatprep.subr.bf16.mxu0 %v9229_v11  ;;  %v5319_v42 = vpack.c.b16 %v5311_v36, %v5311_v36  ;;  %v9249_v11 = vld [vmem:[%s12841_s5 + $0x448] sm:$0xff]  }
 0x46e   :  { %8300 = vmatprep.subr.bf16.mxu1 %v9230_v45  ;;  %v5530_v45 = vpack.c.b16 %v5528_v14, %v5528_v14  ;;  %v9276_v14 = vld [vmem:[%s12841_s5 + $0x4b8] sm:$0xff]  }
 0x470   :  { %8279 = vmatpush3.bf16.msra.mxu0 %v9231_v50  ;;  %v5716_v50 = vpack.c.b16 %v5714_v30, %v5714_v30  ;;  %v5923_v30 = vrot.slane %v5912_v48, 7 }
 0x471   :  { %8301 = vmatpush3.bf16.msra.mxu1 %v9232_v6  ;;  %8280 = vmatprep.subr.bf16.mxu0 %v9233_v18  ;;  %v9252_v6 = vld [vmem:[%s12841_s5 + $0x488] sm:$0xff]   ;;  %v9253_v18 = vld [vmem:[%s12841_s5 + $0x450] sm:$0xff]  }
 0x472   :  { %8302 = vmatprep.subr.bf16.mxu1 %v9234_v1  ;;  %v9255_v1 = vld [vmem:[%s12841_s5 + $0x410] sm:$0xff]  }
 0x474   :  { %8281 = vmatpush3.bf16.msra.mxu0 %v9235_v15  ;;  %v9259_v15 = vld [vmem:[%s12841_s5 + $0x418] sm:$0xff]  }
 0x475   :  { %8303 = vmatpush3.bf16.msra.mxu1 %v9236_v43  ;;  %8282 = vmatprep.subr.bf16.mxu0 %v9237_v39  ;;  %v9263_v43 = vld [vmem:[%s12841_s5 + $0x420] sm:$0xff]  }
 0x476   :  { %8304 = vmatprep.subr.bf16.mxu1 %v9238_v7  ;;  %v5460_v39 = vld [vmem:[#allocation3] sm:$0x10] }
 0x477   :  { %v5464_v7 = vld [vmem:[#allocation3 + $0x20] sm:$0x10]  ;;  %v5509_v46 = vunpack.c.h.b16 %v5460_v39  ;;  %v9284_v39 = vld [vmem:[%s12841_s5 + $0x588] sm:$0xff]  }
 0x478   :  { %8283 = vmatpush3.bf16.msra.mxu0 %v9239_v60  ;;  %v9267_v60 = vld [vmem:[%s12841_s5 + $0x428] sm:$0xff]   ;;  %v5513_v26 = vunpack.c.h.b16 %v5464_v7  ;;  %v9288_v7 = vld [vmem:[%s12841_s5 + $0x590] sm:$0xff]  }
 0x479   :  { %8305 = vmatpush3.bf16.msra.mxu1 %v9240_v54  ;;  %8284 = vmatprep.subr.bf16.mxu0 %v9241_v32  ;;  %v9268_v54 = vld [vmem:[%s12841_s5 + $0x4a8] sm:$0xff]   ;;  %v9269_v32 = vld [vmem:[%s12841_s5 + $0x470] sm:$0xff]   ;;  %v5703_v35 = vrot.slane %v5509_v46, 1  ;;  %v5518_v16 = vsel %vm3958_vm6, %v5517_v10, %v5509_v46  ;;  %v9296_v46 = vld [vmem:[%s12841_s5 + $0x5a0] sm:$0xff]  }
 0x47a   :  { %8306 = vmatprep.subr.bf16.mxu1 %v9242_v2  ;;  %v9270_v2 = vld [vmem:[%s12841_s5 + $0x4f0] sm:$0xff]   ;;  %v5519_v4 = vrot.slane %v5513_v26, 6  ;;  %v5705_v31 = vrot.slane %v5513_v26, 7  ;;  %v5856_v26 = vld [vmem:[#allocation3] sm:$0x20] }
 0x47b   :  { %v5704_v36 = vsel %vm3958_vm6, %v5511_v59, %v5703_v35  ;;  %v9294_v59 = vld [vmem:[%s12841_s5 + $0x5e0] sm:$0xff]   ;;  %v6257_v10 = vld [vmem:[#allocation3 + $0x28] sm:$0x40]  ;;  %v6304_v35 = vunpack.c.h.b16 %v6255_v47  ;;  %v9320_v47 = vld [vmem:[%s12841_s5 + $0x690] sm:$0xff]  }
 0x47c   :  { %8285 = vmatpush3.bf16.msra.mxu0 %v9243_v9  ;;  %v9272_v9 = vld [vmem:[%s12841_s5 + $0x4b0] sm:$0xff]   ;;  %v5520_v17 = vsel %vm3961_vm5, %v5519_v4, %v5518_v16 }
 0x47d   :  { %8307 = vmatpush3.bf16.msra.mxu1 %v9244_v33  ;;  %8314 = vmatprep.subr.bf16.mxu0 %v9245_v29  ;;  %v9274_v33 = vld [vmem:[%s12841_s5 + $0x4f8] sm:$0xff]   ;;  %v6105_v29 = vrot.slane %v5906_v34, 3  ;;  %v6253_v34 = vld [vmem:[#allocation3 + $0x8] sm:$0x40]  ;;  %v5862_v4 = vld [vmem:[#allocation3 + $0x30] sm:$0x20] }
 0x47e   :  { %8336 = vmatprep.subr.bf16.mxu1 %v9246_v53  ;;  %v9275_v53 = vld [vmem:[%s12841_s5 + $0x438] sm:$0xff]  }
 0x47f   :  { %5264 = vmatmul.mubr.bf16.vlgmr.msra.gmra.mrb[28].mxu0 %v5131_v23  ;;  %v5706_v23 = vsel %vm3961_vm5, %v5705_v31, %v5704_v36  ;;  %v9300_v31 = vld [vmem:[%s12841_s5 + $0x5a8] sm:$0xff]  }
 0x480   :  { %5452 = vmatmul.mubr.bf16.vlgmr.msra.gmra.mrb[28].mxu1 %v5319_v42  ;;  %8315 = vmatpush3.bf16.msra.mxu0 %v9247_v57  ;;  %v5707_v57 = vrot.slane %v5515_v44, 6  ;;  %v9277_v42 = vld [vmem:[%s12841_s5 + $0x540] sm:$0xff]  }
 0x481   :  { %5661 = vmatprep.mubr.bf16.mxu0 %v5530_v45  ;;  %8337 = vmatpush3.bf16.msra.mxu1 %v9248_v22  ;;  %v5921_v22 = vsel %vm3958_vm6, %v5920_v52, %v5919_v62  ;;  %v6107_v45 = vsel %vm3958_vm6, %v6106_v20, %v6105_v29  ;;  %v6306_v62 = vunpack.c.h.b16 %v6257_v10  ;;  %v9302_v52 = vld [vmem:[%s12841_s5 + $0x5f0] sm:$0xff]   ;;  %v5911_v29 = vunpack.c.h.b16 %v5862_v4  ;;  %v9324_v10 = vld [vmem:[%s12841_s5 + $0x698] sm:$0xff]   ;;  %v9325_v4 = vld [vmem:[%s12841_s5 + $0x660] sm:$0xff]  }
 0x482   :  { %5847 = vmatprep.mubr.bf16.mxu1 %v5716_v50  ;;  %8316 = vmatprep.subr.bf16.mxu0 %v9249_v11  ;;  %v5922_v11 = vsel %vm3961_vm5, %v5910_v41, %v5921_v22  ;;  %v9278_v50 = vld [vmem:[%s12841_s5 + $0x5c0] sm:$0xff]   ;;  %v9299_v41 = vld [vmem:[%s12841_s5 + $0x528] sm:$0xff]   ;;  %v9305_v22 = vld [vmem:[%s12841_s5 + $0x578] sm:$0xff]  }
 0x483   :  { %8338 = vmatprep.subr.bf16.mxu1 %v9250_v51  ;;  %v5522_v51 = vsel %vm3964_vm13, %v5521_v37, %v5520_v17 }
 0x484   :  { %8317 = vmatpush3.bf16.msra.mxu0 %v9251_v19  ;;  %v6109_v19 = vsel %vm3961_vm5, %v6108_v58, %v6107_v45  ;;  %v9306_v45 = vld [vmem:[%s12841_s5 + $0x5f8] sm:$0xff]  }
 0x485   :  { %8339 = vmatpush3.bf16.msra.mxu1 %v9252_v6  ;;  %8318 = vmatprep.subr.bf16.mxu0 %v9253_v18  ;;  %v5708_v6 = vsel %vm3964_vm13, %v5707_v57, %v5706_v23  ;;  %v9279_v18 = vld [vmem:[%s12841_s5 + $0x500] sm:$0xff]   ;;  %v9304_v23 = vld [vmem:[%s12841_s5 + $0x5b0] sm:$0xff]  }
 0x486   :  { %8340 = vmatprep.subr.bf16.mxu1 %v9254_v49  ;;  %v5924_v49 = vsel %vm3964_vm13, %v5923_v30, %v5922_v11  ;;  %v6319_v30 = vrot.slane %v6306_v62, 2  ;;  %v6505_v11 = vrot.slane %v6304_v35, 4 }
 0x488   :  { %8319 = vmatpush3.bf16.msra.mxu0 %v9255_v1  ;;  %v9280_v1 = vld [vmem:[%s12841_s5 + $0x580] sm:$0xff]  }
 0x489   :  { %8341 = vmatpush3.bf16.msra.mxu1 %v9256_v12  ;;  %8320 = vmatprep.subr.bf16.mxu0 %v9257_v63  ;;  %v5529_v12 = vpack.c.b16 %v5522_v51, %v5522_v51  ;;  %v6110_v63 = vsel %vm3964_vm13, %v5912_v48, %v6109_v19  ;;  %v6259_v48 = vld [vmem:[#allocation3 + $0x38] sm:$0x40]  ;;  %v6507_v19 = vrot.slane %v6306_v62, 3  ;;  %v6653_v62 = vld [vmem:[#allocation3 + $0x8] sm:$0x80] }
 0x48a   :  { %8342 = vmatprep.subr.bf16.mxu1 %v9258_v27  ;;  %v9281_v27 = vld [vmem:[%s12841_s5 + $0x548] sm:$0xff]   ;;  %v6308_v36 = vunpack.c.h.b16 %v6259_v48 }
 0x48b   :  { %v9329_v48 = vld [vmem:[%s12841_s5 + $0x668] sm:$0xff]  }
 0x48c   :  { %8321 = vmatpush3.bf16.msra.mxu0 %v9259_v15  ;;  %v5715_v15 = vpack.c.b16 %v5708_v6, %v5708_v6 }
 0x48d   :  { %8343 = vmatpush3.bf16.msra.mxu1 %v9260_v28  ;;  %8322 = vmatprep.subr.bf16.mxu0 %v9261_v8  ;;  %v9282_v28 = vld [vmem:[%s12841_s5 + $0x5c8] sm:$0xff]   ;;  %v5926_v8 = vpack.c.b16 %v5924_v49, %v5924_v49  ;;  %v9307_v49 = vld [vmem:[%s12841_s5 + $0x538] sm:$0xff]  }
 0x48e   :  { %8344 = vmatprep.subr.bf16.mxu1 %v9262_v21  ;;  %v9283_v21 = vld [vmem:[%s12841_s5 + $0x508] sm:$0xff]  }
 0x490   :  { %8323 = vmatpush3.bf16.msra.mxu0 %v9263_v43  ;;  %v6112_v43 = vpack.c.b16 %v6110_v63, %v6110_v63  ;;  %v6321_v63 = vrot.slane %v6308_v36, 1 }
 0x491   :  { %8345 = vmatpush3.bf16.msra.mxu1 %v9264_v25  ;;  %8324 = vmatprep.subr.bf16.mxu0 %v9265_v13  ;;  %v9285_v25 = vld [vmem:[%s12841_s5 + $0x550] sm:$0xff]  }
 0x492   :  { %8346 = vmatprep.subr.bf16.mxu1 %v9266_v24  ;;  %v9286_v13 = vld [vmem:[%s12841_s5 + $0x5d0] sm:$0xff]   ;;  %v9289_v24 = vld [vmem:[%s12841_s5 + $0x558] sm:$0xff]  }
 0x494   :  { %8325 = vmatpush3.bf16.msra.mxu0 %v9267_v60  ;;  %v9292_v60 = vld [vmem:[%s12841_s5 + $0x598] sm:$0xff]  }
 0x495   :  { %8347 = vmatpush3.bf16.msra.mxu1 %v9268_v54  ;;  %8326 = vmatprep.subr.bf16.mxu0 %v9269_v32  ;;  %v5858_v54 = vld [vmem:[#allocation3 + $0x10] sm:$0x20]  ;;  %v9295_v32 = vld [vmem:[%s12841_s5 + $0x520] sm:$0xff]  }
 0x496   :  { %8348 = vmatprep.subr.bf16.mxu1 %v9270_v2  ;;  %v5860_v2 = vld [vmem:[#allocation3 + $0x20] sm:$0x20]  ;;  %v5907_v44 = vunpack.c.h.b16 %v5858_v54 }
 0x498   :  { %8327 = vmatpush3.bf16.msra.mxu0 %v9271_v0  ;;  %v5905_v0 = vunpack.c.h.b16 %v5856_v26  ;;  %v5914_v16 = vrot.slane %v5907_v44, 1  ;;  %v6100_v58 = vrot.slane %v5907_v44, 2  ;;  %v9314_v26 = vld [vmem:[%s12841_s5 + $0x6c8] sm:$0xff]   ;;  %v9323_v44 = vld [vmem:[%s12841_s5 + $0x618] sm:$0xff]  }
 0x499   :  { %8349 = vmatpush3.bf16.msra.mxu1 %v9272_v9  ;;  %8328 = vmatprep.subr.bf16.mxu0 %v9273_v3  ;;  %v5909_v9 = vunpack.c.h.b16 %v5860_v2  ;;  %v6302_v3 = vunpack.c.h.b16 %v6253_v34  ;;  %v9318_v2 = vld [vmem:[%s12841_s5 + $0x6d0] sm:$0xff]  }
 0x49a   :  { %8350 = vmatprep.subr.bf16.mxu1 %v9274_v33  ;;  %v9301_v33 = vld [vmem:[%s12841_s5 + $0x570] sm:$0xff]   ;;  %v5913_v20 = vrot.slane %v5905_v0, 2  ;;  %v6099_v37 = vrot.slane %v5905_v0, 3  ;;  %v9322_v0 = vld [vmem:[%s12841_s5 + $0x6d8] sm:$0xff]  }
 0x49b   :  { %v6102_v17 = vrot.slane %v5909_v9, 1  ;;  %v6316_v57 = vrot.slane %v6302_v3, 4  ;;  %v9319_v34 = vld [vmem:[%s12841_s5 + $0x610] sm:$0xff]  }
 0x49c   :  { %8329 = vmatpush3.bf16.msra.mxu0 %v9275_v53  ;;  %v9303_v53 = vld [vmem:[%s12841_s5 + $0x530] sm:$0xff]   ;;  %v5915_v51 = vsel %vm3958_vm6, %v5914_v16, %v5913_v20 }
 0x49d   :  { %8351 = vmatpush3.bf16.msra.mxu1 %v9276_v14  ;;  %8358 = vmatprep.subr.bf16.mxu0 %v9277_v42  ;;  %v6317_v14 = vrot.slane %v6304_v35, 3  ;;  %v6504_v42 = vrot.slane %v6302_v3, 5  ;;  %v5916_v6 = vsel %vm3961_vm5, %v5909_v9, %v5915_v51  ;;  %v6252_v9 = vld [vmem:[#allocation3] sm:$0x40]  ;;  %v6254_v3 = vld [vmem:[#allocation3 + $0x10] sm:$0x40] }
 0x49e   :  { %8380 = vmatprep.subr.bf16.mxu1 %v9278_v50  ;;  %v5917_v50 = vrot.slane %v5911_v29, 7  ;;  %v9327_v35 = vld [vmem:[%s12841_s5 + $0x620] sm:$0xff]   ;;  %v6301_v20 = vunpack.c.h.b16 %v6252_v9  ;;  %v6303_v16 = vunpack.c.h.b16 %v6254_v3  ;;  %v9345_v9 = vld [vmem:[%s12841_s5 + $0x748] sm:$0xff]  }
 0x49f   :  { %5662 = vmatmul.mubr.bf16.vlgmr.msra.gmra.mrb[32].mxu0 %v5529_v12  ;;  %v6318_v12 = vsel %vm3958_vm6, %v6317_v14, %v6316_v57  ;;  %v9332_v14 = vld [vmem:[%s12841_s5 + $0x6a8] sm:$0xff]  }
 0x4a0   :  { %5848 = vmatmul.mubr.bf16.vlgmr.msra.gmra.mrb[32].mxu1 %v5715_v15  ;;  %8359 = vmatpush3.bf16.msra.mxu0 %v9279_v18  ;;  %v6101_v18 = vsel %vm3958_vm6, %v6100_v58, %v6099_v37  ;;  %v9309_v15 = vld [vmem:[%s12841_s5 + $0x640] sm:$0xff]   ;;  %v6657_v37 = vld [vmem:[#allocation3 + $0x28] sm:$0x80]  ;;  %v6258_v58 = vld [vmem:[#allocation3 + $0x30] sm:$0x40]  ;;  %v6310_v51 = vrot.slane %v6303_v16, 3 }
 0x4a1   :  { %6057 = vmatprep.mubr.bf16.mxu0 %v5926_v8  ;;  %8381 = vmatpush3.bf16.msra.mxu1 %v9280_v1  ;;  %v6103_v1 = vsel %vm3961_vm5, %v6102_v17, %v6101_v18  ;;  %v6506_v8 = vsel %vm3958_vm6, %v6505_v11, %v6504_v42  ;;  %v9331_v17 = vld [vmem:[%s12841_s5 + $0x628] sm:$0xff]   ;;  %v9334_v42 = vld [vmem:[%s12841_s5 + $0x6f0] sm:$0xff]   ;;  %v6307_v11 = vunpack.c.h.b16 %v6258_v58  ;;  %v9355_v58 = vld [vmem:[%s12841_s5 + $0x718] sm:$0xff]  }
 0x4a2   :  { %6243 = vmatprep.mubr.bf16.mxu1 %v6112_v43  ;;  %8360 = vmatprep.subr.bf16.mxu0 %v9281_v27  ;;  %v9308_v27 = vld [vmem:[%s12841_s5 + $0x5b8] sm:$0xff]   ;;  %v5918_v43 = vsel %vm3964_vm13, %v5917_v50, %v5916_v6  ;;  %v6498_v6 = vrot.slane %v6303_v16, 4  ;;  %v9335_v18 = vld [vmem:[%s12841_s5 + $0x630] sm:$0xff]  }
 0x4a3   :  { %8382 = vmatprep.subr.bf16.mxu1 %v9282_v28  ;;  %v6320_v28 = vsel %vm3961_vm5, %v6319_v30, %v6318_v12  ;;  %v6706_v30 = vunpack.c.h.b16 %v6657_v37  ;;  %v9353_v16 = vld [vmem:[%s12841_s5 + $0x758] sm:$0xff]  }
 0x4a4   :  { %8361 = vmatpush3.bf16.msra.mxu0 %v9283_v21  ;;  %v6509_v21 = vrot.slane %v6308_v36, 2  ;;  %v6702_v36 = vunpack.c.h.b16 %v6653_v62  ;;  %v9349_v62 = vld [vmem:[%s12841_s5 + $0x750] sm:$0xff]   ;;  %v9354_v37 = vld [vmem:[%s12841_s5 + $0x7d8] sm:$0xff]  }
 0x4a5   :  { %8383 = vmatpush3.bf16.msra.mxu1 %v9284_v39  ;;  %8362 = vmatprep.subr.bf16.mxu0 %v9285_v25  ;;  %v9310_v39 = vld [vmem:[%s12841_s5 + $0x6c0] sm:$0xff]   ;;  %v6508_v25 = vsel %vm3961_vm5, %v6507_v19, %v6506_v8  ;;  %v6497_v19 = vrot.slane %v6301_v20, 5 }
 0x4a6   :  { %8384 = vmatprep.subr.bf16.mxu1 %v9286_v13  ;;  %v6104_v13 = vsel %vm3964_vm13, %v5911_v29, %v6103_v1  ;;  %v9330_v29 = vld [vmem:[%s12841_s5 + $0x6e8] sm:$0xff]   ;;  %v6716_v12 = vrot.slane %v6702_v36, 6  ;;  %v6904_v8 = vrot.slane %v6702_v36, 7  ;;  %v9358_v36 = vld [vmem:[%s12841_s5 + $0x7e0] sm:$0xff]  }
 0x4a8   :  { %8363 = vmatpush3.bf16.msra.mxu0 %v9287_v55  ;;  %v9311_v55 = vld [vmem:[%s12841_s5 + $0x600] sm:$0xff]  }
 0x4a9   :  { %8385 = vmatpush3.bf16.msra.mxu1 %v9288_v7  ;;  %8364 = vmatprep.subr.bf16.mxu0 %v9289_v24  ;;  %v6322_v7 = vsel %vm3964_vm13, %v6321_v63, %v6320_v28  ;;  %v5925_v24 = vpack.c.b16 %v5918_v43, %v5918_v43  ;;  %v6719_v28 = vrot.slane %v6706_v30, 4  ;;  %v9338_v43 = vld [vmem:[%s12841_s5 + $0x6f8] sm:$0xff]  }
 0x4aa   :  { %8386 = vmatprep.subr.bf16.mxu1 %v9290_v56  ;;  %v9312_v56 = vld [vmem:[%s12841_s5 + $0x680] sm:$0xff]  }
 0x4ac   :  { %8365 = vmatpush3.bf16.msra.mxu0 %v9291_v5  ;;  %v6510_v5 = vsel %vm3964_vm13, %v6509_v21, %v6508_v25  ;;  %v6314_v25 = vrot.slane %v6307_v11, 1 }
 0x4ad   :  { %8387 = vmatpush3.bf16.msra.mxu1 %v9292_v60  ;;  %8366 = vmatprep.subr.bf16.mxu0 %v9293_v61  ;;  %v6111_v60 = vpack.c.b16 %v6104_v13, %v6104_v13  ;;  %v9313_v61 = vld [vmem:[%s12841_s5 + $0x648] sm:$0xff]   ;;  %v6512_v54 = vpack.c.b16 %v6510_v5, %v6510_v5  ;;  %v6907_v13 = vrot.slane %v6706_v30, 5  ;;  %v9360_v30 = vld [vmem:[%s12841_s5 + $0x7a0] sm:$0xff]  }
 0x4ae   :  { %8388 = vmatprep.subr.bf16.mxu1 %v9294_v59  ;;  %v6324_v59 = vpack.c.b16 %v6322_v7, %v6322_v7  ;;  %v6499_v7 = vsel %vm3958_vm6, %v6498_v6, %v6497_v19  ;;  %v9363_v6 = vld [vmem:[%s12841_s5 + $0x728] sm:$0xff]  }
 0x4b0   :  { %8367 = vmatpush3.bf16.msra.mxu0 %v9295_v32  ;;  %v9315_v32 = vld [vmem:[%s12841_s5 + $0x608] sm:$0xff]  }
 0x4b1   :  { %8389 = vmatpush3.bf16.msra.mxu1 %v9296_v46  ;;  %8368 = vmatprep.subr.bf16.mxu0 %v9297_v38  ;;  %v9316_v46 = vld [vmem:[%s12841_s5 + $0x688] sm:$0xff]   ;;  %v9317_v38 = vld [vmem:[%s12841_s5 + $0x650] sm:$0xff]  }
 0x4b2   :  { %8390 = vmatprep.subr.bf16.mxu1 %v9298_v40  ;;  %v9321_v40 = vld [vmem:[%s12841_s5 + $0x658] sm:$0xff]  }
 0x4b4   :  { %8369 = vmatpush3.bf16.msra.mxu0 %v9299_v41  ;;  %v9326_v41 = vld [vmem:[%s12841_s5 + $0x6e0] sm:$0xff]  }
 0x4b5   :  { %8391 = vmatpush3.bf16.msra.mxu1 %v9300_v31  ;;  %8370 = vmatprep.subr.bf16.mxu0 %v9301_v33  ;;  %v9328_v31 = vld [vmem:[%s12841_s5 + $0x6a0] sm:$0xff]  }
 0x4b6   :  { %8392 = vmatprep.subr.bf16.mxu1 %v9302_v52  ;;  %v6256_v33 = vld [vmem:[#allocation3 + $0x20] sm:$0x40]  ;;  %v6655_v52 = vld [vmem:[#allocation3 + $0x18] sm:$0x80] }
 0x4b7   :  { %v6704_v57 = vunpack.c.h.b16 %v6655_v52  ;;  %v9350_v52 = vld [vmem:[%s12841_s5 + $0x7d0] sm:$0xff]  }
 0x4b8   :  { %8371 = vmatpush3.bf16.msra.mxu0 %v9303_v53  ;;  %v6305_v53 = vunpack.c.h.b16 %v6256_v33  ;;  %v9347_v33 = vld [vmem:[%s12841_s5 + $0x708] sm:$0xff]  }
 0x4b9   :  { %8393 = vmatpush3.bf16.msra.mxu1 %v9304_v23  ;;  %8372 = vmatprep.subr.bf16.mxu0 %v9305_v22  ;;  %v9333_v23 = vld [vmem:[%s12841_s5 + $0x670] sm:$0xff]   ;;  %v6659_v22 = vld [vmem:[#allocation3 + $0x38] sm:$0x80]  ;;  %v6717_v63 = vrot.slane %v6704_v57, 5  ;;  %v6905_v21 = vrot.slane %v6704_v57, 6 }
 0x4ba   :  { %8394 = vmatprep.subr.bf16.mxu1 %v9306_v45  ;;  %v6309_v45 = vrot.slane %v6301_v20, 4  ;;  %v6312_v50 = vrot.slane %v6305_v53, 2  ;;  %v6708_v1 = vunpack.c.h.b16 %v6659_v22  ;;  %v9352_v20 = vld [vmem:[%s12841_s5 + $0x790] sm:$0xff]   ;;  %v6652_v57 = vld [vmem:[#allocation3] sm:$0x80] }
 0x4bb   :  { %v6656_v22 = vld [vmem:[#allocation3 + $0x20] sm:$0x80] }
 0x4bc   :  { %8373 = vmatpush3.bf16.msra.mxu0 %v9307_v49  ;;  %v6500_v49 = vrot.slane %v6305_v53, 3  ;;  %v9356_v53 = vld [vmem:[%s12841_s5 + $0x798] sm:$0xff]   ;;  %v6705_v19 = vunpack.c.h.b16 %v6656_v22 }
 0x4bd   :  { %8395 = vmatpush3.bf16.msra.mxu1 %v9308_v27  ;;  %8402 = vmatprep.subr.bf16.mxu0 %v9309_v15  ;;  %v9336_v27 = vld [vmem:[%s12841_s5 + $0x6b0] sm:$0xff]   ;;  %v9337_v15 = vld [vmem:[%s12841_s5 + $0x678] sm:$0xff]  }
 0x4be   :  { %8424 = vmatprep.subr.bf16.mxu1 %v9310_v39  ;;  %v6311_v39 = vsel %vm3958_vm6, %v6310_v51, %v6309_v45  ;;  %v6501_v5 = vsel %vm3961_vm5, %v6500_v49, %v6499_v7  ;;  %v6701_v45 = vunpack.c.h.b16 %v6652_v57  ;;  %v9365_v49 = vld [vmem:[%s12841_s5 + $0x770] sm:$0xff]  }
 0x4bf   :  { %6058 = vmatmul.mubr.bf16.vlgmr.msra.gmra.mrb[36].mxu0 %v5925_v24  ;;  %v6502_v24 = vrot.slane %v6307_v11, 2  ;;  %v9362_v11 = vld [vmem:[%s12841_s5 + $0x7e8] sm:$0xff]  }
 0x4c0   :  { %6244 = vmatmul.mubr.bf16.vlgmr.msra.gmra.mrb[36].mxu1 %v6111_v60  ;;  %8403 = vmatpush3.bf16.msra.mxu0 %v9311_v55  ;;  %v6313_v55 = vsel %vm3961_vm5, %v6312_v50, %v6311_v39  ;;  %v6718_v60 = vsel %vm3958_vm6, %v6717_v63, %v6716_v12  ;;  %v6658_v50 = vld [vmem:[#allocation3 + $0x30] sm:$0x80]  ;;  %v6897_v39 = vrot.slane %v6701_v45, 7 }
 0x4c1   :  { %6455 = vmatprep.mubr.bf16.mxu0 %v6324_v59  ;;  %8425 = vmatpush3.bf16.msra.mxu1 %v9312_v56  ;;  %v9339_v56 = vld [vmem:[%s12841_s5 + $0x638] sm:$0xff]   ;;  %v9366_v63 = vld [vmem:[%s12841_s5 + $0x7f0] sm:$0xff]  }
 0x4c2   :  { %6643 = vmatprep.mubr.bf16.mxu1 %v6512_v54  ;;  %8404 = vmatprep.subr.bf16.mxu0 %v9313_v61  ;;  %v6721_v61 = vrot.slane %v6708_v1, 3  ;;  %v9340_v59 = vld [vmem:[%s12841_s5 + $0x6b8] sm:$0xff]   ;;  %v6720_v54 = vsel %vm3961_vm5, %v6719_v28, %v6718_v60 }
 0x4c3   :  { %8426 = vmatprep.subr.bf16.mxu1 %v9314_v26  ;;  %v9341_v26 = vld [vmem:[%s12841_s5 + $0x740] sm:$0xff]  }
 0x4c4   :  { %8405 = vmatpush3.bf16.msra.mxu0 %v9315_v32  ;;  %v6906_v32 = vsel %vm3958_vm6, %v6905_v21, %v6904_v8 }
 0x4c5   :  { %8427 = vmatpush3.bf16.msra.mxu1 %v9316_v46  ;;  %8406 = vmatprep.subr.bf16.mxu0 %v9317_v38  ;;  %v6909_v46 = vrot.slane %v6708_v1, 4  ;;  %v6315_v38 = vsel %vm3964_vm13, %v6314_v25, %v6313_v55 }
 0x4c6   :  { %8428 = vmatprep.subr.bf16.mxu1 %v9318_v2  ;;  %v9342_v2 = vld [vmem:[%s12841_s5 + $0x7c0] sm:$0xff]  }
 0x4c8   :  { %8407 = vmatpush3.bf16.msra.mxu0 %v9319_v34  ;;  %v6908_v34 = vsel %vm3961_vm5, %v6907_v13, %v6906_v32  ;;  %v9370_v32 = vld [vmem:[%s12841_s5 + $0x7f8] sm:$0xff]  }
 0x4c9   :  { %8429 = vmatpush3.bf16.msra.mxu1 %v9320_v47  ;;  %8408 = vmatprep.subr.bf16.mxu0 %v9321_v40  ;;  %v6503_v47 = vsel %vm3964_vm13, %v6502_v24, %v6501_v5  ;;  %v9343_v40 = vld [vmem:[%s12841_s5 + $0x700] sm:$0xff]   ;;  %v6900_v5 = vrot.slane %v6705_v19, 5 }
 0x4ca   :  { %8430 = vmatprep.subr.bf16.mxu1 %v9322_v0  ;;  %v6722_v0 = vsel %vm3964_vm13, %v6721_v61, %v6720_v54 }
 0x4cb   :  { %v6724_v3 = vpack.c.b16 %v6722_v0, %v6722_v0 }
 0x4cc   :  { %8409 = vmatpush3.bf16.msra.mxu0 %v9323_v44  ;;  %v6323_v44 = vpack.c.b16 %v6315_v38, %v6315_v38 }
 0x4cd   :  { %8431 = vmatpush3.bf16.msra.mxu1 %v9324_v10  ;;  %8410 = vmatprep.subr.bf16.mxu0 %v9325_v4  ;;  %v9344_v10 = vld [vmem:[%s12841_s5 + $0x780] sm:$0xff]   ;;  %v6910_v4 = vsel %vm3964_vm13, %v6909_v46, %v6908_v34 }
 0x4ce   :  { %8432 = vmatprep.subr.bf16.mxu1 %v9326_v41  ;;  %v6511_v41 = vpack.c.b16 %v6503_v47, %v6503_v47 }
 0x4d0   :  { %8411 = vmatpush3.bf16.msra.mxu0 %v9327_v35  ;;  %v9346_v35 = vld [vmem:[%s12841_s5 + $0x7c8] sm:$0xff]  }
 0x4d1   :  { %8433 = vmatpush3.bf16.msra.mxu1 %v9328_v31  ;;  %8412 = vmatprep.subr.bf16.mxu0 %v9329_v48  ;;  %v6912_v31 = vpack.c.b16 %v6910_v4, %v6910_v4  ;;  %v9348_v48 = vld [vmem:[%s12841_s5 + $0x788] sm:$0xff]  }
 0x4d2   :  { %8434 = vmatprep.subr.bf16.mxu1 %v9330_v29  ;;  %v9351_v29 = vld [vmem:[%s12841_s5 + $0x710] sm:$0xff]  }
 0x4d4   :  { %8413 = vmatpush3.bf16.msra.mxu0 %v9331_v17  ;;  %v9357_v17 = vld [vmem:[%s12841_s5 + $0x760] sm:$0xff]  }
 0x4d5   :  { %8435 = vmatpush3.bf16.msra.mxu1 %v9332_v14  ;;  %8414 = vmatprep.subr.bf16.mxu0 %v9333_v23  ;;  %v6654_v14 = vld [vmem:[#allocation3 + $0x10] sm:$0x80]  ;;  %v9359_v23 = vld [vmem:[%s12841_s5 + $0x720] sm:$0xff]  }
 0x4d6   :  { %8436 = vmatprep.subr.bf16.mxu1 %v9334_v42  ;;  %v9361_v42 = vld [vmem:[%s12841_s5 + $0x768] sm:$0xff]   ;;  %v6703_v51 = vunpack.c.h.b16 %v6654_v14 }
 0x4d8   :  { %8415 = vmatpush3.bf16.msra.mxu0 %v9335_v18  ;;  %v9364_v18 = vld [vmem:[%s12841_s5 + $0x7a8] sm:$0xff]   ;;  %v6710_v28 = vrot.slane %v6703_v51, 5  ;;  %v6898_v25 = vrot.slane %v6703_v51, 6 }
 0x4d9   :  { %8437 = vmatpush3.bf16.msra.mxu1 %v9336_v27  ;;  %8416 = vmatprep.subr.bf16.mxu0 %v9337_v15  ;;  %v6707_v27 = vunpack.c.h.b16 %v6658_v50  ;;  %v6709_v15 = vrot.slane %v6701_v45, 6 }
 0x4da   :  { %8438 = vmatprep.subr.bf16.mxu1 %v9338_v43  ;;  %v6712_v43 = vrot.slane %v6705_v19, 4  ;;  %v6899_v34 = vsel %vm3958_vm6, %v6898_v25, %v6897_v39 }
 0x4db   :  { %v6711_v46 = vsel %vm3958_vm6, %v6710_v28, %v6709_v15  ;;  %v6714_v38 = vrot.slane %v6707_v27, 3  ;;  %v6902_v47 = vrot.slane %v6707_v27, 4  ;;  %v6901_v0 = vsel %vm3961_vm5, %v6900_v5, %v6899_v34 }
 0x4dc   :  { %8417 = vmatpush3.bf16.msra.mxu0 %v9339_v56  ;;  %v9367_v56 = vld [vmem:[%s12841_s5 + $0x730] sm:$0xff]  }
 0x4dd   :  { %8439 = vmatpush3.bf16.msra.mxu1 %v9340_v59  ;;  %8446 = vmatprep.subr.bf16.mxu0 %v9341_v26  ;;  %v9368_v59 = vld [vmem:[%s12841_s5 + $0x7b0] sm:$0xff]   ;;  %v9369_v26 = vld [vmem:[%s12841_s5 + $0x778] sm:$0xff]   ;;  %v6903_v4 = vsel %vm3964_vm13, %v6902_v47, %v6901_v0 }
 0x4de   :  { %8468 = vmatprep.subr.bf16.mxu1 %v9342_v2  ;;  %v6713_v2 = vsel %vm3961_vm5, %v6712_v43, %v6711_v46 }
 0x4df   :  { %6456 = vmatmul.mubr.bf16.vlgmr.msra.gmra.mrb[40].mxu0 %v6323_v44  ;;  %v9372_v44 = vld [vmem:[%s12841_s5 + $0x7b8] sm:$0xff]  }
 0x4e0   :  { %6644 = vmatmul.mubr.bf16.vlgmr.msra.gmra.mrb[40].mxu1 %v6511_v41  ;;  %8447 = vmatpush3.bf16.msra.mxu0 %v9343_v40  ;;  %v9371_v40 = vld [vmem:[%s12841_s5 + $0x738] sm:$0xff]  }
 0x4e1   :  { %6855 = vmatprep.mubr.bf16.mxu0 %v6724_v3  ;;  %8469 = vmatpush3.bf16.msra.mxu1 %v9344_v10  ;;  %v6715_v10 = vsel %vm3964_vm13, %v6714_v38, %v6713_v2 }
 0x4e2   :  { %7043 = vmatprep.mubr.bf16.mxu1 %v6912_v31  ;;  %8448 = vmatprep.subr.bf16.mxu0 %v9345_v9  ;;  %v6723_v41 = vpack.c.b16 %v6715_v10, %v6715_v10  ;;  %v6911_v9 = vpack.c.b16 %v6903_v4, %v6903_v4 }
 0x4e3   :  { %8470 = vmatprep.subr.bf16.mxu1 %v9346_v35 }
 0x4e4   :  { %8449 = vmatpush3.bf16.msra.mxu0 %v9347_v33 }
 0x4e5   :  { %8471 = vmatpush3.bf16.msra.mxu1 %v9348_v48  ;;  %8450 = vmatprep.subr.bf16.mxu0 %v9349_v62 }
 0x4e6   :  { %8472 = vmatprep.subr.bf16.mxu1 %v9350_v52 }
 0x4e8   :  { %8451 = vmatpush3.bf16.msra.mxu0 %v9351_v29 }
 0x4e9   :  { %8473 = vmatpush3.bf16.msra.mxu1 %v9352_v20  ;;  %8452 = vmatprep.subr.bf16.mxu0 %v9353_v16 }
 0x4ea   :  { %8474 = vmatprep.subr.bf16.mxu1 %v9354_v37 }
 0x4ec   :  { %8453 = vmatpush3.bf16.msra.mxu0 %v9355_v58 }
 0x4ed   :  { %8475 = vmatpush3.bf16.msra.mxu1 %v9356_v53  ;;  %8454 = vmatprep.subr.bf16.mxu0 %v9357_v17 }
 0x4ee   :  { %8476 = vmatprep.subr.bf16.mxu1 %v9358_v36 }
 0x4f0   :  { %8455 = vmatpush3.bf16.msra.mxu0 %v9359_v23 }
 0x4f1   :  { %8477 = vmatpush3.bf16.msra.mxu1 %v9360_v30  ;;  %8456 = vmatprep.subr.bf16.mxu0 %v9361_v42 }
 0x4f2   :  { %v8154_v1 = vpop.f32.mrb[16].mxu0  ;;  %v8176_v12 = vpop.f32.mrb[16].mxu1  ;;  %8478 = vmatprep.subr.bf16.mxu1 %v9362_v11 }
 0x4f3   :  { %v8155_v8 = vpop.f32.mrb[17].mxu0  ;;  %v8177_v21 = vpop.f32.mrb[17].mxu1 }
 0x4f4   :  { %v8156_v13 = vadd.f32 %v8155_v8, %v8154_v1  ;;  %v8178_v55 = vadd.f32 %v8177_v21, %v8176_v12  ;;  %8457 = vmatpush3.bf16.msra.mxu0 %v9363_v6  ;;  %v8157_v7 = vpop.f32.mrb[18].mxu0  ;;  %v8179_v24 = vpop.f32.mrb[18].mxu1 }
 0x4f5   :  { %8479 = vmatpush3.bf16.msra.mxu1 %v9364_v18  ;;  %v8158_v60 = vpop.f32.mrb[19].mxu0  ;;  %v8180_v61 = vpop.f32.mrb[19].mxu1  ;;  %8458 = vmatprep.subr.bf16.mxu0 %v9365_v49 }
 0x4f6   :  { %v4259_v54 = vadd.f32 %v8178_v55, %v8156_v13  ;;  %8480 = vmatprep.subr.bf16.mxu1 %v9366_v63 }
 0x4f8   :  { %8459 = vmatpush3.bf16.msra.mxu0 %v9367_v56 }
 0x4f9   :  { %8481 = vmatpush3.bf16.msra.mxu1 %v9368_v59  ;;  %8460 = vmatprep.subr.bf16.mxu0 %v9369_v26 }
 0x4fa   :  { %8482 = vmatprep.subr.bf16.mxu1 %v9370_v32 }
 0x4fc   :  { %8461 = vmatpush3.bf16.msra.mxu0 %v9371_v40 }
 0x4fd   :  { %8483 = vmatpush3.bf16.msra.mxu1 %v9372_v44 }
 0x4ff   :  { %6856 = vmatmul.mubr.bf16.vlgmr.msra.gmra.mrb[44].mxu0 %v6723_v41 }
 0x500   :  { %7044 = vmatmul.mubr.bf16.vlgmr.msra.gmra.mrb[44].mxu1 %v6911_v9 }
 0x512   :  { %v8198_v3 = vpop.f32.mrb[20].mxu0  ;;  %v8220_v35 = vpop.f32.mrb[20].mxu1 }
 0x513   :  { %v8199_v31 = vpop.f32.mrb[21].mxu0  ;;  %v8221_v33 = vpop.f32.mrb[21].mxu1 }
 0x514   :  { %v8200_v48 = vadd.f32 %v8199_v31, %v8198_v3  ;;  %v8222_v62 = vadd.f32 %v8221_v33, %v8220_v35  ;;  %v8201_v52 = vpop.f32.mrb[22].mxu0  ;;  %v8223_v29 = vpop.f32.mrb[22].mxu1 }
 0x515   :  { %v8202_v20 = vpop.f32.mrb[23].mxu0  ;;  %v8224_v16 = vpop.f32.mrb[23].mxu1 }
 0x516   :  { %v4473_v37 = vadd.f32 %v8200_v48, %v4259_v54 }
 0x518   :  { %v4659_v58 = vadd.f32 %v8222_v62, %v4473_v37 }
 0x532   :  { %v8242_v53 = vpop.f32.mrb[24].mxu0 }
 0x533   :  { %v8264_v17 = vpop.f32.mrb[24].mxu1  ;;  %v8243_v36 = vpop.f32.mrb[25].mxu0 }
 0x534   :  { %v8244_v57 = vadd.f32 %v8243_v36, %v8242_v53  ;;  %v8265_v14 = vpop.f32.mrb[25].mxu1  ;;  %v8245_v23 = vpop.f32.mrb[26].mxu0 }
 0x535   :  { %v8266_v22 = vadd.f32 %v8265_v14, %v8264_v17  ;;  %v8267_v30 = vpop.f32.mrb[26].mxu1  ;;  %v8246_v42 = vpop.f32.mrb[27].mxu0 }
 0x536   :  { %v4871_v11 = vadd.f32 %v8244_v57, %v4659_v58  ;;  %v8268_v45 = vpop.f32.mrb[27].mxu1  ;;  %v8135_v30 = vld [vmem:[%s12842_s6] ss:$0 sm:$0xff] }
 0x538   :  { %v5059_v51 = vadd.f32 %v8266_v22, %v4871_v11 }
 0x552   :  { %v8286_v50 = vpop.f32.mrb[28].mxu0 }
 0x553   :  { %v8308_v19 = vpop.f32.mrb[28].mxu1  ;;  %v8287_v6 = vpop.f32.mrb[29].mxu0 }
 0x554   :  { %v8288_v18 = vadd.f32 %v8287_v6, %v8286_v50  ;;  %v8309_v49 = vpop.f32.mrb[29].mxu1  ;;  %v8289_v1 = vpop.f32.mrb[30].mxu0 }
 0x555   :  { %v8310_v12 = vadd.f32 %v8309_v49, %v8308_v19  ;;  %v8311_v63 = vpop.f32.mrb[30].mxu1  ;;  %v8290_v27 = vpop.f32.mrb[31].mxu0 }
 0x556   :  { %v5271_v15 = vadd.f32 %v8288_v18, %v5059_v51  ;;  %v8312_v28 = vpop.f32.mrb[31].mxu1 }
 0x558   :  { %v5459_v8 = vadd.f32 %v8310_v12, %v5271_v15  ;;  %v8136_v15 = vld [vmem:[%s12842_s6 + $0x1] ss:$0 sm:$0xff] }
 0x572   :  { %v8330_v21 = vpop.f32.mrb[32].mxu0 }
 0x573   :  { %v8352_v43 = vpop.f32.mrb[32].mxu1  ;;  %v8331_v39 = vpop.f32.mrb[33].mxu0 }
 0x574   :  { %v8332_v25 = vadd.f32 %v8331_v39, %v8330_v21  ;;  %v8353_v13 = vpop.f32.mrb[33].mxu1  ;;  %v8333_v55 = vpop.f32.mrb[34].mxu0 }
 0x575   :  { %v8354_v7 = vadd.f32 %v8353_v13, %v8352_v43  ;;  %v8355_v24 = vpop.f32.mrb[34].mxu1  ;;  %v8334_v56 = vpop.f32.mrb[35].mxu0 }
 0x576   :  { %v5669_v5 = vadd.f32 %v8332_v25, %v5459_v8  ;;  %v8356_v60 = vpop.f32.mrb[35].mxu1  ;;  %v8137_v8 = vld [vmem:[%s12842_s6 + $0x2] ss:$0 sm:$0xff] }
 0x578   :  { %v5855_v61 = vadd.f32 %v8354_v7, %v5669_v5 }
 0x592   :  { %v8374_v59 = vpop.f32.mrb[36].mxu0 }
 0x593   :  { %v8396_v26 = vpop.f32.mrb[36].mxu1  ;;  %v8375_v54 = vpop.f32.mrb[37].mxu0 }
 0x594   :  { %v8376_v32 = vadd.f32 %v8375_v54, %v8374_v59  ;;  %v8397_v46 = vpop.f32.mrb[37].mxu1  ;;  %v8377_v38 = vpop.f32.mrb[38].mxu0 }
 0x595   :  { %v8398_v2 = vadd.f32 %v8397_v46, %v8396_v26  ;;  %v8399_v34 = vpop.f32.mrb[38].mxu1  ;;  %v8378_v47 = vpop.f32.mrb[39].mxu0 }
 0x596   :  { %v6065_v40 = vadd.f32 %v8376_v32, %v5855_v61  ;;  %v8400_v0 = vpop.f32.mrb[39].mxu1 }
 0x598   :  { %v6251_v44 = vadd.f32 %v8398_v2, %v6065_v40 }
 0x5b2   :  { %v8418_v10 = vpop.f32.mrb[40].mxu0 }
 0x5b3   :  { %v8440_v4 = vpop.f32.mrb[40].mxu1  ;;  %v8419_v41 = vpop.f32.mrb[41].mxu0 }
 0x5b4   :  { %v8420_v9 = vadd.f32 %v8419_v41, %v8418_v10  ;;  %v8441_v3 = vpop.f32.mrb[41].mxu1  ;;  %v8421_v35 = vpop.f32.mrb[42].mxu0 }
 0x5b5   :  { %v8442_v31 = vadd.f32 %v8441_v3, %v8440_v4  ;;  %v8443_v33 = vpop.f32.mrb[42].mxu1  ;;  %v8422_v48 = vpop.f32.mrb[43].mxu0 }
 0x5b6   :  { %v6463_v62 = vadd.f32 %v8420_v9, %v6251_v44  ;;  %v8444_v52 = vpop.f32.mrb[43].mxu1 }
 0x5b8   :  { %v6651_v29 = vadd.f32 %v8442_v31, %v6463_v62 }
 0x5d2   :  { %v8462_v20 = vpop.f32.mrb[44].mxu0 }
 0x5d3   :  { %v8484_v16 = vpop.f32.mrb[44].mxu1  ;;  %v8463_v37 = vpop.f32.mrb[45].mxu0 }
 0x5d4   :  { %v8464_v58 = vadd.f32 %v8463_v37, %v8462_v20  ;;  %v8485_v53 = vpop.f32.mrb[45].mxu1  ;;  %v8465_v17 = vpop.f32.mrb[46].mxu0 }
 0x5d5   :  { %v8486_v36 = vadd.f32 %v8485_v53, %v8484_v16  ;;  %v8487_v57 = vpop.f32.mrb[46].mxu1  ;;  %v8466_v14 = vpop.f32.mrb[47].mxu0 }
 0x5d6   :  { %v6863_v23 = vadd.f32 %v8464_v58, %v6651_v29  ;;  %v8488_v22 = vpop.f32.mrb[47].mxu1 }
 0x5d8   :  { %v7051_v42 = vadd.f32 %v8486_v36, %v6863_v23 }
 0x5da   :  { %v7057_v11 = vadd.f32 %v8135_v30, %v7051_v42 }
 0x5dc   :  { %v7058_v45 = vmax.f32 %v7057_v11, 0.0 }
 0x5de   :  { %v7060_v51 = vsel %vm7059_vm10, %v7058_v45, 0.0 }
 0x5df   :  { %7061 = vadd.xlane.f32.xlu1 %v7060_v51 }
 0x66c   :  { %v7062_v50 = vpop.xlane.xlu1 %7061 }
 0x66d   :  { %v7064_v19 = vmul.f32 0.03125, %v7062_v50 }
 0x66f   :  { %v7065_v6 = vsub.f32 %v7058_v45, %v7064_v19 }
 0x671   :  { %v7066_v18 = vmul.f32 %v7065_v6, %v7065_v6 }
 0x673   :  { %v7067_v49 = vsel %vm7059_vm10, %v7066_v18, 0.0 }
 0x674   :  { %7068 = vadd.xlane.f32.xlu0 %v7067_v49 }
 0x701   :  { %v7069_v1 = vpop.xlane.xlu0 %7068 }
 0x702   :  { %v7070_v12 = vmul.f32 0.03125, %v7069_v1 }
 0x704   :  { %v7071_v63 = vadd.f32 1e-05, %v7070_v12 }
 0x706   :  { %9373 = vrsqrt.f32 %v7071_v63 }
 0x710   :  { %v9374_v27 = vpop.eup %9373 }
 0x711   :  { %v7073_v28 = vmul.f32 %v9374_v27, %v7065_v6 }
 0x713   :  { %v7079_v21 = vmul.f32 %v8136_v15, %v7073_v28 }
 0x715   :  { %v7085_v43 = vadd.f32 %v8137_v8, %v7079_v21 }
 0x717   :  { %7086 = vst.msk [vmem:[%s12843_s7] sm:$0xf] %vm7059_vm10, %v7085_v43 }

</bundles_post_ra>
